<compile_context>
chip_gen: v7x
topology: tpu7x:2x2x1
jax: 0.10.0
libtpu: 0.0.40
codegen_flags: <defaults>
</compile_context>

<pallas_src>
import functools

import jax
import jax.numpy as jnp
from jax.experimental import pallas as pl
from jax.experimental.pallas import tpu as pltpu

NEG_SLOPE = 0.2
BN_EPS = 1e-5
KSIZE = 4
LANE = 128


def _round_up(v, m):
    return (v + m - 1) // m * m


# ----------------------------- Pallas kernel --------------------------------

def _conv_fused_kernel(a_ref, w_ref, b_ref, *rest, do_bn, do_leaky, inv_rows):
    """Tiled matmul with fused bias + (optional) BatchNorm + LeakyReLU epilogue.

    Grid = (M_tiles, K_tiles); K (last axis) is the reduction axis and the
    output block stays resident across it.  For BN layers M_tiles == 1 so the
    full (M, Cout) accumulator is available for the batch statistics.
    """
    if do_bn:
        gamma_ref, beta_ref, o_ref, acc_ref = rest
    else:
        o_ref, acc_ref = rest

    k = pl.program_id(1)

    @pl.when(k == 0)
    def _init():
        acc_ref[...] = jnp.zeros_like(acc_ref)

    acc_ref[...] += jnp.dot(a_ref[...], w_ref[...],
                            preferred_element_type=jnp.float32)

    @pl.when(k == pl.num_programs(1) - 1)
    def _epilogue():
        y = acc_ref[...] + b_ref[...]
        if do_bn:
            # training-mode batch statistics over all M rows (centered formula
            # to avoid E[x^2]-E[x]^2 cancellation).
            mean = jnp.sum(y, axis=0, keepdims=True) * inv_rows
            centered = y - mean
            var = jnp.sum(centered * centered, axis=0, keepdims=True) * inv_rows
            y = centered * jax.lax.rsqrt(var + BN_EPS)
            y = y * gamma_ref[...] + beta_ref[...]
        if do_leaky:
            y = jnp.where(y >= 0, y, NEG_SLOPE * y)
        o_ref[...] = y.astype(o_ref.dtype)


def conv_block(x_nhwc, w_mat, bias, gamma=None, beta=None, *,
               stride, do_bn, do_leaky, block_m=None, block_k=512):
    """im2col (JAX glue) + fused Pallas matmul/bias/BN/LeakyReLU."""
    a, (N, OH, OW) = _im2col(x_nhwc, stride)
    M, K = a.shape
    Cout = w_mat.shape[1]

    tk = block_k if K % block_k == 0 else K
    if do_bn or block_m is None or M % block_m != 0:
        bm = M                      # BN needs every row of the batch resident
    else:
        bm = block_m
    grid = (M // bm, K // tk)

    inputs = [a, w_mat, bias]
    in_specs = [
        pl.BlockSpec((bm, tk), lambda i, k: (i, k)),
        pl.BlockSpec((tk, Cout), lambda i, k: (k, 0)),
        pl.BlockSpec((1, Cout), lambda i, k: (0, 0)),
    ]
    if do_bn:
        inputs += [gamma, beta]
        in_specs += [pl.BlockSpec((1, Cout), lambda i, k: (0, 0)),
                     pl.BlockSpec((1, Cout), lambda i, k: (0, 0))]

    kernel = functools.partial(_conv_fused_kernel, do_bn=do_bn,
                               do_leaky=do_leaky, inv_rows=1.0 / M)
    y = pl.pallas_call(
        kernel,
        out_shape=jax.ShapeDtypeStruct((M, Cout), jnp.float32),
        grid=grid,
        in_specs=in_specs,
        out_specs=pl.BlockSpec((bm, Cout), lambda i, k: (i, 0)),
        scratch_shapes=[pltpu.VMEM((bm, Cout), jnp.float32)],
        compiler_params=pltpu.CompilerParams(
            dimension_semantics=("parallel", "arbitrary")),
    )(*inputs)
    return y, (N, OH, OW, Cout)


# ------------------------------ JAX glue -------------------------------------

def _im2col(x_nhwc, stride):
    """(N, H, W, C) -> patch matrix (N*OH*OW, 16*C); 4x4 kernel, padding=1.

    Flattened K order is (kh, kw, cin), matching prepare_params' weight layout.
    """
    N, H, W, C = x_nhwc.shape
    xp = jnp.pad(x_nhwc, ((0, 0), (1, 1), (1, 1), (0, 0)))
    OH = (H + 2 - KSIZE) // stride + 1
    OW = (W + 2 - KSIZE) // stride + 1
    cols = [xp[:, kh:kh + stride * OH:stride, kw:kw + stride * OW:stride, :]
            for kh in range(KSIZE) for kw in range(KSIZE)]
    a = jnp.concatenate(cols, axis=-1)               # (N, OH, OW, 16*C)
    return a.reshape(N * OH * OW, KSIZE * KSIZE * C), (N, OH, OW)


def prepare_params(params):
    """Hoisted one-time weight prep: transpose to (K, Cout) matmul layout,
    zero-pad layer-1 Cin to a multiple of 8 (lane-dense K), zero-pad layer-5
    Cout to 128 lanes (real channel sliced off after the kernel)."""
    prep = {}

    def to_mat(w):  # (Cout, Cin, KH, KW) -> (KH*KW*Cin, Cout)
        cout, cin = w.shape[0], w.shape[1]
        return jnp.transpose(w, (2, 3, 1, 0)).reshape(KSIZE * KSIZE * cin, cout)

    w1 = params["w1"]
    cin1 = w1.shape[1]
    cin1_pad = _round_up(cin1, 8)
    w1 = jnp.pad(w1, ((0, 0), (0, cin1_pad - cin1), (0, 0), (0, 0)))
    prep["w1"] = to_mat(w1)
    prep["b1"] = params["b1"].reshape(1, -1)

    for idx in (2, 3, 4):
        prep[f"w{idx}"] = to_mat(params[f"w{idx}"])
        prep[f"b{idx}"] = params[f"b{idx}"].reshape(1, -1)
        prep[f"gamma{idx}"] = params[f"gamma{idx}"].reshape(1, -1)
        prep[f"beta{idx}"] = params[f"beta{idx}"].reshape(1, -1)

    w5 = to_mat(params["w5"])
    cout5_pad = _round_up(w5.shape[1], LANE)
    prep["w5"] = jnp.pad(w5, ((0, 0), (0, cout5_pad - w5.shape[1])))
    prep["b5"] = jnp.pad(params["b5"].reshape(1, -1),
                         ((0, 0), (0, cout5_pad - params["b5"].shape[0])))
    return prep


def patch_discriminator(x_nchw, prep):
    x = jnp.transpose(x_nchw, (0, 2, 3, 1))            # NCHW -> NHWC
    # zero-pad input channels to match the padded layer-1 weight (6 -> 8).
    cin_pad = prep["w1"].shape[0] // (KSIZE * KSIZE) - x.shape[-1]
    if cin_pad:
        x = jnp.pad(x, ((0, 0), (0, 0), (0, 0), (0, cin_pad)))

    # layer 1: conv(s=2) + LeakyReLU (M tiled / parallel, no BN)
    y, shp = conv_block(x, prep["w1"], prep["b1"],
                        stride=2, do_bn=False, do_leaky=True, block_m=256)
    x = y.reshape(shp)

    # layers 2-4: conv + BatchNorm(batch stats) + LeakyReLU, fully fused
    for idx, stride in ((2, 2), (3, 2), (4, 1)):
        y, shp = conv_block(x, prep[f"w{idx}"], prep[f"b{idx}"],
                            prep[f"gamma{idx}"], prep[f"beta{idx}"],
                            stride=stride, do_bn=True, do_leaky=True)
        x = y.reshape(shp)

    # layer 5: conv(s=1), no activation; Cout lane-padded to 128 in the kernel
    y, shp = conv_block(x, prep["w5"], prep["b5"],
                        stride=1, do_bn=False, do_leaky=False)
    N, OH, OW, _ = shp
    y = y[:, :1].reshape(N, OH, OW, 1)                 # drop lane padding
    return jnp.transpose(y, (0, 3, 1, 2))              # NHWC -> NCHW


# ----------------------------- reference (pure JAX) --------------------------

def reference(x_nchw, params):
    x = jnp.transpose(x_nchw, (0, 2, 3, 1))

    def conv(x, w, b, stride):
        wt = jnp.transpose(w, (2, 3, 1, 0))  # HWIO
        y = jax.lax.conv_general_dilated(
            x, wt, (stride, stride), ((1, 1), (1, 1)),
            dimension_numbers=("NHWC", "HWIO", "NHWC"))
        return y + b.reshape(1, 1, 1, -1)

    def leaky(y):
        return jnp.where(y >= 0, y, NEG_SLOPE * y)

    def bn(y, g, be):
        mean = jnp.mean(y, axis=(0, 1, 2), keepdims=True)
        var = jnp.mean((y - mean) ** 2, axis=(0, 1, 2), keepdims=True)
        return (y - mean) / jnp.sqrt(var + BN_EPS) * g.reshape(1, 1, 1, -1) \
            + be.reshape(1, 1, 1, -1)

    y = leaky(conv(x, params["w1"], params["b1"], 2))
    for idx, s in zip((2, 3, 4), (2, 2, 1)):
        y = leaky(bn(conv(y, params[f"w{idx}"], params[f"b{idx}"], s),
                     params[f"gamma{idx}"], params[f"beta{idx}"]))
    y = conv(y, params["w5"], params["b5"], 1)
    return jnp.transpose(y, (0, 3, 1, 2))


# ----------------------------- params ---------------------------------------

def init_params(key):
    specs = [(64, 6), (128, 64), (256, 128), (512, 256), (1, 512)]
    params = {}
    keys = jax.random.split(key, 2 * len(specs))
    for idx, (cout, cin) in enumerate(specs, start=1):
        fan_in = cin * KSIZE * KSIZE
        scale = 1.0 / jnp.sqrt(jnp.float32(fan_in))
        params[f"w{idx}"] = scale * jax.random.normal(
            keys[2 * (idx - 1)], (cout, cin, KSIZE, KSIZE), jnp.float32)
        params[f"b{idx}"] = scale * jax.random.normal(
            keys[2 * idx - 1], (cout,), jnp.float32)
    for idx in (2, 3, 4):
        c = specs[idx - 1][0]
        params[f"gamma{idx}"] = jnp.ones((c,), jnp.float32)
        params[f"beta{idx}"] = jnp.zeros((c,), jnp.float32)
    return params


# ----------------------------- main ------------------------------------------

if __name__ == "__main__":
    key = jax.random.PRNGKey(0)
    # NCHW input like PyTorch: batch=2, in_channels=6, spatial 32x32
    x = jax.random.normal(key, (2, 6, 32, 32), jnp.float32)
    params = init_params(jax.random.PRNGKey(1))
    prep = prepare_params(params)          # one-time weight layout prep

    fwd = jax.jit(patch_discriminator)
    out = jax.block_until_ready(fwd(x, prep))

    ref = reference(x, params)
    assert out.shape == (2, 1, 2, 2), out.shape
    max_err = float(jnp.max(jnp.abs(out - ref)))
    assert bool(jnp.allclose(out, ref, rtol=1e-3, atol=1e-3)), max_err

    print("KERNEL_OK")
</pallas_src>

<mosaic_0001>
module attributes {stable_mosaic.version = 11 : i64} {
  func.func @_conv_fused_kernel(%arg0: i32, %arg1: i32, %arg2: memref<256x128xf32, #tpu.memory_space<vmem>>, %arg3: memref<128x64xf32, #tpu.memory_space<vmem>>, %arg4: memref<1x64xf32, #tpu.memory_space<vmem>>, %arg5: memref<256x64xf32, #tpu.memory_space<vmem>>, %arg6: memref<256x64xf32, #tpu.memory_space<vmem>>) attributes {dimension_semantics = [#tpu.dimension_semantics<parallel>, #tpu.dimension_semantics<arbitrary>], iteration_bounds = array<i64: 2, 1>, scalar_prefetch = 0 : i64, scratch_operands = 1 : i64, tpu.core_type = #tpu.core_type<tc>, window_params = [{transform_indices = @transform_0, window_bounds = array<i64: 256, 128>}, {transform_indices = @transform_1, window_bounds = array<i64: 128, 64>}, {pipeline_mode = #tpu.pipeline_mode<synchronous>, transform_indices = @transform_2, window_bounds = array<i64: 1, 64>}, {transform_indices = @transform_3, window_bounds = array<i64: 256, 64>}]} {
    %c0_i32 = arith.constant 0 : i32
    %0 = arith.cmpi eq, %arg1, %c0_i32 : i32
    %1 = arith.extui %0 : i1 to i32
    %c0_i32_0 = arith.constant 0 : i32
    %2 = arith.cmpi ne, %1, %c0_i32_0 : i32
    scf.if %2 {
      %cst_10 = arith.constant 0.000000e+00 : f32
      %12 = vector.broadcast %cst_10 : f32 to vector<256x64xf32>
      %c0_11 = arith.constant 0 : index
      %c0_12 = arith.constant 0 : index
      %13 = vector.load %arg6[%c0_11, %c0_12] : memref<256x64xf32, #tpu.memory_space<vmem>>, vector<256x64xf32>
      tpu.vector_store %arg6[%c0_11, %c0_12], %12 {strides = array<i32>} : memref<256x64xf32, #tpu.memory_space<vmem>>, vector<256x64xf32>,
    } else {
    }
    %c0 = arith.constant 0 : index
    %c0_1 = arith.constant 0 : index
    %3 = vector.load %arg6[%c0, %c0_1] : memref<256x64xf32, #tpu.memory_space<vmem>>, vector<256x64xf32>
    %c0_2 = arith.constant 0 : index
    %c0_3 = arith.constant 0 : index
    %4 = vector.load %arg2[%c0_2, %c0_3] : memref<256x128xf32, #tpu.memory_space<vmem>>, vector<256x128xf32>
    %c0_4 = arith.constant 0 : index
    %c0_5 = arith.constant 0 : index
    %5 = vector.load %arg3[%c0_4, %c0_5] : memref<128x64xf32, #tpu.memory_space<vmem>>, vector<128x64xf32>
    %cst = arith.constant dense<0.000000e+00> : vector<256x64xf32>
    %6 = tpu.matmul %4, %5, %cst {dimension_numbers = #tpu.dot_dimension_numbers<[1], [0], [0], [1], [0, 0, 1, 1], [], []>} : vector<256x128xf32>, vector<128x64xf32>, vector<256x64xf32> -> vector<256x64xf32>
    %7 = arith.addf %3, %6 : vector<256x64xf32>
    %c0_6 = arith.constant 0 : index
    %c0_7 = arith.constant 0 : index
    %8 = vector.load %arg6[%c0_6, %c0_7] : memref<256x64xf32, #tpu.memory_space<vmem>>, vector<256x64xf32>
    tpu.vector_store %arg6[%c0_6, %c0_7], %7 {strides = array<i32>} : memref<256x64xf32, #tpu.memory_space<vmem>>, vector<256x64xf32>,
    %c0_i32_8 = arith.constant 0 : i32
    %9 = arith.cmpi eq, %arg1, %c0_i32_8 : i32
    %10 = arith.extui %9 : i1 to i32
    %c0_i32_9 = arith.constant 0 : i32
    %11 = arith.cmpi ne, %10, %c0_i32_9 : i32
    scf.if %11 {
      %c0_10 = arith.constant 0 : index
      %c0_11 = arith.constant 0 : index
      %12 = vector.load %arg6[%c0_10, %c0_11] : memref<256x64xf32, #tpu.memory_space<vmem>>, vector<256x64xf32>
      %c0_12 = arith.constant 0 : index
      %c0_13 = arith.constant 0 : index
      %13 = vector.load %arg4[%c0_12, %c0_13] : memref<1x64xf32, #tpu.memory_space<vmem>>, vector<1x64xf32>
      %14 = vector.broadcast %13 : vector<1x64xf32> to vector<256x64xf32>
      %15 = arith.addf %12, %14 : vector<256x64xf32>
      %cst_14 = arith.constant 0.000000e+00 : f32
      %16 = vector.broadcast %cst_14 : f32 to vector<256x64xf32>
      %17 = arith.cmpf oge, %15, %16 : vector<256x64xf32>
      %cst_15 = arith.constant 2.000000e-01 : f32
      %18 = vector.broadcast %cst_15 : f32 to vector<256x64xf32>
      %19 = arith.mulf %18, %15 : vector<256x64xf32>
      %20 = arith.select %17, %15, %19 : vector<256x64xi1>, vector<256x64xf32>
      %c0_16 = arith.constant 0 : index
      %c0_17 = arith.constant 0 : index
      %21 = vector.load %arg5[%c0_16, %c0_17] : memref<256x64xf32, #tpu.memory_space<vmem>>, vector<256x64xf32>
      tpu.vector_store %arg5[%c0_16, %c0_17], %20 {strides = array<i32>} : memref<256x64xf32, #tpu.memory_space<vmem>>, vector<256x64xf32>,
    } else {
    }
    return
  }
  func.func @transform_0(%arg0: i32, %arg1: i32) -> (i32, i32) {
    %c0_i32 = arith.constant 0 : i32
    return %arg0, %arg1 : i32, i32
  }
  func.func @transform_1(%arg0: i32, %arg1: i32) -> (i32, i32) {
    %c0_i32 = arith.constant 0 : i32
    %c0_i32_0 = arith.constant 0 : i32
    return %arg1, %c0_i32 : i32, i32
  }
  func.func @transform_2(%arg0: i32, %arg1: i32) -> (i32, i32) {
    %c0_i32 = arith.constant 0 : i32
    %c0_i32_0 = arith.constant 0 : i32
    %c0_i32_1 = arith.constant 0 : i32
    return %c0_i32, %c0_i32_0 : i32, i32
  }
  func.func @transform_3(%arg0: i32, %arg1: i32) -> (i32, i32) {
    %c0_i32 = arith.constant 0 : i32
    %c0_i32_0 = arith.constant 0 : i32
    return %arg0, %c0_i32 : i32, i32
  }
}

module attributes {stable_mosaic.version = 11 : i64} {
  func.func @_conv_fused_kernel(%arg0: i32, %arg1: i32, %arg2: memref<128x512xf32, #tpu.memory_space<vmem>>, %arg3: memref<512x128xf32, #tpu.memory_space<vmem>>, %arg4: memref<1x128xf32, #tpu.memory_space<vmem>>, %arg5: memref<1x128xf32, #tpu.memory_space<vmem>>, %arg6: memref<1x128xf32, #tpu.memory_space<vmem>>, %arg7: memref<128x128xf32, #tpu.memory_space<vmem>>, %arg8: memref<128x128xf32, #tpu.memory_space<vmem>>) attributes {dimension_semantics = [#tpu.dimension_semantics<parallel>, #tpu.dimension_semantics<arbitrary>], iteration_bounds = array<i64: 1, 2>, scalar_prefetch = 0 : i64, scratch_operands = 1 : i64, tpu.core_type = #tpu.core_type<tc>, window_params = [{transform_indices = @transform_0, window_bounds = array<i64: 128, 512>}, {transform_indices = @transform_1, window_bounds = array<i64: 512, 128>}, {pipeline_mode = #tpu.pipeline_mode<synchronous>, transform_indices = @transform_2, window_bounds = array<i64: 1, 128>}, {pipeline_mode = #tpu.pipeline_mode<synchronous>, transform_indices = @transform_3, window_bounds = array<i64: 1, 128>}, {pipeline_mode = #tpu.pipeline_mode<synchronous>, transform_indices = @transform_4, window_bounds = array<i64: 1, 128>}, {transform_indices = @transform_5, window_bounds = array<i64: 128, 128>}]} {
    %c0_i32 = arith.constant 0 : i32
    %0 = arith.cmpi eq, %arg1, %c0_i32 : i32
    %1 = arith.extui %0 : i1 to i32
    %c0_i32_0 = arith.constant 0 : i32
    %2 = arith.cmpi ne, %1, %c0_i32_0 : i32
    scf.if %2 {
      %cst_9 = arith.constant 0.000000e+00 : f32
      %12 = vector.broadcast %cst_9 : f32 to vector<128x128xf32>
      %c0_10 = arith.constant 0 : index
      %c0_11 = arith.constant 0 : index
      %13 = vector.load %arg8[%c0_10, %c0_11] : memref<128x128xf32, #tpu.memory_space<vmem>>, vector<128x128xf32>
      tpu.vector_store %arg8[%c0_10, %c0_11], %12 {strides = array<i32>} : memref<128x128xf32, #tpu.memory_space<vmem>>, vector<128x128xf32>,
    } else {
    }
    %c0 = arith.constant 0 : index
    %c0_1 = arith.constant 0 : index
    %3 = vector.load %arg8[%c0, %c0_1] : memref<128x128xf32, #tpu.memory_space<vmem>>, vector<128x128xf32>
    %c0_2 = arith.constant 0 : index
    %c0_3 = arith.constant 0 : index
    %4 = vector.load %arg2[%c0_2, %c0_3] : memref<128x512xf32, #tpu.memory_space<vmem>>, vector<128x512xf32>
    %c0_4 = arith.constant 0 : index
    %c0_5 = arith.constant 0 : index
    %5 = vector.load %arg3[%c0_4, %c0_5] : memref<512x128xf32, #tpu.memory_space<vmem>>, vector<512x128xf32>
    %cst = arith.constant dense<0.000000e+00> : vector<128x128xf32>
    %6 = tpu.matmul %4, %5, %cst {dimension_numbers = #tpu.dot_dimension_numbers<[1], [0], [0], [1], [0, 0, 1, 1], [], []>} : vector<128x512xf32>, vector<512x128xf32>, vector<128x128xf32> -> vector<128x128xf32>
    %7 = arith.addf %3, %6 : vector<128x128xf32>
    %c0_6 = arith.constant 0 : index
    %c0_7 = arith.constant 0 : index
    %8 = vector.load %arg8[%c0_6, %c0_7] : memref<128x128xf32, #tpu.memory_space<vmem>>, vector<128x128xf32>
    tpu.vector_store %arg8[%c0_6, %c0_7], %7 {strides = array<i32>} : memref<128x128xf32, #tpu.memory_space<vmem>>, vector<128x128xf32>,
    %c1_i32 = arith.constant 1 : i32
    %9 = arith.cmpi eq, %arg1, %c1_i32 : i32
    %10 = arith.extui %9 : i1 to i32
    %c0_i32_8 = arith.constant 0 : i32
    %11 = arith.cmpi ne, %10, %c0_i32_8 : i32
    scf.if %11 {
      %c0_9 = arith.constant 0 : index
      %c0_10 = arith.constant 0 : index
      %12 = vector.load %arg8[%c0_9, %c0_10] : memref<128x128xf32, #tpu.memory_space<vmem>>, vector<128x128xf32>
      %c0_11 = arith.constant 0 : index
      %c0_12 = arith.constant 0 : index
      %13 = vector.load %arg4[%c0_11, %c0_12] : memref<1x128xf32, #tpu.memory_space<vmem>>, vector<1x128xf32>
      %14 = vector.broadcast %13 : vector<1x128xf32> to vector<128x128xf32>
      %15 = arith.addf %12, %14 : vector<128x128xf32>
      %cst_13 = arith.constant dense<0.000000e+00> : vector<128xf32>
      %16 = vector.multi_reduction <add>, %15, %cst_13 [0] : vector<128x128xf32> to vector<128xf32>
      %17 = vector.shape_cast %16 : vector<128xf32> to vector<1x128xf32>
      %cst_14 = arith.constant 7.812500e-03 : f32
      %18 = vector.broadcast %cst_14 : f32 to vector<1x128xf32>
      %19 = arith.mulf %17, %18 : vector<1x128xf32>
      %20 = vector.broadcast %19 : vector<1x128xf32> to vector<128x128xf32>
      %21 = arith.subf %15, %20 : vector<128x128xf32>
      %22 = arith.mulf %21, %21 : vector<128x128xf32>
      %cst_15 = arith.constant dense<0.000000e+00> : vector<128xf32>
      %23 = vector.multi_reduction <add>, %22, %cst_15 [0] : vector<128x128xf32> to vector<128xf32>
      %24 = vector.shape_cast %23 : vector<128xf32> to vector<1x128xf32>
      %cst_16 = arith.constant 7.812500e-03 : f32
      %25 = vector.broadcast %cst_16 : f32 to vector<1x128xf32>
      %26 = arith.mulf %24, %25 : vector<1x128xf32>
      %cst_17 = arith.constant 9.99999974E-6 : f32
      %27 = vector.broadcast %cst_17 : f32 to vector<1x128xf32>
      %28 = arith.addf %26, %27 : vector<1x128xf32>
      %29 = math.rsqrt %28 : vector<1x128xf32>
      %30 = vector.broadcast %29 : vector<1x128xf32> to vector<128x128xf32>
      %31 = arith.mulf %21, %30 : vector<128x128xf32>
      %c0_18 = arith.constant 0 : index
      %c0_19 = arith.constant 0 : index
      %32 = vector.load %arg5[%c0_18, %c0_19] : memref<1x128xf32, #tpu.memory_space<vmem>>, vector<1x128xf32>
      %33 = vector.broadcast %32 : vector<1x128xf32> to vector<128x128xf32>
      %34 = arith.mulf %31, %33 : vector<128x128xf32>
      %c0_20 = arith.constant 0 : index
      %c0_21 = arith.constant 0 : index
      %35 = vector.load %arg6[%c0_20, %c0_21] : memref<1x128xf32, #tpu.memory_space<vmem>>, vector<1x128xf32>
      %36 = vector.broadcast %35 : vector<1x128xf32> to vector<128x128xf32>
      %37 = arith.addf %34, %36 : vector<128x128xf32>
      %cst_22 = arith.constant 0.000000e+00 : f32
      %38 = vector.broadcast %cst_22 : f32 to vector<128x128xf32>
      %39 = arith.cmpf oge, %37, %38 : vector<128x128xf32>
      %cst_23 = arith.constant 2.000000e-01 : f32
      %40 = vector.broadcast %cst_23 : f32 to vector<128x128xf32>
      %41 = arith.mulf %40, %37 : vector<128x128xf32>
      %42 = arith.select %39, %37, %41 : vector<128x128xi1>, vector<128x128xf32>
      %c0_24 = arith.constant 0 : index
      %c0_25 = arith.constant 0 : index
      %43 = vector.load %arg7[%c0_24, %c0_25] : memref<128x128xf32, #tpu.memory_space<vmem>>, vector<128x128xf32>
      tpu.vector_store %arg7[%c0_24, %c0_25], %42 {strides = array<i32>} : memref<128x128xf32, #tpu.memory_space<vmem>>, vector<128x128xf32>,
    } else {
    }
    return
  }
  func.func @transform_0(%arg0: i32, %arg1: i32) -> (i32, i32) {
    %c0_i32 = arith.constant 0 : i32
    return %arg0, %arg1 : i32, i32
  }
  func.func @transform_1(%arg0: i32, %arg1: i32) -> (i32, i32) {
    %c0_i32 = arith.constant 0 : i32
    %c0_i32_0 = arith.constant 0 : i32
    return %arg1, %c0_i32 : i32, i32
  }
  func.func @transform_2(%arg0: i32, %arg1: i32) -> (i32, i32) {
    %c0_i32 = arith.constant 0 : i32
    %c0_i32_0 = arith.constant 0 : i32
    %c0_i32_1 = arith.constant 0 : i32
    return %c0_i32, %c0_i32_0 : i32, i32
  }
  func.func @transform_3(%arg0: i32, %arg1: i32) -> (i32, i32) {
    %c0_i32 = arith.constant 0 : i32
    %c0_i32_0 = arith.constant 0 : i32
    %c0_i32_1 = arith.constant 0 : i32
    return %c0_i32, %c0_i32_0 : i32, i32
  }
  func.func @transform_4(%arg0: i32, %arg1: i32) -> (i32, i32) {
    %c0_i32 = arith.constant 0 : i32
    %c0_i32_0 = arith.constant 0 : i32
    %c0_i32_1 = arith.constant 0 : i32
    return %c0_i32, %c0_i32_0 : i32, i32
  }
  func.func @transform_5(%arg0: i32, %arg1: i32) -> (i32, i32) {
    %c0_i32 = arith.constant 0 : i32
    %c0_i32_0 = arith.constant 0 : i32
    return %arg0, %c0_i32 : i32, i32
  }
}

module attributes {stable_mosaic.version = 11 : i64} {
  func.func @_conv_fused_kernel(%arg0: i32, %arg1: i32, %arg2: memref<32x512xf32, #tpu.memory_space<vmem>>, %arg3: memref<512x256xf32, #tpu.memory_space<vmem>>, %arg4: memref<1x256xf32, #tpu.memory_space<vmem>>, %arg5: memref<1x256xf32, #tpu.memory_space<vmem>>, %arg6: memref<1x256xf32, #tpu.memory_space<vmem>>, %arg7: memref<32x256xf32, #tpu.memory_space<vmem>>, %arg8: memref<32x256xf32, #tpu.memory_space<vmem>>) attributes {dimension_semantics = [#tpu.dimension_semantics<parallel>, #tpu.dimension_semantics<arbitrary>], iteration_bounds = array<i64: 1, 4>, scalar_prefetch = 0 : i64, scratch_operands = 1 : i64, tpu.core_type = #tpu.core_type<tc>, window_params = [{transform_indices = @transform_0, window_bounds = array<i64: 32, 512>}, {transform_indices = @transform_1, window_bounds = array<i64: 512, 256>}, {pipeline_mode = #tpu.pipeline_mode<synchronous>, transform_indices = @transform_2, window_bounds = array<i64: 1, 256>}, {pipeline_mode = #tpu.pipeline_mode<synchronous>, transform_indices = @transform_3, window_bounds = array<i64: 1, 256>}, {pipeline_mode = #tpu.pipeline_mode<synchronous>, transform_indices = @transform_4, window_bounds = array<i64: 1, 256>}, {transform_indices = @transform_5, window_bounds = array<i64: 32, 256>}]} {
    %c0_i32 = arith.constant 0 : i32
    %0 = arith.cmpi eq, %arg1, %c0_i32 : i32
    %1 = arith.extui %0 : i1 to i32
    %c0_i32_0 = arith.constant 0 : i32
    %2 = arith.cmpi ne, %1, %c0_i32_0 : i32
    scf.if %2 {
      %cst_9 = arith.constant 0.000000e+00 : f32
      %12 = vector.broadcast %cst_9 : f32 to vector<32x256xf32>
      %c0_10 = arith.constant 0 : index
      %c0_11 = arith.constant 0 : index
      %13 = vector.load %arg8[%c0_10, %c0_11] : memref<32x256xf32, #tpu.memory_space<vmem>>, vector<32x256xf32>
      tpu.vector_store %arg8[%c0_10, %c0_11], %12 {strides = array<i32>} : memref<32x256xf32, #tpu.memory_space<vmem>>, vector<32x256xf32>,
    } else {
    }
    %c0 = arith.constant 0 : index
    %c0_1 = arith.constant 0 : index
    %3 = vector.load %arg8[%c0, %c0_1] : memref<32x256xf32, #tpu.memory_space<vmem>>, vector<32x256xf32>
    %c0_2 = arith.constant 0 : index
    %c0_3 = arith.constant 0 : index
    %4 = vector.load %arg2[%c0_2, %c0_3] : memref<32x512xf32, #tpu.memory_space<vmem>>, vector<32x512xf32>
    %c0_4 = arith.constant 0 : index
    %c0_5 = arith.constant 0 : index
    %5 = vector.load %arg3[%c0_4, %c0_5] : memref<512x256xf32, #tpu.memory_space<vmem>>, vector<512x256xf32>
    %cst = arith.constant dense<0.000000e+00> : vector<32x256xf32>
    %6 = tpu.matmul %4, %5, %cst {dimension_numbers = #tpu.dot_dimension_numbers<[1], [0], [0], [1], [0, 0, 1, 1], [], []>} : vector<32x512xf32>, vector<512x256xf32>, vector<32x256xf32> -> vector<32x256xf32>
    %7 = arith.addf %3, %6 : vector<32x256xf32>
    %c0_6 = arith.constant 0 : index
    %c0_7 = arith.constant 0 : index
    %8 = vector.load %arg8[%c0_6, %c0_7] : memref<32x256xf32, #tpu.memory_space<vmem>>, vector<32x256xf32>
    tpu.vector_store %arg8[%c0_6, %c0_7], %7 {strides = array<i32>} : memref<32x256xf32, #tpu.memory_space<vmem>>, vector<32x256xf32>,
    %c3_i32 = arith.constant 3 : i32
    %9 = arith.cmpi eq, %arg1, %c3_i32 : i32
    %10 = arith.extui %9 : i1 to i32
    %c0_i32_8 = arith.constant 0 : i32
    %11 = arith.cmpi ne, %10, %c0_i32_8 : i32
    scf.if %11 {
      %c0_9 = arith.constant 0 : index
      %c0_10 = arith.constant 0 : index
      %12 = vector.load %arg8[%c0_9, %c0_10] : memref<32x256xf32, #tpu.memory_space<vmem>>, vector<32x256xf32>
      %c0_11 = arith.constant 0 : index
      %c0_12 = arith.constant 0 : index
      %13 = vector.load %arg4[%c0_11, %c0_12] : memref<1x256xf32, #tpu.memory_space<vmem>>, vector<1x256xf32>
      %14 = vector.broadcast %13 : vector<1x256xf32> to vector<32x256xf32>
      %15 = arith.addf %12, %14 : vector<32x256xf32>
      %cst_13 = arith.constant dense<0.000000e+00> : vector<256xf32>
      %16 = vector.multi_reduction <add>, %15, %cst_13 [0] : vector<32x256xf32> to vector<256xf32>
      %17 = vector.shape_cast %16 : vector<256xf32> to vector<1x256xf32>
      %cst_14 = arith.constant 3.125000e-02 : f32
      %18 = vector.broadcast %cst_14 : f32 to vector<1x256xf32>
      %19 = arith.mulf %17, %18 : vector<1x256xf32>
      %20 = vector.broadcast %19 : vector<1x256xf32> to vector<32x256xf32>
      %21 = arith.subf %15, %20 : vector<32x256xf32>
      %22 = arith.mulf %21, %21 : vector<32x256xf32>
      %cst_15 = arith.constant dense<0.000000e+00> : vector<256xf32>
      %23 = vector.multi_reduction <add>, %22, %cst_15 [0] : vector<32x256xf32> to vector<256xf32>
      %24 = vector.shape_cast %23 : vector<256xf32> to vector<1x256xf32>
      %cst_16 = arith.constant 3.125000e-02 : f32
      %25 = vector.broadcast %cst_16 : f32 to vector<1x256xf32>
      %26 = arith.mulf %24, %25 : vector<1x256xf32>
      %cst_17 = arith.constant 9.99999974E-6 : f32
      %27 = vector.broadcast %cst_17 : f32 to vector<1x256xf32>
      %28 = arith.addf %26, %27 : vector<1x256xf32>
      %29 = math.rsqrt %28 : vector<1x256xf32>
      %30 = vector.broadcast %29 : vector<1x256xf32> to vector<32x256xf32>
      %31 = arith.mulf %21, %30 : vector<32x256xf32>
      %c0_18 = arith.constant 0 : index
      %c0_19 = arith.constant 0 : index
      %32 = vector.load %arg5[%c0_18, %c0_19] : memref<1x256xf32, #tpu.memory_space<vmem>>, vector<1x256xf32>
      %33 = vector.broadcast %32 : vector<1x256xf32> to vector<32x256xf32>
      %34 = arith.mulf %31, %33 : vector<32x256xf32>
      %c0_20 = arith.constant 0 : index
      %c0_21 = arith.constant 0 : index
      %35 = vector.load %arg6[%c0_20, %c0_21] : memref<1x256xf32, #tpu.memory_space<vmem>>, vector<1x256xf32>
      %36 = vector.broadcast %35 : vector<1x256xf32> to vector<32x256xf32>
      %37 = arith.addf %34, %36 : vector<32x256xf32>
      %cst_22 = arith.constant 0.000000e+00 : f32
      %38 = vector.broadcast %cst_22 : f32 to vector<32x256xf32>
      %39 = arith.cmpf oge, %37, %38 : vector<32x256xf32>
      %cst_23 = arith.constant 2.000000e-01 : f32
      %40 = vector.broadcast %cst_23 : f32 to vector<32x256xf32>
      %41 = arith.mulf %40, %37 : vector<32x256xf32>
      %42 = arith.select %39, %37, %41 : vector<32x256xi1>, vector<32x256xf32>
      %c0_24 = arith.constant 0 : index
      %c0_25 = arith.constant 0 : index
      %43 = vector.load %arg7[%c0_24, %c0_25] : memref<32x256xf32, #tpu.memory_space<vmem>>, vector<32x256xf32>
      tpu.vector_store %arg7[%c0_24, %c0_25], %42 {strides = array<i32>} : memref<32x256xf32, #tpu.memory_space<vmem>>, vector<32x256xf32>,
    } else {
    }
    return
  }
  func.func @transform_0(%arg0: i32, %arg1: i32) -> (i32, i32) {
    %c0_i32 = arith.constant 0 : i32
    return %arg0, %arg1 : i32, i32
  }
  func.func @transform_1(%arg0: i32, %arg1: i32) -> (i32, i32) {
    %c0_i32 = arith.constant 0 : i32
    %c0_i32_0 = arith.constant 0 : i32
    return %arg1, %c0_i32 : i32, i32
  }
  func.func @transform_2(%arg0: i32, %arg1: i32) -> (i32, i32) {
    %c0_i32 = arith.constant 0 : i32
    %c0_i32_0 = arith.constant 0 : i32
    %c0_i32_1 = arith.constant 0 : i32
    return %c0_i32, %c0_i32_0 : i32, i32
  }
  func.func @transform_3(%arg0: i32, %arg1: i32) -> (i32, i32) {
    %c0_i32 = arith.constant 0 : i32
    %c0_i32_0 = arith.constant 0 : i32
    %c0_i32_1 = arith.constant 0 : i32
    return %c0_i32, %c0_i32_0 : i32, i32
  }
  func.func @transform_4(%arg0: i32, %arg1: i32) -> (i32, i32) {
    %c0_i32 = arith.constant 0 : i32
    %c0_i32_0 = arith.constant 0 : i32
    %c0_i32_1 = arith.constant 0 : i32
    return %c0_i32, %c0_i32_0 : i32, i32
  }
  func.func @transform_5(%arg0: i32, %arg1: i32) -> (i32, i32) {
    %c0_i32 = arith.constant 0 : i32
    %c0_i32_0 = arith.constant 0 : i32
    return %arg0, %c0_i32 : i32, i32
  }
}

module attributes {stable_mosaic.version = 11 : i64} {
  func.func @_conv_fused_kernel(%arg0: i32, %arg1: i32, %arg2: memref<18x512xf32, #tpu.memory_space<vmem>>, %arg3: memref<512x512xf32, #tpu.memory_space<vmem>>, %arg4: memref<1x512xf32, #tpu.memory_space<vmem>>, %arg5: memref<1x512xf32, #tpu.memory_space<vmem>>, %arg6: memref<1x512xf32, #tpu.memory_space<vmem>>, %arg7: memref<18x512xf32, #tpu.memory_space<vmem>>, %arg8: memref<18x512xf32, #tpu.memory_space<vmem>>) attributes {dimension_semantics = [#tpu.dimension_semantics<parallel>, #tpu.dimension_semantics<arbitrary>], iteration_bounds = array<i64: 1, 8>, scalar_prefetch = 0 : i64, scratch_operands = 1 : i64, tpu.core_type = #tpu.core_type<tc>, window_params = [{transform_indices = @transform_0, window_bounds = array<i64: 18, 512>}, {transform_indices = @transform_1, window_bounds = array<i64: 512, 512>}, {pipeline_mode = #tpu.pipeline_mode<synchronous>, transform_indices = @transform_2, window_bounds = array<i64: 1, 512>}, {pipeline_mode = #tpu.pipeline_mode<synchronous>, transform_indices = @transform_3, window_bounds = array<i64: 1, 512>}, {pipeline_mode = #tpu.pipeline_mode<synchronous>, transform_indices = @transform_4, window_bounds = array<i64: 1, 512>}, {transform_indices = @transform_5, window_bounds = array<i64: 18, 512>}]} {
    %c0_i32 = arith.constant 0 : i32
    %0 = arith.cmpi eq, %arg1, %c0_i32 : i32
    %1 = arith.extui %0 : i1 to i32
    %c0_i32_0 = arith.constant 0 : i32
    %2 = arith.cmpi ne, %1, %c0_i32_0 : i32
    scf.if %2 {
      %cst_9 = arith.constant 0.000000e+00 : f32
      %12 = vector.broadcast %cst_9 : f32 to vector<18x512xf32>
      %c0_10 = arith.constant 0 : index
      %c0_11 = arith.constant 0 : index
      %13 = vector.load %arg8[%c0_10, %c0_11] : memref<18x512xf32, #tpu.memory_space<vmem>>, vector<18x512xf32>
      tpu.vector_store %arg8[%c0_10, %c0_11], %12 {strides = array<i32>} : memref<18x512xf32, #tpu.memory_space<vmem>>, vector<18x512xf32>,
    } else {
    }
    %c0 = arith.constant 0 : index
    %c0_1 = arith.constant 0 : index
    %3 = vector.load %arg8[%c0, %c0_1] : memref<18x512xf32, #tpu.memory_space<vmem>>, vector<18x512xf32>
    %c0_2 = arith.constant 0 : index
    %c0_3 = arith.constant 0 : index
    %4 = vector.load %arg2[%c0_2, %c0_3] : memref<18x512xf32, #tpu.memory_space<vmem>>, vector<18x512xf32>
    %c0_4 = arith.constant 0 : index
    %c0_5 = arith.constant 0 : index
    %5 = vector.load %arg3[%c0_4, %c0_5] : memref<512x512xf32, #tpu.memory_space<vmem>>, vector<512x512xf32>
    %cst = arith.constant dense<0.000000e+00> : vector<18x512xf32>
    %6 = tpu.matmul %4, %5, %cst {dimension_numbers = #tpu.dot_dimension_numbers<[1], [0], [0], [1], [0, 0, 1, 1], [], []>} : vector<18x512xf32>, vector<512x512xf32>, vector<18x512xf32> -> vector<18x512xf32>
    %7 = arith.addf %3, %6 : vector<18x512xf32>
    %c0_6 = arith.constant 0 : index
    %c0_7 = arith.constant 0 : index
    %8 = vector.load %arg8[%c0_6, %c0_7] : memref<18x512xf32, #tpu.memory_space<vmem>>, vector<18x512xf32>
    tpu.vector_store %arg8[%c0_6, %c0_7], %7 {strides = array<i32>} : memref<18x512xf32, #tpu.memory_space<vmem>>, vector<18x512xf32>,
    %c7_i32 = arith.constant 7 : i32
    %9 = arith.cmpi eq, %arg1, %c7_i32 : i32
    %10 = arith.extui %9 : i1 to i32
    %c0_i32_8 = arith.constant 0 : i32
    %11 = arith.cmpi ne, %10, %c0_i32_8 : i32
    scf.if %11 {
      %c0_9 = arith.constant 0 : index
      %c0_10 = arith.constant 0 : index
      %12 = vector.load %arg8[%c0_9, %c0_10] : memref<18x512xf32, #tpu.memory_space<vmem>>, vector<18x512xf32>
      %c0_11 = arith.constant 0 : index
      %c0_12 = arith.constant 0 : index
      %13 = vector.load %arg4[%c0_11, %c0_12] : memref<1x512xf32, #tpu.memory_space<vmem>>, vector<1x512xf32>
      %14 = vector.broadcast %13 : vector<1x512xf32> to vector<18x512xf32>
      %15 = arith.addf %12, %14 : vector<18x512xf32>
      %cst_13 = arith.constant dense<0.000000e+00> : vector<512xf32>
      %16 = vector.multi_reduction <add>, %15, %cst_13 [0] : vector<18x512xf32> to vector<512xf32>
      %17 = vector.shape_cast %16 : vector<512xf32> to vector<1x512xf32>
      %cst_14 = arith.constant 0.055555556 : f32
      %18 = vector.broadcast %cst_14 : f32 to vector<1x512xf32>
      %19 = arith.mulf %17, %18 : vector<1x512xf32>
      %20 = vector.broadcast %19 : vector<1x512xf32> to vector<18x512xf32>
      %21 = arith.subf %15, %20 : vector<18x512xf32>
      %22 = arith.mulf %21, %21 : vector<18x512xf32>
      %cst_15 = arith.constant dense<0.000000e+00> : vector<512xf32>
      %23 = vector.multi_reduction <add>, %22, %cst_15 [0] : vector<18x512xf32> to vector<512xf32>
      %24 = vector.shape_cast %23 : vector<512xf32> to vector<1x512xf32>
      %cst_16 = arith.constant 0.055555556 : f32
      %25 = vector.broadcast %cst_16 : f32 to vector<1x512xf32>
      %26 = arith.mulf %24, %25 : vector<1x512xf32>
      %cst_17 = arith.constant 9.99999974E-6 : f32
      %27 = vector.broadcast %cst_17 : f32 to vector<1x512xf32>
      %28 = arith.addf %26, %27 : vector<1x512xf32>
      %29 = math.rsqrt %28 : vector<1x512xf32>
      %30 = vector.broadcast %29 : vector<1x512xf32> to vector<18x512xf32>
      %31 = arith.mulf %21, %30 : vector<18x512xf32>
      %c0_18 = arith.constant 0 : index
      %c0_19 = arith.constant 0 : index
      %32 = vector.load %arg5[%c0_18, %c0_19] : memref<1x512xf32, #tpu.memory_space<vmem>>, vector<1x512xf32>
      %33 = vector.broadcast %32 : vector<1x512xf32> to vector<18x512xf32>
      %34 = arith.mulf %31, %33 : vector<18x512xf32>
      %c0_20 = arith.constant 0 : index
      %c0_21 = arith.constant 0 : index
      %35 = vector.load %arg6[%c0_20, %c0_21] : memref<1x512xf32, #tpu.memory_space<vmem>>, vector<1x512xf32>
      %36 = vector.broadcast %35 : vector<1x512xf32> to vector<18x512xf32>
      %37 = arith.addf %34, %36 : vector<18x512xf32>
      %cst_22 = arith.constant 0.000000e+00 : f32
      %38 = vector.broadcast %cst_22 : f32 to vector<18x512xf32>
      %39 = arith.cmpf oge, %37, %38 : vector<18x512xf32>
      %cst_23 = arith.constant 2.000000e-01 : f32
      %40 = vector.broadcast %cst_23 : f32 to vector<18x512xf32>
      %41 = arith.mulf %40, %37 : vector<18x512xf32>
      %42 = arith.select %39, %37, %41 : vector<18x512xi1>, vector<18x512xf32>
      %c0_24 = arith.constant 0 : index
      %c0_25 = arith.constant 0 : index
      %43 = vector.load %arg7[%c0_24, %c0_25] : memref<18x512xf32, #tpu.memory_space<vmem>>, vector<18x512xf32>
      tpu.vector_store %arg7[%c0_24, %c0_25], %42 {strides = array<i32>} : memref<18x512xf32, #tpu.memory_space<vmem>>, vector<18x512xf32>,
    } else {
    }
    return
  }
  func.func @transform_0(%arg0: i32, %arg1: i32) -> (i32, i32) {
    %c0_i32 = arith.constant 0 : i32
    return %arg0, %arg1 : i32, i32
  }
  func.func @transform_1(%arg0: i32, %arg1: i32) -> (i32, i32) {
    %c0_i32 = arith.constant 0 : i32
    %c0_i32_0 = arith.constant 0 : i32
    return %arg1, %c0_i32 : i32, i32
  }
  func.func @transform_2(%arg0: i32, %arg1: i32) -> (i32, i32) {
    %c0_i32 = arith.constant 0 : i32
    %c0_i32_0 = arith.constant 0 : i32
    %c0_i32_1 = arith.constant 0 : i32
    return %c0_i32, %c0_i32_0 : i32, i32
  }
  func.func @transform_3(%arg0: i32, %arg1: i32) -> (i32, i32) {
    %c0_i32 = arith.constant 0 : i32
    %c0_i32_0 = arith.constant 0 : i32
    %c0_i32_1 = arith.constant 0 : i32
    return %c0_i32, %c0_i32_0 : i32, i32
  }
  func.func @transform_4(%arg0: i32, %arg1: i32) -> (i32, i32) {
    %c0_i32 = arith.constant 0 : i32
    %c0_i32_0 = arith.constant 0 : i32
    %c0_i32_1 = arith.constant 0 : i32
    return %c0_i32, %c0_i32_0 : i32, i32
  }
  func.func @transform_5(%arg0: i32, %arg1: i32) -> (i32, i32) {
    %c0_i32 = arith.constant 0 : i32
    %c0_i32_0 = arith.constant 0 : i32
    return %arg0, %c0_i32 : i32, i32
  }
}

module attributes {stable_mosaic.version = 11 : i64} {
  func.func @_conv_fused_kernel(%arg0: i32, %arg1: i32, %arg2: memref<8x512xf32, #tpu.memory_space<vmem>>, %arg3: memref<512x128xf32, #tpu.memory_space<vmem>>, %arg4: memref<1x128xf32, #tpu.memory_space<vmem>>, %arg5: memref<8x128xf32, #tpu.memory_space<vmem>>, %arg6: memref<8x128xf32, #tpu.memory_space<vmem>>) attributes {dimension_semantics = [#tpu.dimension_semantics<parallel>, #tpu.dimension_semantics<arbitrary>], iteration_bounds = array<i64: 1, 16>, scalar_prefetch = 0 : i64, scratch_operands = 1 : i64, tpu.core_type = #tpu.core_type<tc>, window_params = [{transform_indices = @transform_0, window_bounds = array<i64: 8, 512>}, {transform_indices = @transform_1, window_bounds = array<i64: 512, 128>}, {pipeline_mode = #tpu.pipeline_mode<synchronous>, transform_indices = @transform_2, window_bounds = array<i64: 1, 128>}, {transform_indices = @transform_3, window_bounds = array<i64: 8, 128>}]} {
    %c0_i32 = arith.constant 0 : i32
    %0 = arith.cmpi eq, %arg1, %c0_i32 : i32
    %1 = arith.extui %0 : i1 to i32
    %c0_i32_0 = arith.constant 0 : i32
    %2 = arith.cmpi ne, %1, %c0_i32_0 : i32
    scf.if %2 {
      %cst_9 = arith.constant 0.000000e+00 : f32
      %12 = vector.broadcast %cst_9 : f32 to vector<8x128xf32>
      %c0_10 = arith.constant 0 : index
      %c0_11 = arith.constant 0 : index
      %13 = vector.load %arg6[%c0_10, %c0_11] : memref<8x128xf32, #tpu.memory_space<vmem>>, vector<8x128xf32>
      tpu.vector_store %arg6[%c0_10, %c0_11], %12 {strides = array<i32>} : memref<8x128xf32, #tpu.memory_space<vmem>>, vector<8x128xf32>,
    } else {
    }
    %c0 = arith.constant 0 : index
    %c0_1 = arith.constant 0 : index
    %3 = vector.load %arg6[%c0, %c0_1] : memref<8x128xf32, #tpu.memory_space<vmem>>, vector<8x128xf32>
    %c0_2 = arith.constant 0 : index
    %c0_3 = arith.constant 0 : index
    %4 = vector.load %arg2[%c0_2, %c0_3] : memref<8x512xf32, #tpu.memory_space<vmem>>, vector<8x512xf32>
    %c0_4 = arith.constant 0 : index
    %c0_5 = arith.constant 0 : index
    %5 = vector.load %arg3[%c0_4, %c0_5] : memref<512x128xf32, #tpu.memory_space<vmem>>, vector<512x128xf32>
    %cst = arith.constant dense<0.000000e+00> : vector<8x128xf32>
    %6 = tpu.matmul %4, %5, %cst {dimension_numbers = #tpu.dot_dimension_numbers<[1], [0], [0], [1], [0, 0, 1, 1], [], []>} : vector<8x512xf32>, vector<512x128xf32>, vector<8x128xf32> -> vector<8x128xf32>
    %7 = arith.addf %3, %6 : vector<8x128xf32>
    %c0_6 = arith.constant 0 : index
    %c0_7 = arith.constant 0 : index
    %8 = vector.load %arg6[%c0_6, %c0_7] : memref<8x128xf32, #tpu.memory_space<vmem>>, vector<8x128xf32>
    tpu.vector_store %arg6[%c0_6, %c0_7], %7 {strides = array<i32>} : memref<8x128xf32, #tpu.memory_space<vmem>>, vector<8x128xf32>,
    %c15_i32 = arith.constant 15 : i32
    %9 = arith.cmpi eq, %arg1, %c15_i32 : i32
    %10 = arith.extui %9 : i1 to i32
    %c0_i32_8 = arith.constant 0 : i32
    %11 = arith.cmpi ne, %10, %c0_i32_8 : i32
    scf.if %11 {
      %c0_9 = arith.constant 0 : index
      %c0_10 = arith.constant 0 : index
      %12 = vector.load %arg6[%c0_9, %c0_10] : memref<8x128xf32, #tpu.memory_space<vmem>>, vector<8x128xf32>
      %c0_11 = arith.constant 0 : index
      %c0_12 = arith.constant 0 : index
      %13 = vector.load %arg4[%c0_11, %c0_12] : memref<1x128xf32, #tpu.memory_space<vmem>>, vector<1x128xf32>
      %14 = vector.broadcast %13 : vector<1x128xf32> to vector<8x128xf32>
      %15 = arith.addf %12, %14 : vector<8x128xf32>
      %c0_13 = arith.constant 0 : index
      %c0_14 = arith.constant 0 : index
      %16 = vector.load %arg5[%c0_13, %c0_14] : memref<8x128xf32, #tpu.memory_space<vmem>>, vector<8x128xf32>
      tpu.vector_store %arg5[%c0_13, %c0_14], %15 {strides = array<i32>} : memref<8x128xf32, #tpu.memory_space<vmem>>, vector<8x128xf32>,
    } else {
    }
    return
  }
  func.func @transform_0(%arg0: i32, %arg1: i32) -> (i32, i32) {
    %c0_i32 = arith.constant 0 : i32
    return %arg0, %arg1 : i32, i32
  }
  func.func @transform_1(%arg0: i32, %arg1: i32) -> (i32, i32) {
    %c0_i32 = arith.constant 0 : i32
    %c0_i32_0 = arith.constant 0 : i32
    return %arg1, %c0_i32 : i32, i32
  }
  func.func @transform_2(%arg0: i32, %arg1: i32) -> (i32, i32) {
    %c0_i32 = arith.constant 0 : i32
    %c0_i32_0 = arith.constant 0 : i32
    %c0_i32_1 = arith.constant 0 : i32
    return %c0_i32, %c0_i32_0 : i32, i32
  }
  func.func @transform_3(%arg0: i32, %arg1: i32) -> (i32, i32) {
    %c0_i32 = arith.constant 0 : i32
    %c0_i32_0 = arith.constant 0 : i32
    return %arg0, %c0_i32 : i32, i32
  }
}

</mosaic_0001>

<bundles_post_ra>
// kernel: patch_discriminator.5
= control target key start
LH: loop header
LB: loop body
LE: loop exit
PB: predicated region body
PF: predicated region fallthrough
CT: control target
= control target key end

     0   :  { %s1170_s12 = smov 0   ;;  %s1172_s13 = smov 0   ;;  %s1476_s0 = inlined_call_operand.vmem [shape: f32[512,128], index: 0, kind: input, shape index: {}]   ;;  %s1477_s1 = inlined_call_operand.vmem [shape: f32[128,64], index: 1, kind: input, shape index: {}]   ;;  %s1478_s2 = inlined_call_operand.vmem [shape: f32[1,64], index: 2, kind: input, shape index: {}]   ;;  %s1479_s3 = inlined_call_operand.vmem [shape: f32[512,64], index: 3, kind: output, shape index: {}]  }
   0x1   :  { %s1174_s14 = smov 0  }
   0x2 LB: > { %s25_s15 = sadd.s32 1, %s1143_s13  ;;  %p916_p0 = scmp.ge.s32.totalorder %s1147_s14, 1  ;;  %s1147_s14 = sphi %s1174_s14, %s13_s14   ;;  %s1143_s13 = sphi %s1172_s13, %s1482_s13   ;;  %s1139_s12 = sphi %s1170_s12, %s1481_s12  }
   0x3   : > { %p27_p1 = scmp.ge.s32.totalorder %s25_s15, 2  ;;  %p166_p2 = scmp.lt.s32.totalorder %s1147_s14, 3 }
   0x5   : > { %s1484_s15 = smov (%p27_p1, %s25_s15), 0  ;;  %p167_p3 = pnand %p916_p0, %p166_p2 }
   0x6   : > { %v320_v0 = vld [vmem:[%s1477_s1] sm:$0xff] (!%p167_p3)  ;;  %v321_v1 = vld [vmem:[%s1477_s1 + $0x8] sm:$0xff] (!%p167_p3)  ;;  %v322_v2 = vld [vmem:[%s1477_s1 + $0x10] sm:$0xff] (!%p167_p3)  ;;  %s917_s22 = sshll.u32 (!%p167_p3), %s1139_s12, 5  ;;  %vm223_vm0 = vcmask (!%p167_p3), 523264   ;;  %v1149_v5 = vmov (!%p167_p3), 0.0  }
   0x7   : > { %170 = sbr.rel (%p167_p3) target bundleno = 307 (0x133), region = 32  ;;  %v1052_v3 = vpack.c.bf16 (!%p167_p3), %v321_v1, %v320_v0  ;;  %v323_v4 = vld [vmem:[%s1477_s1 + $0x18] sm:$0xff] (!%p167_p3)  ;;  %p1205_p4 = scmp.lt.s32.totalorder (!%p167_p3), %s917_s22, 63  ;;  %225 = vst.msk [vmem:[#allocation2 + $0x8] sm:$0xff] (!%p167_p3), %vm223_vm0, %v1149_v5  ;;  %224 = vst.msk [vmem:[#allocation2] sm:$0xff] (!%p167_p3), %vm223_vm0, %v1149_v5  ;;  %v324_v7 = vld [vmem:[%s1477_s1 + $0x20] sm:$0xff] (!%p167_p3) }
   0x8   : > { %226 = vst.msk [vmem:[#allocation2 + $0x10] sm:$0xff] (!%p167_p3), %vm223_vm0, %v1149_v5  ;;  %227 = vst.msk [vmem:[#allocation2 + $0x18] sm:$0xff] (!%p167_p3), %vm223_vm0, %v1149_v5  ;;  %v1056_v6 = vpack.c.bf16 (!%p167_p3), %v323_v4, %v322_v2  ;;  %v325_v8 = vld [vmem:[%s1477_s1 + $0x28] sm:$0xff] (!%p167_p3)  ;;  %v326_v10 = vld [vmem:[%s1477_s1 + $0x30] sm:$0xff] (!%p167_p3) }
   0x9   : > { %228 = vst.msk [vmem:[#allocation2 + $0x20] sm:$0xff] (!%p167_p3), %vm223_vm0, %v1149_v5  ;;  %229 = vst.msk [vmem:[#allocation2 + $0x28] sm:$0xff] (!%p167_p3), %vm223_vm0, %v1149_v5  ;;  %1053 = vmatprep.subr.bf16.mxu0 (!%p167_p3), %v1052_v3  ;;  %1084 = vmatprep.subr.bf16.mxu1 (!%p167_p3), %v1052_v3  ;;  %v1060_v9 = vpack.c.bf16 (!%p167_p3), %v325_v8, %v324_v7  ;;  %v327_v11 = vld [vmem:[%s1477_s1 + $0x38] sm:$0xff] (!%p167_p3)  ;;  %v328_v15 = vld [vmem:[%s1477_s1 + $0x40] sm:$0xff] (!%p167_p3) }
   0xa   : > { %230 = vst.msk [vmem:[#allocation2 + $0x30] sm:$0xff] (!%p167_p3), %vm223_vm0, %v1149_v5  ;;  %231 = vst.msk [vmem:[#allocation2 + $0x38] sm:$0xff] (!%p167_p3), %vm223_vm0, %v1149_v5  ;;  %1055 = vmatpush3.bf16.msra.mxu0 (!%p167_p3), %v1052_v3  ;;  %1092 = vmatpush3.bf16.msra.mxu1 (!%p167_p3), %v1052_v3  ;;  %v1064_v14 = vpack.c.bf16 (!%p167_p3), %v327_v11, %v326_v10  ;;  %v329_v16 = vld [vmem:[%s1477_s1 + $0x48] sm:$0xff] (!%p167_p3)  ;;  %v330_v18 = vld [vmem:[%s1477_s1 + $0x50] sm:$0xff] (!%p167_p3) }
   0xb   : > { %232 = vst.msk [vmem:[#allocation2 + $0x40] sm:$0xff] (!%p167_p3), %vm223_vm0, %v1149_v5  ;;  %233 = vst.msk [vmem:[#allocation2 + $0x48] sm:$0xff] (!%p167_p3), %vm223_vm0, %v1149_v5  ;;  %1057 = vmatprep.subr.bf16.mxu0 (!%p167_p3), %v1056_v6  ;;  %1085 = vmatprep.subr.bf16.mxu1 (!%p167_p3), %v1056_v6  ;;  %v1068_v17 = vpack.c.bf16 (!%p167_p3), %v329_v16, %v328_v15  ;;  %v331_v19 = vld [vmem:[%s1477_s1 + $0x58] sm:$0xff] (!%p167_p3)  ;;  %v332_v21 = vld [vmem:[%s1477_s1 + $0x60] sm:$0xff] (!%p167_p3) }
   0xc   : > { %234 = vst.msk [vmem:[#allocation2 + $0x50] sm:$0xff] (!%p167_p3), %vm223_vm0, %v1149_v5  ;;  %235 = vst.msk [vmem:[#allocation2 + $0x58] sm:$0xff] (!%p167_p3), %vm223_vm0, %v1149_v5  ;;  %v1072_v20 = vpack.c.bf16 (!%p167_p3), %v331_v19, %v330_v18  ;;  %v333_v22 = vld [vmem:[%s1477_s1 + $0x68] sm:$0xff] (!%p167_p3)  ;;  %v334_v24 = vld [vmem:[%s1477_s1 + $0x70] sm:$0xff] (!%p167_p3) }
   0xd   : > { %236 = vst.msk [vmem:[#allocation2 + $0x60] sm:$0xff] (!%p167_p3), %vm223_vm0, %v1149_v5  ;;  %237 = vst.msk [vmem:[#allocation2 + $0x68] sm:$0xff] (!%p167_p3), %vm223_vm0, %v1149_v5  ;;  %v1076_v23 = vpack.c.bf16 (!%p167_p3), %v333_v22, %v332_v21  ;;  %v335_v25 = vld [vmem:[%s1477_s1 + $0x78] sm:$0xff] (!%p167_p3)  ;;  %v1332_v21 = vld [vmem:[%s1478_s2] ss:$0 sm:$0xff] (!%p167_p3) }
   0xe   : > { %238 = vst.msk [vmem:[#allocation2 + $0x70] sm:$0xff] %vm223_vm0, %v1149_v5  ;;  %239 = vst.msk [vmem:[#allocation2 + $0x78] sm:$0xff] %vm223_vm0, %v1149_v5  ;;  %s1486_s22 = smov (!%p1205_p4, %s917_s22), 63  ;;  %1059 = vmatpush3.bf16.msra.mxu0 %v1056_v6  ;;  %1093 = vmatpush3.bf16.msra.mxu1 %v1056_v6  ;;  %v1080_v26 = vpack.c.bf16 %v335_v25, %v334_v24  ;;  %v257_v57 = vld [vmem:[#allocation2 + $0x8] sm:$0xff]  ;;  %v256_v59 = vld [vmem:[#allocation2] sm:$0xff] }
   0xf   : > { %240 = vst.msk [vmem:[#allocation2 + $0x80] sm:$0xff] %vm223_vm0, %v1149_v5  ;;  %241 = vst.msk [vmem:[#allocation2 + $0x88] sm:$0xff] %vm223_vm0, %v1149_v5  ;;  %s918_s30 = sshll.u32 %s1486_s22, 3  ;;  %1061 = vmatprep.subr.bf16.mxu0 %v1060_v9  ;;  %1086 = vmatprep.subr.bf16.mxu1 %v1060_v9  ;;  %v258_v7 = vld [vmem:[#allocation2 + $0x10] sm:$0xff] }
  0x10   : > { %242 = vst.msk [vmem:[#allocation2 + $0x90] sm:$0xff] %vm223_vm0, %v1149_v5  ;;  %243 = vst.msk [vmem:[#allocation2 + $0x98] sm:$0xff] %vm223_vm0, %v1149_v5  ;;  %s1265_s10 = scalar_lea.vmem %s1476_s0, %s918_s30  ;;  %v260_v19 = vld [vmem:[#allocation2 + $0x20] sm:$0xff]  ;;  %s1349_s9 = scalar_lea.vmem %s1479_s3, %s918_s30 }
  0x11   : > { %244 = vst.msk [vmem:[#allocation2 + $0xa0] sm:$0xff] %vm223_vm0, %v1149_v5  ;;  %245 = vst.msk [vmem:[#allocation2 + $0xa8] sm:$0xff] %vm223_vm0, %v1149_v5  ;;  %v288_v12 = vld [vmem:[%s1265_s10] sm:$0xff]  ;;  %v289_v27 = vld [vmem:[%s1265_s10 + $0x8] sm:$0xff] }
  0x12   : > { %246 = vst.msk [vmem:[#allocation2 + $0xb0] sm:$0xff] %vm223_vm0, %v1149_v5  ;;  %247 = vst.msk [vmem:[#allocation2 + $0xb8] sm:$0xff] %vm223_vm0, %v1149_v5  ;;  %v304_v13 = vld [vmem:[%s1265_s10 + $0x80] sm:$0xff]  ;;  %1004 = vmatprep.mubr.f32.mxu0 %v288_v12  ;;  %1063 = vmatpush3.bf16.msra.mxu0 %v1060_v9  ;;  %v305_v28 = vld [vmem:[%s1265_s10 + $0x88] sm:$0xff] }
  0x13   : > { %248 = vst.msk [vmem:[#allocation2 + $0xc0] sm:$0xff] %vm223_vm0, %v1149_v5  ;;  %249 = vst.msk [vmem:[#allocation2 + $0xc8] sm:$0xff] %vm223_vm0, %v1149_v5  ;;  %1028 = vmatprep.mubr.f32.mxu1 %v304_v13  ;;  %1094 = vmatpush3.bf16.msra.mxu1 %v1060_v9  ;;  %v290_v29 = vld [vmem:[%s1265_s10 + $0x10] sm:$0xff]  ;;  %v291_v31 = vld [vmem:[%s1265_s10 + $0x18] sm:$0xff] }
  0x14   : > { %250 = vst.msk [vmem:[#allocation2 + $0xd0] sm:$0xff] %vm223_vm0, %v1149_v5  ;;  %251 = vst.msk [vmem:[#allocation2 + $0xd8] sm:$0xff] %vm223_vm0, %v1149_v5  ;;  %1065 = vmatprep.subr.bf16.mxu0 %v1064_v14  ;;  %1087 = vmatprep.subr.bf16.mxu1 %v1064_v14  ;;  %v306_v30 = vld [vmem:[%s1265_s10 + $0x90] sm:$0xff]  ;;  %v307_v32 = vld [vmem:[%s1265_s10 + $0x98] sm:$0xff] }
  0x15   : > { %252 = vst.msk [vmem:[#allocation2 + $0xe0] sm:$0xff] %vm223_vm0, %v1149_v5  ;;  %253 = vst.msk [vmem:[#allocation2 + $0xe8] sm:$0xff] %vm223_vm0, %v1149_v5  ;;  %v292_v33 = vld [vmem:[%s1265_s10 + $0x20] sm:$0xff]  ;;  %v293_v35 = vld [vmem:[%s1265_s10 + $0x28] sm:$0xff] }
  0x16   : > { %254 = vst.msk [vmem:[#allocation2 + $0xf0] sm:$0xff] %vm223_vm0, %v1149_v5  ;;  %255 = vst.msk [vmem:[#allocation2 + $0xf8] sm:$0xff] %vm223_vm0, %v1149_v5  ;;  %1067 = vmatpush3.bf16.msra.mxu0 %v1064_v14  ;;  %v308_v34 = vld [vmem:[%s1265_s10 + $0xa0] sm:$0xff]  ;;  %v309_v36 = vld [vmem:[%s1265_s10 + $0xa8] sm:$0xff] }
  0x17   : > { %1095 = vmatpush3.bf16.msra.mxu1 %v1064_v14  ;;  %1069 = vmatprep.subr.bf16.mxu0 %v1068_v17  ;;  %v294_v37 = vld [vmem:[%s1265_s10 + $0x30] sm:$0xff]  ;;  %v295_v39 = vld [vmem:[%s1265_s10 + $0x38] sm:$0xff]  ;;  %v296_v41 = vld [vmem:[%s1265_s10 + $0x40] sm:$0xff] }
  0x18   : > { %1088 = vmatprep.subr.bf16.mxu1 %v1068_v17  ;;  %v310_v38 = vld [vmem:[%s1265_s10 + $0xb0] sm:$0xff]  ;;  %v311_v40 = vld [vmem:[%s1265_s10 + $0xb8] sm:$0xff]  ;;  %v312_v42 = vld [vmem:[%s1265_s10 + $0xc0] sm:$0xff] }
  0x19   : > { %v297_v43 = vld [vmem:[%s1265_s10 + $0x48] sm:$0xff]  ;;  %v298_v45 = vld [vmem:[%s1265_s10 + $0x50] sm:$0xff]  ;;  %v299_v47 = vld [vmem:[%s1265_s10 + $0x58] sm:$0xff] }
  0x1a   : > { %1071 = vmatpush3.bf16.msra.mxu0 %v1068_v17  ;;  %v313_v44 = vld [vmem:[%s1265_s10 + $0xc8] sm:$0xff]  ;;  %v314_v46 = vld [vmem:[%s1265_s10 + $0xd0] sm:$0xff]  ;;  %v315_v48 = vld [vmem:[%s1265_s10 + $0xd8] sm:$0xff] }
  0x1b   : > { %1096 = vmatpush3.bf16.msra.mxu1 %v1068_v17  ;;  %1073 = vmatprep.subr.bf16.mxu0 %v1072_v20  ;;  %v300_v49 = vld [vmem:[%s1265_s10 + $0x60] sm:$0xff]  ;;  %v301_v51 = vld [vmem:[%s1265_s10 + $0x68] sm:$0xff]  ;;  %v302_v53 = vld [vmem:[%s1265_s10 + $0x70] sm:$0xff] }
  0x1c   : > { %1089 = vmatprep.subr.bf16.mxu1 %v1072_v20  ;;  %v316_v50 = vld [vmem:[%s1265_s10 + $0xe0] sm:$0xff]  ;;  %v317_v52 = vld [vmem:[%s1265_s10 + $0xe8] sm:$0xff]  ;;  %v318_v54 = vld [vmem:[%s1265_s10 + $0xf0] sm:$0xff] }
  0x1d   : > { %v303_v55 = vld [vmem:[%s1265_s10 + $0x78] sm:$0xff]  ;;  %v273_v58 = vld [vmem:[#allocation2 + $0x88] sm:$0xff]  ;;  %v272_v60 = vld [vmem:[#allocation2 + $0x80] sm:$0xff] }
  0x1e   : > { %1075 = vmatpush3.bf16.msra.mxu0 %v1072_v20  ;;  %v319_v56 = vld [vmem:[%s1265_s10 + $0xf8] sm:$0xff]  ;;  %v274_v8 = vld [vmem:[#allocation2 + $0x90] sm:$0xff]  ;;  %v261_v17 = vld [vmem:[#allocation2 + $0x28] sm:$0xff] }
  0x1f   : > { %1097 = vmatpush3.bf16.msra.mxu1 %v1072_v20  ;;  %1077 = vmatprep.subr.bf16.mxu0 %v1076_v23  ;;  %v259_v5 = vld [vmem:[#allocation2 + $0x18] sm:$0xff]  ;;  %v277_v18 = vld [vmem:[#allocation2 + $0xa8] sm:$0xff]  ;;  %v276_v20 = vld [vmem:[#allocation2 + $0xa0] sm:$0xff] }
  0x20   : > { %1090 = vmatprep.subr.bf16.mxu1 %v1076_v23  ;;  %v275_v6 = vld [vmem:[#allocation2 + $0x98] sm:$0xff] }
  0x22   : > { %1079 = vmatpush3.bf16.msra.mxu0 %v1076_v23 }
  0x23   : > { %1098 = vmatpush3.bf16.msra.mxu1 %v1076_v23  ;;  %1081 = vmatprep.subr.bf16.mxu0 %v1080_v26 }
  0x24   : > { %1091 = vmatprep.subr.bf16.mxu1 %v1080_v26 }
  0x26   : > { %1083 = vmatpush3.bf16.msra.mxu0 %v1080_v26 }
  0x27   : > { %1099 = vmatpush3.bf16.msra.mxu1 %v1080_v26 }
  0x29   : > { %1005 = vmatmul.mubr.f32.vlgmr.msra.gmra.mrb[0].mxu0 %v289_v27 }
  0x2a   : > { %1029 = vmatmul.mubr.f32.vlgmr.msra.gmra.mrb[0].mxu1 %v305_v28  ;;  %1007 = vmatprep.mubr.f32.mxu0 %v290_v29 }
  0x2b   : > { %1031 = vmatprep.mubr.f32.mxu1 %v306_v30 }
  0x2d   : > { %1008 = vmatmul.mubr.f32.gmra.mrb[2].mxu0 %v291_v31 }
  0x2e   : > { %1032 = vmatmul.mubr.f32.gmra.mrb[2].mxu1 %v307_v32  ;;  %1010 = vmatprep.mubr.f32.mxu0 %v292_v33 }
  0x2f   : > { %1034 = vmatprep.mubr.f32.mxu1 %v308_v34 }
  0x31   : > { %1011 = vmatmul.mubr.f32.gmra.mrb[4].mxu0 %v293_v35 }
  0x32   : > { %1035 = vmatmul.mubr.f32.gmra.mrb[4].mxu1 %v309_v36  ;;  %1013 = vmatprep.mubr.f32.mxu0 %v294_v37  ;;  %v263_v36 = vld [vmem:[#allocation2 + $0x38] sm:$0xff] }
  0x33   : > { %1037 = vmatprep.mubr.f32.mxu1 %v310_v38 }
  0x35   : > { %1014 = vmatmul.mubr.f32.gmra.mrb[6].mxu0 %v295_v39 }
  0x36   : > { %1038 = vmatmul.mubr.f32.gmra.mrb[6].mxu1 %v311_v40  ;;  %1016 = vmatprep.mubr.f32.mxu0 %v296_v41  ;;  %v279_v40 = vld [vmem:[#allocation2 + $0xb8] sm:$0xff] }
  0x37   : > { %1040 = vmatprep.mubr.f32.mxu1 %v312_v42  ;;  %v262_v42 = vld [vmem:[#allocation2 + $0x30] sm:$0xff] }
  0x39   : > { %1017 = vmatmul.mubr.f32.gmra.mrb[8].mxu0 %v297_v43  ;;  %v278_v43 = vld [vmem:[#allocation2 + $0xb0] sm:$0xff] }
  0x3a   : > { %1041 = vmatmul.mubr.f32.gmra.mrb[8].mxu1 %v313_v44  ;;  %1019 = vmatprep.mubr.f32.mxu0 %v298_v45 }
  0x3b   : > { %1043 = vmatprep.mubr.f32.mxu1 %v314_v46 }
  0x3d   : > { %1020 = vmatmul.mubr.f32.gmra.mrb[10].mxu0 %v299_v47 }
  0x3e   : > { %1044 = vmatmul.mubr.f32.gmra.mrb[10].mxu1 %v315_v48  ;;  %1022 = vmatprep.mubr.f32.mxu0 %v300_v49 }
  0x3f   : > { %1046 = vmatprep.mubr.f32.mxu1 %v316_v50 }
  0x41   : > { %1023 = vmatmul.mubr.f32.gmra.mrb[12].mxu0 %v301_v51 }
  0x42   : > { %1047 = vmatmul.mubr.f32.gmra.mrb[12].mxu1 %v317_v52  ;;  %1025 = vmatprep.mubr.f32.mxu0 %v302_v53 }
  0x43   : > { %1049 = vmatprep.mubr.f32.mxu1 %v318_v54 }
  0x45   : > { %1026 = vmatmul.mubr.f32.gmra.mrb[14].mxu0 %v303_v55 }
  0x46   : > { %1050 = vmatmul.mubr.f32.gmra.mrb[14].mxu1 %v319_v56 }
  0xfc   : > { %v1006_v61 = vpop.f32.mrb[0].mxu0 }
  0xfd   : > { %v1030_v62 = vpop.f32.mrb[0].mxu1  ;;  %v562_v63 = vadd.f32 %v1006_v61, %v257_v57  ;;  %v402_v1 = vpop.f32.mrb[1].mxu0 }
  0xfe   : > { %v578_v0 = vadd.f32 %v1030_v62, %v273_v58  ;;  %v482_v2 = vpop.f32.mrb[1].mxu1  ;;  %v561_v3 = vadd.f32 %v402_v1, %v256_v59  ;;  %v265_v62 = vld [vmem:[#allocation2 + $0x48] sm:$0xff] }
  0xff   : > { %v577_v4 = vadd.f32 %v482_v2, %v272_v60  ;;  %595 = vst.msk [vmem:[#allocation2 + $0x8] sm:$0xff] %vm223_vm0, %v562_v63 }
 0x100   : > { %611 = vst.msk [vmem:[#allocation2 + $0x88] sm:$0xff] %vm223_vm0, %v578_v0  ;;  %594 = vst.msk [vmem:[#allocation2] sm:$0xff] %vm223_vm0, %v561_v3  ;;  %v1009_v9 = vpop.f32.mrb[2].mxu0 }
 0x101   : > { %610 = vst.msk [vmem:[#allocation2 + $0x80] sm:$0xff] %vm223_vm0, %v577_v4  ;;  %v1033_v10 = vpop.f32.mrb[2].mxu1  ;;  %v564_v11 = vadd.f32 %v1009_v9, %v259_v5  ;;  %v412_v13 = vpop.f32.mrb[3].mxu0  ;;  %v281_v5 = vld [vmem:[#allocation2 + $0xc8] sm:$0xff] }
 0x102   : > { %v580_v12 = vadd.f32 %v1033_v10, %v275_v6  ;;  %v492_v14 = vpop.f32.mrb[3].mxu1  ;;  %v563_v15 = vadd.f32 %v412_v13, %v258_v7  ;;  %v264_v6 = vld [vmem:[#allocation2 + $0x40] sm:$0xff] }
 0x103   : > { %v579_v16 = vadd.f32 %v492_v14, %v274_v8  ;;  %597 = vst.msk [vmem:[#allocation2 + $0x18] sm:$0xff] %vm223_vm0, %v564_v11  ;;  %v280_v8 = vld [vmem:[#allocation2 + $0xc0] sm:$0xff] }
 0x104   : > { %613 = vst.msk [vmem:[#allocation2 + $0x98] sm:$0xff] %vm223_vm0, %v580_v12  ;;  %596 = vst.msk [vmem:[#allocation2 + $0x10] sm:$0xff] %vm223_vm0, %v563_v15  ;;  %v1012_v22 = vpop.f32.mrb[4].mxu0 }
 0x105   : > { %612 = vst.msk [vmem:[#allocation2 + $0x90] sm:$0xff] %vm223_vm0, %v579_v16  ;;  %v1036_v23 = vpop.f32.mrb[4].mxu1  ;;  %v566_v24 = vadd.f32 %v1012_v22, %v261_v17  ;;  %v422_v26 = vpop.f32.mrb[5].mxu0 }
 0x106   : > { %v582_v25 = vadd.f32 %v1036_v23, %v277_v18  ;;  %v502_v27 = vpop.f32.mrb[5].mxu1  ;;  %v630_v28 = vld [vmem:[#allocation2 + $0x8] sm:$0xff]  ;;  %v565_v30 = vadd.f32 %v422_v26, %v260_v19 }
 0x107   : > { %v646_v29 = vld [vmem:[#allocation2 + $0x88] sm:$0xff]  ;;  %v581_v31 = vadd.f32 %v502_v27, %v276_v20  ;;  %v669_v32 = vadd.f32 %v1332_v21, %v630_v28  ;;  %v629_v34 = vld [vmem:[#allocation2] sm:$0xff]  ;;  %599 = vst.msk [vmem:[#allocation2 + $0x28] sm:$0xff] %vm223_vm0, %v566_v24 }
 0x108   : > { %v685_v33 = vadd.f32 %v1332_v21, %v646_v29  ;;  %v645_v35 = vld [vmem:[#allocation2 + $0x80] sm:$0xff]  ;;  %615 = vst.msk [vmem:[#allocation2 + $0xa8] sm:$0xff] %vm223_vm0, %v582_v25  ;;  %v668_v37 = vadd.f32 %v1332_v21, %v629_v34  ;;  %598 = vst.msk [vmem:[#allocation2 + $0x20] sm:$0xff] %vm223_vm0, %v565_v30  ;;  %v1015_v39 = vpop.f32.mrb[6].mxu0  ;;  %v267_v29 = vld [vmem:[#allocation2 + $0x58] sm:$0xff] }
 0x109   : > { %v684_v38 = vadd.f32 %v1332_v21, %v645_v35  ;;  %614 = vst.msk [vmem:[#allocation2 + $0xa0] sm:$0xff] %vm223_vm0, %v581_v31  ;;  %v1039_v41 = vpop.f32.mrb[6].mxu1  ;;  %vm701_vm1 = vcmp.ge.f32.partialorder %v669_v32, 0.0  ;;  %v733_v44 = vmul.f32 0.2, %v669_v32  ;;  %v568_v53 = vadd.f32 %v1015_v39, %v263_v36  ;;  %v432_v55 = vpop.f32.mrb[7].mxu0 }
 0x10a   : > { %vm717_vm2 = vcmp.ge.f32.partialorder %v685_v33, 0.0  ;;  %v749_v45 = vmul.f32 0.2, %v685_v33  ;;  %vm700_vm3 = vcmp.ge.f32.partialorder %v668_v37, 0.0  ;;  %v732_v46 = vmul.f32 0.2, %v668_v37 }
 0x10b   : > { %vm716_vm4 = vcmp.ge.f32.partialorder %v684_v38, 0.0  ;;  %v748_v47 = vmul.f32 0.2, %v684_v38  ;;  %v765_v48 = vsel %vm701_vm1, %v669_v32, %v733_v44  ;;  %v632_v50 = vld [vmem:[#allocation2 + $0x18] sm:$0xff]  ;;  %v631_v52 = vld [vmem:[#allocation2 + $0x10] sm:$0xff]  ;;  %v584_v54 = vadd.f32 %v1039_v41, %v279_v40  ;;  %v512_v56 = vpop.f32.mrb[7].mxu1 }
 0x10c   : > { %v781_v49 = vsel %vm717_vm2, %v685_v33, %v749_v45  ;;  %v648_v51 = vld [vmem:[#allocation2 + $0x98] sm:$0xff]  ;;  %797 = vst.msk [vmem:[%s1349_s9 + $0x8] sm:$0xff] %vm223_vm0, %v765_v48  ;;  %v764_v57 = vsel %vm700_vm3, %v668_v37, %v732_v46  ;;  %v671_v59 = vadd.f32 %v1332_v21, %v632_v50  ;;  %v647_v61 = vld [vmem:[#allocation2 + $0x90] sm:$0xff]  ;;  %v1018_v63 = vpop.f32.mrb[8].mxu0  ;;  %v670_v1 = vadd.f32 %v1332_v21, %v631_v52 }
 0x10d   : > { %813 = vst.msk [vmem:[%s1349_s9 + $0x88] sm:$0xff] %vm223_vm0, %v781_v49  ;;  %v780_v58 = vsel %vm716_vm4, %v684_v38, %v748_v47  ;;  %v687_v60 = vadd.f32 %v1332_v21, %v648_v51  ;;  %v1042_v0 = vpop.f32.mrb[8].mxu1  ;;  %796 = vst.msk [vmem:[%s1349_s9] sm:$0xff] %vm223_vm0, %v764_v57  ;;  %v686_v2 = vadd.f32 %v1332_v21, %v647_v61  ;;  %v442_v7 = vpop.f32.mrb[9].mxu0  ;;  %v283_v36 = vld [vmem:[#allocation2 + $0xd8] sm:$0xff]  ;;  %v266_v37 = vld [vmem:[#allocation2 + $0x50] sm:$0xff] }
 0x10e   : > { %812 = vst.msk [vmem:[%s1349_s9 + $0x80] sm:$0xff] %vm223_vm0, %v780_v58  ;;  %601 = vst.msk [vmem:[#allocation2 + $0x38] sm:$0xff] %vm223_vm0, %v568_v53  ;;  %v567_v3 = vadd.f32 %v432_v55, %v262_v42  ;;  %v583_v4 = vadd.f32 %v512_v56, %v278_v43  ;;  %v522_v9 = vpop.f32.mrb[9].mxu1  ;;  %vm703_vm5 = vcmp.ge.f32.partialorder %v671_v59, 0.0  ;;  %v735_v10 = vmul.f32 0.2, %v671_v59 }
 0x10f   : > { %617 = vst.msk [vmem:[#allocation2 + $0xb8] sm:$0xff] %vm223_vm0, %v584_v54  ;;  %vm719_vm6 = vcmp.ge.f32.partialorder %v687_v60, 0.0  ;;  %v751_v11 = vmul.f32 0.2, %v687_v60  ;;  %vm702_vm7 = vcmp.ge.f32.partialorder %v670_v1, 0.0  ;;  %vm718_vm8 = vcmp.ge.f32.partialorder %v686_v2, 0.0 }
 0x110   : > { %v734_v12 = vmul.f32 0.2, %v670_v1  ;;  %v750_v13 = vmul.f32 0.2, %v686_v2  ;;  %600 = vst.msk [vmem:[#allocation2 + $0x30] sm:$0xff] %vm223_vm0, %v567_v3  ;;  %616 = vst.msk [vmem:[#allocation2 + $0xb0] sm:$0xff] %vm223_vm0, %v583_v4  ;;  %v767_v14 = vsel %vm703_vm5, %v671_v59, %v735_v10  ;;  %v570_v19 = vadd.f32 %v1018_v63, %v265_v62 }
 0x111   : > { %v783_v15 = vsel %vm719_vm6, %v687_v60, %v751_v11  ;;  %v634_v16 = vld [vmem:[#allocation2 + $0x28] sm:$0xff]  ;;  %v633_v18 = vld [vmem:[#allocation2 + $0x20] sm:$0xff]  ;;  %v586_v20 = vadd.f32 %v1042_v0, %v281_v5  ;;  %v1021_v22 = vpop.f32.mrb[10].mxu0  ;;  %v1045_v23 = vpop.f32.mrb[10].mxu1  ;;  %799 = vst.msk [vmem:[%s1349_s9 + $0x18] sm:$0xff] %vm223_vm0, %v767_v14  ;;  %v569_v34 = vadd.f32 %v442_v7, %v264_v6  ;;  %v585_v35 = vadd.f32 %v522_v9, %v280_v8  ;;  %v282_v38 = vld [vmem:[#allocation2 + $0xd0] sm:$0xff] }
 0x112   : > { %v650_v17 = vld [vmem:[#allocation2 + $0xa8] sm:$0xff]  ;;  %815 = vst.msk [vmem:[%s1349_s9 + $0x98] sm:$0xff] %vm223_vm0, %v783_v15  ;;  %v766_v24 = vsel %vm702_vm7, %v670_v1, %v734_v12  ;;  %v782_v25 = vsel %vm718_vm8, %v686_v2, %v750_v13  ;;  %v673_v26 = vadd.f32 %v1332_v21, %v634_v16  ;;  %v649_v28 = vld [vmem:[#allocation2 + $0xa0] sm:$0xff]  ;;  %v452_v30 = vpop.f32.mrb[11].mxu0  ;;  %v532_v31 = vpop.f32.mrb[11].mxu1  ;;  %v672_v32 = vadd.f32 %v1332_v21, %v633_v18 }
 0x113   : > { %v689_v27 = vadd.f32 %v1332_v21, %v650_v17  ;;  %798 = vst.msk [vmem:[%s1349_s9 + $0x10] sm:$0xff] %vm223_vm0, %v766_v24  ;;  %814 = vst.msk [vmem:[%s1349_s9 + $0x90] sm:$0xff] %vm223_vm0, %v782_v25  ;;  %v688_v33 = vadd.f32 %v1332_v21, %v649_v28  ;;  %v572_v47 = vadd.f32 %v1021_v22, %v267_v29  ;;  %v269_v57 = vld [vmem:[#allocation2 + $0x68] sm:$0xff]  ;;  %v268_v1 = vld [vmem:[#allocation2 + $0x60] sm:$0xff] }
 0x114   : > { %603 = vst.msk [vmem:[#allocation2 + $0x48] sm:$0xff] %vm223_vm0, %v570_v19  ;;  %619 = vst.msk [vmem:[#allocation2 + $0xc8] sm:$0xff] %vm223_vm0, %v586_v20  ;;  %vm705_vm9 = vcmp.ge.f32.partialorder %v673_v26, 0.0  ;;  %v737_v39 = vmul.f32 0.2, %v673_v26  ;;  %vm704_vm11 = vcmp.ge.f32.partialorder %v672_v32, 0.0  ;;  %v588_v48 = vadd.f32 %v1045_v23, %v283_v36 }
 0x115   : > { %vm721_vm10 = vcmp.ge.f32.partialorder %v689_v27, 0.0  ;;  %v753_v40 = vmul.f32 0.2, %v689_v27  ;;  %v736_v41 = vmul.f32 0.2, %v672_v32  ;;  %vm720_vm12 = vcmp.ge.f32.partialorder %v688_v33, 0.0 }
 0x116   : > { %v752_v42 = vmul.f32 0.2, %v688_v33  ;;  %602 = vst.msk [vmem:[#allocation2 + $0x40] sm:$0xff] %vm223_vm0, %v569_v34  ;;  %618 = vst.msk [vmem:[#allocation2 + $0xc0] sm:$0xff] %vm223_vm0, %v585_v35  ;;  %v769_v43 = vsel %vm705_vm9, %v673_v26, %v737_v39  ;;  %v636_v45 = vld [vmem:[#allocation2 + $0x38] sm:$0xff]  ;;  %v1024_v49 = vpop.f32.mrb[12].mxu0  ;;  %v571_v62 = vadd.f32 %v452_v30, %v266_v37  ;;  %v587_v63 = vadd.f32 %v532_v31, %v282_v38 }
 0x117   : > { %v785_v44 = vsel %vm721_vm10, %v689_v27, %v753_v40  ;;  %v652_v46 = vld [vmem:[#allocation2 + $0xb8] sm:$0xff]  ;;  %v1048_v50 = vpop.f32.mrb[12].mxu1  ;;  %801 = vst.msk [vmem:[%s1349_s9 + $0x28] sm:$0xff] %vm223_vm0, %v769_v43  ;;  %v768_v51 = vsel %vm704_vm11, %v672_v32, %v736_v41  ;;  %v675_v53 = vadd.f32 %v1332_v21, %v636_v45  ;;  %v635_v55 = vld [vmem:[#allocation2 + $0x30] sm:$0xff]  ;;  %v462_v58 = vpop.f32.mrb[13].mxu0  ;;  %605 = vst.msk [vmem:[#allocation2 + $0x58] sm:$0xff] %vm223_vm0, %v572_v47 }
 0x118   : > { %817 = vst.msk [vmem:[%s1349_s9 + $0xa8] sm:$0xff] %vm223_vm0, %v785_v44  ;;  %v784_v52 = vsel %vm720_vm12, %v688_v33, %v752_v42  ;;  %v691_v54 = vadd.f32 %v1332_v21, %v652_v46  ;;  %v651_v56 = vld [vmem:[#allocation2 + $0xb0] sm:$0xff]  ;;  %v542_v59 = vpop.f32.mrb[13].mxu1  ;;  %800 = vst.msk [vmem:[%s1349_s9 + $0x20] sm:$0xff] %vm223_vm0, %v768_v51  ;;  %v674_v60 = vadd.f32 %v1332_v21, %v635_v55  ;;  %v285_v0 = vld [vmem:[#allocation2 + $0xe8] sm:$0xff]  ;;  %v1027_v13 = vpop.f32.mrb[14].mxu0 }
 0x119   : > { %816 = vst.msk [vmem:[%s1349_s9 + $0xa0] sm:$0xff] %vm223_vm0, %v784_v52  ;;  %v690_v61 = vadd.f32 %v1332_v21, %v651_v56  ;;  %621 = vst.msk [vmem:[#allocation2 + $0xd8] sm:$0xff] %vm223_vm0, %v588_v48  ;;  %v284_v2 = vld [vmem:[#allocation2 + $0xe0] sm:$0xff]  ;;  %vm707_vm13 = vcmp.ge.f32.partialorder %v675_v53, 0.0  ;;  %v739_v3 = vmul.f32 0.2, %v675_v53  ;;  %v574_v11 = vadd.f32 %v1024_v49, %v269_v57 }
 0x11a   : > { %vm723_vm14 = vcmp.ge.f32.partialorder %v691_v54, 0.0  ;;  %v755_v4 = vmul.f32 0.2, %v691_v54  ;;  %vm706_vm15 = vcmp.ge.f32.partialorder %v674_v60, 0.0  ;;  %v738_v5 = vmul.f32 0.2, %v674_v60 }
 0x11b   : > { %vm722_vm1 = vcmp.ge.f32.partialorder %v690_v61, 0.0  ;;  %v754_v6 = vmul.f32 0.2, %v690_v61  ;;  %604 = vst.msk [vmem:[#allocation2 + $0x50] sm:$0xff] %vm223_vm0, %v571_v62  ;;  %620 = vst.msk [vmem:[#allocation2 + $0xd0] sm:$0xff] %vm223_vm0, %v587_v63  ;;  %v771_v7 = vsel %vm707_vm13, %v675_v53, %v739_v3  ;;  %v638_v9 = vld [vmem:[#allocation2 + $0x48] sm:$0xff]  ;;  %v590_v12 = vadd.f32 %v1048_v50, %v285_v0 }
 0x11c   : > { %v787_v8 = vsel %vm723_vm14, %v691_v54, %v755_v4  ;;  %v654_v10 = vld [vmem:[#allocation2 + $0xc8] sm:$0xff]  ;;  %v1051_v14 = vpop.f32.mrb[14].mxu1  ;;  %803 = vst.msk [vmem:[%s1349_s9 + $0x38] sm:$0xff] %vm223_vm0, %v771_v7  ;;  %v770_v15 = vsel %vm706_vm15, %v674_v60, %v738_v5  ;;  %v677_v17 = vadd.f32 %v1332_v21, %v638_v9  ;;  %v271_v22 = vld [vmem:[#allocation2 + $0x78] sm:$0xff]  ;;  %v472_v23 = vpop.f32.mrb[15].mxu0  ;;  %607 = vst.msk [vmem:[#allocation2 + $0x68] sm:$0xff] %vm223_vm0, %v574_v11 }
 0x11d   : > { %819 = vst.msk [vmem:[%s1349_s9 + $0xb8] sm:$0xff] %vm223_vm0, %v787_v8  ;;  %v786_v16 = vsel %vm722_vm1, %v690_v61, %v754_v6  ;;  %v693_v18 = vadd.f32 %v1332_v21, %v654_v10  ;;  %v637_v19 = vld [vmem:[#allocation2 + $0x40] sm:$0xff]  ;;  %v552_v24 = vpop.f32.mrb[15].mxu1  ;;  %802 = vst.msk [vmem:[%s1349_s9 + $0x30] sm:$0xff] %vm223_vm0, %v770_v15  ;;  %v573_v27 = vadd.f32 %v462_v58, %v268_v1  ;;  %v287_v29 = vld [vmem:[#allocation2 + $0xf8] sm:$0xff] }
 0x11e   : > { %v653_v20 = vld [vmem:[#allocation2 + $0xc0] sm:$0xff]  ;;  %818 = vst.msk [vmem:[%s1349_s9 + $0xb0] sm:$0xff] %vm223_vm0, %v786_v16  ;;  %v676_v25 = vadd.f32 %v1332_v21, %v637_v19  ;;  %623 = vst.msk [vmem:[#allocation2 + $0xe8] sm:$0xff] %vm223_vm0, %v590_v12  ;;  %v589_v28 = vadd.f32 %v542_v59, %v284_v2  ;;  %v270_v30 = vld [vmem:[#allocation2 + $0x70] sm:$0xff]  ;;  %vm709_vm2 = vcmp.ge.f32.partialorder %v677_v17, 0.0  ;;  %v576_v40 = vadd.f32 %v1027_v13, %v271_v22 }
 0x11f   : > { %v692_v26 = vadd.f32 %v1332_v21, %v653_v20  ;;  %v286_v31 = vld [vmem:[#allocation2 + $0xf0] sm:$0xff]  ;;  %v741_v32 = vmul.f32 0.2, %v677_v17  ;;  %vm725_vm3 = vcmp.ge.f32.partialorder %v693_v18, 0.0  ;;  %v757_v33 = vmul.f32 0.2, %v693_v18 }
 0x120   : > { %vm708_vm4 = vcmp.ge.f32.partialorder %v676_v25, 0.0  ;;  %v740_v34 = vmul.f32 0.2, %v676_v25  ;;  %606 = vst.msk [vmem:[#allocation2 + $0x60] sm:$0xff] %vm223_vm0, %v573_v27  ;;  %622 = vst.msk [vmem:[#allocation2 + $0xe0] sm:$0xff] %vm223_vm0, %v589_v28  ;;  %v640_v38 = vld [vmem:[#allocation2 + $0x58] sm:$0xff]  ;;  %v592_v41 = vadd.f32 %v1051_v14, %v287_v29  ;;  %v575_v50 = vadd.f32 %v472_v23, %v270_v30 }
 0x121   : > { %vm724_vm5 = vcmp.ge.f32.partialorder %v692_v26, 0.0  ;;  %v756_v35 = vmul.f32 0.2, %v692_v26  ;;  %v773_v36 = vsel %vm709_vm2, %v677_v17, %v741_v32  ;;  %v789_v37 = vsel %vm725_vm3, %v693_v18, %v757_v33  ;;  %v656_v39 = vld [vmem:[#allocation2 + $0xd8] sm:$0xff]  ;;  %609 = vst.msk [vmem:[#allocation2 + $0x78] sm:$0xff] %vm223_vm0, %v576_v40 }
 0x122   : > { %805 = vst.msk [vmem:[%s1349_s9 + $0x48] sm:$0xff] %vm223_vm0, %v773_v36  ;;  %821 = vst.msk [vmem:[%s1349_s9 + $0xc8] sm:$0xff] %vm223_vm0, %v789_v37  ;;  %v772_v42 = vsel %vm708_vm4, %v676_v25, %v740_v34  ;;  %v679_v44 = vadd.f32 %v1332_v21, %v640_v38  ;;  %v695_v45 = vadd.f32 %v1332_v21, %v656_v39  ;;  %v639_v46 = vld [vmem:[#allocation2 + $0x50] sm:$0xff] }
 0x123   : > { %v788_v43 = vsel %vm724_vm5, %v692_v26, %v756_v35  ;;  %v655_v47 = vld [vmem:[#allocation2 + $0xd0] sm:$0xff]  ;;  %804 = vst.msk [vmem:[%s1349_s9 + $0x40] sm:$0xff] %vm223_vm0, %v772_v42  ;;  %v678_v48 = vadd.f32 %v1332_v21, %v639_v46  ;;  %625 = vst.msk [vmem:[#allocation2 + $0xf8] sm:$0xff] %vm223_vm0, %v592_v41  ;;  %v591_v51 = vadd.f32 %v552_v24, %v286_v31  ;;  %v642_v58 = vld [vmem:[#allocation2 + $0x68] sm:$0xff] }
 0x124   : > { %820 = vst.msk [vmem:[%s1349_s9 + $0xc0] sm:$0xff] %vm223_vm0, %v788_v43  ;;  %v694_v49 = vadd.f32 %v1332_v21, %v655_v47  ;;  %vm711_vm6 = vcmp.ge.f32.partialorder %v679_v44, 0.0  ;;  %v743_v52 = vmul.f32 0.2, %v679_v44  ;;  %vm727_vm7 = vcmp.ge.f32.partialorder %v695_v45, 0.0  ;;  %608 = vst.msk [vmem:[#allocation2 + $0x70] sm:$0xff] %vm223_vm0, %v575_v50 }
 0x125   : > { %v759_v53 = vmul.f32 0.2, %v695_v45  ;;  %vm710_vm8 = vcmp.ge.f32.partialorder %v678_v48, 0.0  ;;  %v742_v54 = vmul.f32 0.2, %v678_v48  ;;  %624 = vst.msk [vmem:[#allocation2 + $0xf0] sm:$0xff] %vm223_vm0, %v591_v51  ;;  %v681_v62 = vadd.f32 %v1332_v21, %v642_v58 }
 0x126   : > { %vm726_vm9 = vcmp.ge.f32.partialorder %v694_v49, 0.0  ;;  %v758_v55 = vmul.f32 0.2, %v694_v49  ;;  %v775_v56 = vsel %vm711_vm6, %v679_v44, %v743_v52  ;;  %v658_v59 = vld [vmem:[#allocation2 + $0xe8] sm:$0xff] }
 0x127   : > { %v791_v57 = vsel %vm727_vm7, %v695_v45, %v759_v53  ;;  %807 = vst.msk [vmem:[%s1349_s9 + $0x58] sm:$0xff] %vm223_vm0, %v775_v56  ;;  %v774_v60 = vsel %vm710_vm8, %v678_v48, %v742_v54  ;;  %v697_v63 = vadd.f32 %v1332_v21, %v658_v59  ;;  %v641_v0 = vld [vmem:[#allocation2 + $0x60] sm:$0xff]  ;;  %vm713_vm10 = vcmp.ge.f32.partialorder %v681_v62, 0.0 }
 0x128   : > { %823 = vst.msk [vmem:[%s1349_s9 + $0xd8] sm:$0xff] %vm223_vm0, %v791_v57  ;;  %v790_v61 = vsel %vm726_vm9, %v694_v49, %v758_v55  ;;  %v657_v1 = vld [vmem:[#allocation2 + $0xe0] sm:$0xff]  ;;  %806 = vst.msk [vmem:[%s1349_s9 + $0x50] sm:$0xff] %vm223_vm0, %v774_v60  ;;  %v680_v2 = vadd.f32 %v1332_v21, %v641_v0  ;;  %v745_v4 = vmul.f32 0.2, %v681_v62  ;;  %v644_v10 = vld [vmem:[#allocation2 + $0x78] sm:$0xff] }
 0x129   : > { %822 = vst.msk [vmem:[%s1349_s9 + $0xd0] sm:$0xff] %vm223_vm0, %v790_v61  ;;  %v696_v3 = vadd.f32 %v1332_v21, %v657_v1  ;;  %vm729_vm11 = vcmp.ge.f32.partialorder %v697_v63, 0.0  ;;  %v761_v5 = vmul.f32 0.2, %v697_v63  ;;  %v683_v14 = vadd.f32 %v1332_v21, %v644_v10 }
 0x12a   : > { %vm712_vm12 = vcmp.ge.f32.partialorder %v680_v2, 0.0  ;;  %v744_v6 = vmul.f32 0.2, %v680_v2  ;;  %v777_v8 = vsel %vm713_vm10, %v681_v62, %v745_v4  ;;  %v660_v11 = vld [vmem:[#allocation2 + $0xf8] sm:$0xff] }
 0x12b   : > { %vm728_vm13 = vcmp.ge.f32.partialorder %v696_v3, 0.0  ;;  %v760_v7 = vmul.f32 0.2, %v696_v3  ;;  %v793_v9 = vsel %vm729_vm11, %v697_v63, %v761_v5  ;;  %809 = vst.msk [vmem:[%s1349_s9 + $0x68] sm:$0xff] %vm223_vm0, %v777_v8  ;;  %v699_v15 = vadd.f32 %v1332_v21, %v660_v11  ;;  %v643_v16 = vld [vmem:[#allocation2 + $0x70] sm:$0xff] }
 0x12c   : > { %825 = vst.msk [vmem:[%s1349_s9 + $0xe8] sm:$0xff] %vm223_vm0, %v793_v9  ;;  %v776_v12 = vsel %vm712_vm12, %v680_v2, %v744_v6  ;;  %v659_v17 = vld [vmem:[#allocation2 + $0xf0] sm:$0xff]  ;;  %v682_v18 = vadd.f32 %v1332_v21, %v643_v16  ;;  %vm715_vm14 = vcmp.ge.f32.partialorder %v683_v14, 0.0  ;;  %v747_v20 = vmul.f32 0.2, %v683_v14 }
 0x12d   : > { %v792_v13 = vsel %vm728_vm13, %v696_v3, %v760_v7  ;;  %808 = vst.msk [vmem:[%s1349_s9 + $0x60] sm:$0xff] %vm223_vm0, %v776_v12  ;;  %v698_v19 = vadd.f32 %v1332_v21, %v659_v17  ;;  %vm731_vm15 = vcmp.ge.f32.partialorder %v699_v15, 0.0  ;;  %v763_v22 = vmul.f32 0.2, %v699_v15 }
 0x12e   : > { %824 = vst.msk [vmem:[%s1349_s9 + $0xe0] sm:$0xff] %vm223_vm0, %v792_v13  ;;  %vm714_vm1 = vcmp.ge.f32.partialorder %v682_v18, 0.0  ;;  %v746_v23 = vmul.f32 0.2, %v682_v18  ;;  %v779_v25 = vsel %vm715_vm14, %v683_v14, %v747_v20 }
 0x12f   : > { %vm730_vm2 = vcmp.ge.f32.partialorder %v698_v19, 0.0  ;;  %v762_v24 = vmul.f32 0.2, %v698_v19  ;;  %v795_v26 = vsel %vm731_vm15, %v699_v15, %v763_v22  ;;  %811 = vst.msk [vmem:[%s1349_s9 + $0x78] sm:$0xff] %vm223_vm0, %v779_v25 }
 0x130   : > { %827 = vst.msk [vmem:[%s1349_s9 + $0xf8] sm:$0xff] %vm223_vm0, %v795_v26  ;;  %v778_v27 = vsel %vm714_vm1, %v682_v18, %v746_v23 }
 0x131   : > { %v794_v28 = vsel %vm730_vm2, %v698_v19, %v762_v24  ;;  %810 = vst.msk [vmem:[%s1349_s9 + $0x70] sm:$0xff] %vm223_vm0, %v778_v27 }
 0x132   : > { %826 = vst.msk [vmem:[%s1349_s9 + $0xf0] sm:$0xff] %vm223_vm0, %v794_v28 }
 0x133 PF: > { %s13_s14 = sadd.s32 1, %s1147_s14   ;;  %s1481_s12 = smov %s1143_s13 }
 0x134   : > { %p10_p5 = scmp.ge.s32.totalorder %s13_s14, 4   ;;  %s1482_s13 = smov %s1484_s15 }
 0x136   :  { %12 = sbr.rel (!%p10_p5) target bundleno = 2 (0x2), region = 73 }

// kernel: patch_discriminator.6
= control target key start
LH: loop header
LB: loop body
LE: loop exit
PB: predicated region body
PF: predicated region fallthrough
CT: control target
= control target key end

     0   :  { %s1587_s18 = smov 0   ;;  %s1589_s19 = smov 0   ;;  %s2069_s0 = inlined_call_operand.vmem [shape: f32[128,1024], index: 0, kind: input, shape index: {}]   ;;  %s2070_s1 = inlined_call_operand.vmem [shape: f32[1024,128], index: 1, kind: input, shape index: {}]   ;;  %s2071_s2 = inlined_call_operand.vmem [shape: f32[1,128], index: 2, kind: input, shape index: {}]   ;;  %s2072_s3 = inlined_call_operand.vmem [shape: f32[1,128], index: 3, kind: input, shape index: {}]   ;;  %s2073_s4 = inlined_call_operand.vmem [shape: f32[1,128], index: 4, kind: input, shape index: {}]   ;;  %s2074_s5 = inlined_call_operand.vmem [shape: f32[128,128], index: 5, kind: output, shape index: {}]  }
   0x1   :  { %s1591_s20 = smov 0   ;;  %s1593_s21 = smov 0  }
   0x2   :  { %s1595_s22 = smov 0  }
   0x3 LB: > { %s24_s23 = sadd.s32 1, %s1550_s21  ;;  %p43_p1 = scmp.ne.s32.totalorder %s1542_s19, %s1538_s18  ;;  %s1554_s22 = sphi %s1595_s22, %s15_s22   ;;  %s1550_s21 = sphi %s1593_s21, %s2078_s21   ;;  %s1546_s20 = sphi %s1591_s20, %s2077_s20   ;;  %s1542_s19 = sphi %s1589_s19, %s2076_s19   ;;  %s1538_s18 = sphi %s1587_s18, %s2075_s18  }
   0x4   : > { %p25_p0 = scmp.ge.s32.totalorder %s24_s23, 2  ;;  %p44_p2 = scmp.eq.s32.totalorder %s1554_s22, 0 }
   0x5   : > { %s36_s25 = sadd.s32 1, %s1542_s19  ;;  %p1231_p5 = scmp.ge.s32.totalorder %s1554_s22, 2 }
   0x6   : > { %s2080_s23 = smov (%p25_p0, %s24_s23), 0  ;;  %p45_p3 = por %p44_p2, %p43_p1 }
   0x7   : > { %s32_s24 = ssub.s32 %s1550_s21, %s2080_s23  ;;  %193 = sbr.rel (%p1231_p5) target bundleno = 50 (0x32), region = 28 }
   0x8   : > { %p34_p4 = scmp.eq.s32.totalorder %s32_s24, 0 }
   0xa   : > { %s1622_s26 = scalar_select %p34_p4, %s1542_s19, %s36_s25  }
   0xe   : > { %196 = sbr.rel (!%p45_p3) target bundleno = 50 (0x32), region = 32  ;;  %s198_s27 = sand.u32 (%p45_p3), 1, %s1542_s19  }
   0xf   : > { %s1248_s28 = sshll.u32 (%p45_p3), %s1550_s21, 5  ;;  %s1232_s29 = sshll.u32 (%p45_p3), %s198_s27, 9 }
  0x10   : > { %s1630_s7 = scalar_lea.vmem (%p45_p3), %s2069_s0, %s1248_s28  ;;  %s1635_s8 = scalar_lea.vmem (%p45_p3), [#allocation3], %s1232_s29 }
  0x11   : > { %v219_v0 = vld [vmem:[%s1630_s7] sm:$0xff] (%p45_p3)  ;;  %v221_v1 = vld [vmem:[%s1630_s7 + $0x8] sm:$0xff] (%p45_p3)  ;;  %v223_v2 = vld [vmem:[%s1630_s7 + $0x10] sm:$0xff] (%p45_p3) }
  0x12   : > { %220 = vst [vmem:[%s1635_s8] sm:$0xff] (%p45_p3), %v219_v0  ;;  %222 = vst [vmem:[%s1635_s8 + $0x8] sm:$0xff] (%p45_p3), %v221_v1  ;;  %v225_v3 = vld [vmem:[%s1630_s7 + $0x18] sm:$0xff] (%p45_p3)  ;;  %v227_v4 = vld [vmem:[%s1630_s7 + $0x40] sm:$0xff] (%p45_p3) }
  0x13   : > { %224 = vst [vmem:[%s1635_s8 + $0x10] sm:$0xff] (%p45_p3), %v223_v2  ;;  %v229_v5 = vld [vmem:[%s1630_s7 + $0x48] sm:$0xff] (%p45_p3)  ;;  %226 = vst [vmem:[%s1635_s8 + $0x18] sm:$0xff] (%p45_p3), %v225_v3  ;;  %v231_v6 = vld [vmem:[%s1630_s7 + $0x50] sm:$0xff] (%p45_p3) }
  0x14   : > { %228 = vst [vmem:[%s1635_s8 + $0x20] sm:$0xff] (%p45_p3), %v227_v4  ;;  %230 = vst [vmem:[%s1635_s8 + $0x28] sm:$0xff] (%p45_p3), %v229_v5  ;;  %v233_v7 = vld [vmem:[%s1630_s7 + $0x58] sm:$0xff] (%p45_p3)  ;;  %v235_v8 = vld [vmem:[%s1630_s7 + $0x80] sm:$0xff] (%p45_p3) }
  0x15   : > { %232 = vst [vmem:[%s1635_s8 + $0x30] sm:$0xff] %v231_v6  ;;  %234 = vst [vmem:[%s1635_s8 + $0x38] sm:$0xff] %v233_v7  ;;  %v237_v9 = vld [vmem:[%s1630_s7 + $0x88] sm:$0xff]  ;;  %v239_v10 = vld [vmem:[%s1630_s7 + $0x90] sm:$0xff] }
  0x16   : > { %236 = vst [vmem:[%s1635_s8 + $0x40] sm:$0xff] %v235_v8  ;;  %v241_v11 = vld [vmem:[%s1630_s7 + $0x98] sm:$0xff]  ;;  %238 = vst [vmem:[%s1635_s8 + $0x48] sm:$0xff] %v237_v9  ;;  %v243_v12 = vld [vmem:[%s1630_s7 + $0xc0] sm:$0xff] }
  0x17   : > { %240 = vst [vmem:[%s1635_s8 + $0x50] sm:$0xff] %v239_v10  ;;  %242 = vst [vmem:[%s1635_s8 + $0x58] sm:$0xff] %v241_v11  ;;  %v245_v13 = vld [vmem:[%s1630_s7 + $0xc8] sm:$0xff]  ;;  %v247_v14 = vld [vmem:[%s1630_s7 + $0xd0] sm:$0xff] }
  0x18   : > { %244 = vst [vmem:[%s1635_s8 + $0x60] sm:$0xff] %v243_v12  ;;  %246 = vst [vmem:[%s1635_s8 + $0x68] sm:$0xff] %v245_v13  ;;  %v249_v15 = vld [vmem:[%s1630_s7 + $0xd8] sm:$0xff]  ;;  %v251_v16 = vld [vmem:[%s1630_s7 + $0x100] sm:$0xff] }
  0x19   : > { %248 = vst [vmem:[%s1635_s8 + $0x70] sm:$0xff] %v247_v14  ;;  %v253_v17 = vld [vmem:[%s1630_s7 + $0x108] sm:$0xff]  ;;  %250 = vst [vmem:[%s1635_s8 + $0x78] sm:$0xff] %v249_v15  ;;  %v255_v18 = vld [vmem:[%s1630_s7 + $0x110] sm:$0xff] }
  0x1a   : > { %252 = vst [vmem:[%s1635_s8 + $0x80] sm:$0xff] %v251_v16  ;;  %254 = vst [vmem:[%s1635_s8 + $0x88] sm:$0xff] %v253_v17  ;;  %v257_v19 = vld [vmem:[%s1630_s7 + $0x118] sm:$0xff]  ;;  %v259_v20 = vld [vmem:[%s1630_s7 + $0x140] sm:$0xff] }
  0x1b   : > { %256 = vst [vmem:[%s1635_s8 + $0x90] sm:$0xff] %v255_v18  ;;  %258 = vst [vmem:[%s1635_s8 + $0x98] sm:$0xff] %v257_v19  ;;  %v261_v21 = vld [vmem:[%s1630_s7 + $0x148] sm:$0xff]  ;;  %v263_v22 = vld [vmem:[%s1630_s7 + $0x150] sm:$0xff] }
  0x1c   : > { %260 = vst [vmem:[%s1635_s8 + $0xa0] sm:$0xff] %v259_v20  ;;  %v265_v23 = vld [vmem:[%s1630_s7 + $0x158] sm:$0xff]  ;;  %262 = vst [vmem:[%s1635_s8 + $0xa8] sm:$0xff] %v261_v21  ;;  %v267_v24 = vld [vmem:[%s1630_s7 + $0x180] sm:$0xff] }
  0x1d   : > { %264 = vst [vmem:[%s1635_s8 + $0xb0] sm:$0xff] %v263_v22  ;;  %266 = vst [vmem:[%s1635_s8 + $0xb8] sm:$0xff] %v265_v23  ;;  %v269_v25 = vld [vmem:[%s1630_s7 + $0x188] sm:$0xff]  ;;  %v271_v26 = vld [vmem:[%s1630_s7 + $0x190] sm:$0xff] }
  0x1e   : > { %268 = vst [vmem:[%s1635_s8 + $0xc0] sm:$0xff] %v267_v24  ;;  %270 = vst [vmem:[%s1635_s8 + $0xc8] sm:$0xff] %v269_v25  ;;  %v273_v27 = vld [vmem:[%s1630_s7 + $0x198] sm:$0xff]  ;;  %v275_v28 = vld [vmem:[%s1630_s7 + $0x1c0] sm:$0xff] }
  0x1f   : > { %272 = vst [vmem:[%s1635_s8 + $0xd0] sm:$0xff] %v271_v26  ;;  %v277_v29 = vld [vmem:[%s1630_s7 + $0x1c8] sm:$0xff]  ;;  %274 = vst [vmem:[%s1635_s8 + $0xd8] sm:$0xff] %v273_v27  ;;  %v279_v30 = vld [vmem:[%s1630_s7 + $0x1d0] sm:$0xff] }
  0x20   : > { %276 = vst [vmem:[%s1635_s8 + $0xe0] sm:$0xff] %v275_v28  ;;  %278 = vst [vmem:[%s1635_s8 + $0xe8] sm:$0xff] %v277_v29  ;;  %v281_v31 = vld [vmem:[%s1630_s7 + $0x1d8] sm:$0xff]  ;;  %v283_v32 = vld [vmem:[%s1630_s7 + $0x200] sm:$0xff] }
  0x21   : > { %280 = vst [vmem:[%s1635_s8 + $0xf0] sm:$0xff] %v279_v30  ;;  %282 = vst [vmem:[%s1635_s8 + $0xf8] sm:$0xff] %v281_v31  ;;  %v285_v33 = vld [vmem:[%s1630_s7 + $0x208] sm:$0xff]  ;;  %v287_v34 = vld [vmem:[%s1630_s7 + $0x210] sm:$0xff] }
  0x22   : > { %284 = vst [vmem:[%s1635_s8 + $0x100] sm:$0xff] %v283_v32  ;;  %v289_v35 = vld [vmem:[%s1630_s7 + $0x218] sm:$0xff]  ;;  %286 = vst [vmem:[%s1635_s8 + $0x108] sm:$0xff] %v285_v33  ;;  %v291_v36 = vld [vmem:[%s1630_s7 + $0x240] sm:$0xff] }
  0x23   : > { %288 = vst [vmem:[%s1635_s8 + $0x110] sm:$0xff] %v287_v34  ;;  %290 = vst [vmem:[%s1635_s8 + $0x118] sm:$0xff] %v289_v35  ;;  %v293_v37 = vld [vmem:[%s1630_s7 + $0x248] sm:$0xff]  ;;  %v295_v38 = vld [vmem:[%s1630_s7 + $0x250] sm:$0xff] }
  0x24   : > { %292 = vst [vmem:[%s1635_s8 + $0x120] sm:$0xff] %v291_v36  ;;  %294 = vst [vmem:[%s1635_s8 + $0x128] sm:$0xff] %v293_v37  ;;  %v297_v39 = vld [vmem:[%s1630_s7 + $0x258] sm:$0xff]  ;;  %v299_v40 = vld [vmem:[%s1630_s7 + $0x280] sm:$0xff] }
  0x25   : > { %296 = vst [vmem:[%s1635_s8 + $0x130] sm:$0xff] %v295_v38  ;;  %v301_v41 = vld [vmem:[%s1630_s7 + $0x288] sm:$0xff]  ;;  %298 = vst [vmem:[%s1635_s8 + $0x138] sm:$0xff] %v297_v39  ;;  %v303_v42 = vld [vmem:[%s1630_s7 + $0x290] sm:$0xff] }
  0x26   : > { %300 = vst [vmem:[%s1635_s8 + $0x140] sm:$0xff] %v299_v40  ;;  %302 = vst [vmem:[%s1635_s8 + $0x148] sm:$0xff] %v301_v41  ;;  %v305_v43 = vld [vmem:[%s1630_s7 + $0x298] sm:$0xff]  ;;  %v307_v44 = vld [vmem:[%s1630_s7 + $0x2c0] sm:$0xff] }
  0x27   : > { %304 = vst [vmem:[%s1635_s8 + $0x150] sm:$0xff] %v303_v42  ;;  %306 = vst [vmem:[%s1635_s8 + $0x158] sm:$0xff] %v305_v43  ;;  %v309_v45 = vld [vmem:[%s1630_s7 + $0x2c8] sm:$0xff]  ;;  %v311_v46 = vld [vmem:[%s1630_s7 + $0x2d0] sm:$0xff] }
  0x28   : > { %308 = vst [vmem:[%s1635_s8 + $0x160] sm:$0xff] %v307_v44  ;;  %v313_v47 = vld [vmem:[%s1630_s7 + $0x2d8] sm:$0xff]  ;;  %310 = vst [vmem:[%s1635_s8 + $0x168] sm:$0xff] %v309_v45  ;;  %v315_v48 = vld [vmem:[%s1630_s7 + $0x300] sm:$0xff] }
  0x29   : > { %312 = vst [vmem:[%s1635_s8 + $0x170] sm:$0xff] %v311_v46  ;;  %314 = vst [vmem:[%s1635_s8 + $0x178] sm:$0xff] %v313_v47  ;;  %v317_v49 = vld [vmem:[%s1630_s7 + $0x308] sm:$0xff]  ;;  %v319_v50 = vld [vmem:[%s1630_s7 + $0x310] sm:$0xff] }
  0x2a   : > { %316 = vst [vmem:[%s1635_s8 + $0x180] sm:$0xff] %v315_v48  ;;  %318 = vst [vmem:[%s1635_s8 + $0x188] sm:$0xff] %v317_v49  ;;  %v321_v51 = vld [vmem:[%s1630_s7 + $0x318] sm:$0xff]  ;;  %v323_v52 = vld [vmem:[%s1630_s7 + $0x340] sm:$0xff] }
  0x2b   : > { %320 = vst [vmem:[%s1635_s8 + $0x190] sm:$0xff] %v319_v50  ;;  %v325_v53 = vld [vmem:[%s1630_s7 + $0x348] sm:$0xff]  ;;  %322 = vst [vmem:[%s1635_s8 + $0x198] sm:$0xff] %v321_v51  ;;  %v327_v54 = vld [vmem:[%s1630_s7 + $0x350] sm:$0xff] }
  0x2c   : > { %324 = vst [vmem:[%s1635_s8 + $0x1a0] sm:$0xff] %v323_v52  ;;  %326 = vst [vmem:[%s1635_s8 + $0x1a8] sm:$0xff] %v325_v53  ;;  %v329_v55 = vld [vmem:[%s1630_s7 + $0x358] sm:$0xff]  ;;  %v331_v56 = vld [vmem:[%s1630_s7 + $0x380] sm:$0xff] }
  0x2d   : > { %328 = vst [vmem:[%s1635_s8 + $0x1b0] sm:$0xff] %v327_v54  ;;  %330 = vst [vmem:[%s1635_s8 + $0x1b8] sm:$0xff] %v329_v55  ;;  %v333_v57 = vld [vmem:[%s1630_s7 + $0x388] sm:$0xff]  ;;  %v335_v58 = vld [vmem:[%s1630_s7 + $0x390] sm:$0xff] }
  0x2e   : > { %332 = vst [vmem:[%s1635_s8 + $0x1c0] sm:$0xff] %v331_v56  ;;  %v337_v59 = vld [vmem:[%s1630_s7 + $0x398] sm:$0xff]  ;;  %334 = vst [vmem:[%s1635_s8 + $0x1c8] sm:$0xff] %v333_v57  ;;  %v339_v60 = vld [vmem:[%s1630_s7 + $0x3c0] sm:$0xff] }
  0x2f   : > { %336 = vst [vmem:[%s1635_s8 + $0x1d0] sm:$0xff] %v335_v58  ;;  %338 = vst [vmem:[%s1635_s8 + $0x1d8] sm:$0xff] %v337_v59  ;;  %v341_v61 = vld [vmem:[%s1630_s7 + $0x3c8] sm:$0xff]  ;;  %v343_v62 = vld [vmem:[%s1630_s7 + $0x3d0] sm:$0xff] }
  0x30   : > { %340 = vst [vmem:[%s1635_s8 + $0x1e0] sm:$0xff] %v339_v60  ;;  %342 = vst [vmem:[%s1635_s8 + $0x1e8] sm:$0xff] %v341_v61  ;;  %v345_v63 = vld [vmem:[%s1630_s7 + $0x3d8] sm:$0xff] }
  0x31   : > { %344 = vst [vmem:[%s1635_s8 + $0x1f0] sm:$0xff] %v343_v62  ;;  %346 = vst [vmem:[%s1635_s8 + $0x1f8] sm:$0xff] %v345_v63 }
  0x32 PF: > { %p1235_p6 = scmp.ge.s32.totalorder %s1554_s22, 1  ;;  %p360_p7 = scmp.lt.s32.totalorder %s1554_s22, 3 }
  0x34   : > { %p361_p8 = pnand %p1235_p6, %p360_p7 }
  0x35   : > { %s367_s9 = sand.u32 (!%p361_p8), 1, %s1538_s18   ;;  %s1237_s10 = sshll.u32 (!%p361_p8), %s1546_s20, 6 }
  0x36   : > { %364 = sbr.rel (%p361_p8) target bundleno = 503 (0x1f7), region = 59  ;;  %s1236_s11 = sshll.u32 (!%p361_p8), %s367_s9, 9 }
  0x37   : > { %p402_p9 = scmp.lt.s32.totalorder (!%p361_p8), %s1237_s10, 127  ;;  %s1771_s16 = scalar_lea.vmem (!%p361_p8), [#allocation3], %s1236_s11 }
  0x38   : > { %p1239_p10 = scmp.ne.s32.totalorder (!%p361_p8), %s1546_s20, 0 }
  0x3d   : > { %s2082_s10 = smov (!%p402_p9, %s1237_s10), 127  ;;  %416 = sbr.rel (%p1239_p10) target bundleno = 71 (0x47), region = 67 }
  0x3e   : > { %s1238_s12 = sshll.u32 %s2082_s10, 3  ;;  %v1556_v0 = vmov (!%p1239_p10), 0.0  }
  0x3f   : > { %s1769_s15 = scalar_lea.vmem %s2070_s1, %s1238_s12  ;;  %417 = vst [vmem:[#allocation2] sm:$0xff] (!%p1239_p10), %v1556_v0  ;;  %418 = vst [vmem:[#allocation2 + $0x8] sm:$0xff] (!%p1239_p10), %v1556_v0 }
  0x40   : > { %419 = vst [vmem:[#allocation2 + $0x10] sm:$0xff] (!%p1239_p10), %v1556_v0  ;;  %420 = vst [vmem:[#allocation2 + $0x18] sm:$0xff] (!%p1239_p10), %v1556_v0 }
  0x41   : > { %421 = vst [vmem:[#allocation2 + $0x20] sm:$0xff] (!%p1239_p10), %v1556_v0  ;;  %422 = vst [vmem:[#allocation2 + $0x28] sm:$0xff] (!%p1239_p10), %v1556_v0 }
  0x42   : > { %423 = vst [vmem:[#allocation2 + $0x30] sm:$0xff] (!%p1239_p10), %v1556_v0  ;;  %424 = vst [vmem:[#allocation2 + $0x38] sm:$0xff] (!%p1239_p10), %v1556_v0 }
  0x43   : > { %425 = vst [vmem:[#allocation2 + $0x40] sm:$0xff] (!%p1239_p10), %v1556_v0  ;;  %426 = vst [vmem:[#allocation2 + $0x48] sm:$0xff] (!%p1239_p10), %v1556_v0 }
  0x44   : > { %427 = vst [vmem:[#allocation2 + $0x50] sm:$0xff] %v1556_v0  ;;  %428 = vst [vmem:[#allocation2 + $0x58] sm:$0xff] %v1556_v0 }
  0x45   : > { %429 = vst [vmem:[#allocation2 + $0x60] sm:$0xff] %v1556_v0  ;;  %430 = vst [vmem:[#allocation2 + $0x68] sm:$0xff] %v1556_v0 }
  0x46   : > { %431 = vst [vmem:[#allocation2 + $0x70] sm:$0xff] %v1556_v0  ;;  %432 = vst [vmem:[#allocation2 + $0x78] sm:$0xff] %v1556_v0 }
  0x47 PF: > { %v529_v1 = vld [vmem:[%s1769_s15 + $0x80] sm:$0xff]  ;;  %v530_v2 = vld [vmem:[%s1769_s15 + $0x88] sm:$0xff]  ;;  %v531_v12 = vld [vmem:[%s1769_s15 + $0x90] sm:$0xff]  ;;  %p1240_p11 = scmp.ne.s32.totalorder %s1546_s20, 1 }
  0x48   : > { %v561_v3 = vld [vmem:[%s1769_s15 + $0x180] sm:$0xff]  ;;  %v1409_v4 = vpack.c.bf16 %v530_v2, %v529_v1  ;;  %v562_v5 = vld [vmem:[%s1769_s15 + $0x188] sm:$0xff]  ;;  %v532_v14 = vld [vmem:[%s1769_s15 + $0x98] sm:$0xff] }
  0x49   : > { %v513_v6 = vld [vmem:[%s1769_s15] sm:$0xff]  ;;  %v514_v7 = vld [vmem:[%s1769_s15 + $0x8] sm:$0xff]  ;;  %v1441_v8 = vpack.c.bf16 %v562_v5, %v561_v3  ;;  %v563_v15 = vld [vmem:[%s1769_s15 + $0x190] sm:$0xff]  ;;  %v1413_v17 = vpack.c.bf16 %v532_v14, %v531_v12 }
  0x4a   : > { %v1411_v9 = vpack.c.bf16 %v514_v7, %v513_v6  ;;  %v545_v10 = vld [vmem:[%s1769_s15 + $0x100] sm:$0xff]  ;;  %v546_v11 = vld [vmem:[%s1769_s15 + $0x108] sm:$0xff]  ;;  %1410 = vmatprep.subr.bf16.mxu0 %v1409_v4  ;;  %v564_v16 = vld [vmem:[%s1769_s15 + $0x198] sm:$0xff] }
  0x4b   : > { %v1443_v13 = vpack.c.bf16 %v546_v11, %v545_v10  ;;  %1442 = vmatprep.subr.bf16.mxu1 %v1441_v8  ;;  %v1445_v18 = vpack.c.bf16 %v564_v16, %v563_v15  ;;  %v515_v19 = vld [vmem:[%s1769_s15 + $0x10] sm:$0xff]  ;;  %v516_v20 = vld [vmem:[%s1769_s15 + $0x18] sm:$0xff]  ;;  %v533_v24 = vld [vmem:[%s1769_s15 + $0xa0] sm:$0xff] }
  0x4c   : > { %1412 = vmatpush3.bf16.msra.mxu0 %v1411_v9  ;;  %v547_v21 = vld [vmem:[%s1769_s15 + $0x110] sm:$0xff]  ;;  %v1415_v22 = vpack.c.bf16 %v516_v20, %v515_v19  ;;  %v548_v23 = vld [vmem:[%s1769_s15 + $0x118] sm:$0xff]  ;;  %v534_v25 = vld [vmem:[%s1769_s15 + $0xa8] sm:$0xff] }
  0x4d   : > { %1444 = vmatpush3.bf16.msra.mxu1 %v1443_v13  ;;  %1414 = vmatprep.subr.bf16.mxu0 %v1413_v17  ;;  %v1447_v26 = vpack.c.bf16 %v548_v23, %v547_v21  ;;  %v1417_v27 = vpack.c.bf16 %v534_v25, %v533_v24  ;;  %v565_v28 = vld [vmem:[%s1769_s15 + $0x1a0] sm:$0xff]  ;;  %v566_v29 = vld [vmem:[%s1769_s15 + $0x1a8] sm:$0xff]  ;;  %v535_v36 = vld [vmem:[%s1769_s15 + $0xb0] sm:$0xff] }
  0x4e   : > { %1446 = vmatprep.subr.bf16.mxu1 %v1445_v18  ;;  %v517_v30 = vld [vmem:[%s1769_s15 + $0x20] sm:$0xff]  ;;  %v1449_v31 = vpack.c.bf16 %v566_v29, %v565_v28  ;;  %v518_v32 = vld [vmem:[%s1769_s15 + $0x28] sm:$0xff]  ;;  %v536_v37 = vld [vmem:[%s1769_s15 + $0xb8] sm:$0xff] }
  0x4f   : > { %v549_v33 = vld [vmem:[%s1769_s15 + $0x120] sm:$0xff]  ;;  %v550_v34 = vld [vmem:[%s1769_s15 + $0x128] sm:$0xff]  ;;  %v1419_v35 = vpack.c.bf16 %v518_v32, %v517_v30  ;;  %v567_v38 = vld [vmem:[%s1769_s15 + $0x1b0] sm:$0xff]  ;;  %v1421_v40 = vpack.c.bf16 %v536_v37, %v535_v36 }
  0x50   : > { %1416 = vmatpush3.bf16.msra.mxu0 %v1415_v22  ;;  %v1451_v39 = vpack.c.bf16 %v550_v34, %v549_v33  ;;  %v568_v41 = vld [vmem:[%s1769_s15 + $0x1b8] sm:$0xff]  ;;  %v519_v42 = vld [vmem:[%s1769_s15 + $0x30] sm:$0xff]  ;;  %v537_v47 = vld [vmem:[%s1769_s15 + $0xc0] sm:$0xff] }
  0x51   : > { %1448 = vmatpush3.bf16.msra.mxu1 %v1447_v26  ;;  %1418 = vmatprep.subr.bf16.mxu0 %v1417_v27  ;;  %v520_v43 = vld [vmem:[%s1769_s15 + $0x38] sm:$0xff]  ;;  %v1453_v44 = vpack.c.bf16 %v568_v41, %v567_v38  ;;  %v551_v45 = vld [vmem:[%s1769_s15 + $0x130] sm:$0xff]  ;;  %v538_v48 = vld [vmem:[%s1769_s15 + $0xc8] sm:$0xff] }
  0x52   : > { %1450 = vmatprep.subr.bf16.mxu1 %v1449_v31  ;;  %v552_v46 = vld [vmem:[%s1769_s15 + $0x138] sm:$0xff]  ;;  %v569_v49 = vld [vmem:[%s1769_s15 + $0x1c0] sm:$0xff]  ;;  %v570_v50 = vld [vmem:[%s1769_s15 + $0x1c8] sm:$0xff]  ;;  %v1423_v51 = vpack.c.bf16 %v520_v43, %v519_v42  ;;  %v1425_v53 = vpack.c.bf16 %v538_v48, %v537_v47 }
  0x53   : > { %v1455_v52 = vpack.c.bf16 %v552_v46, %v551_v45  ;;  %v521_v54 = vld [vmem:[%s1769_s15 + $0x40] sm:$0xff]  ;;  %v522_v55 = vld [vmem:[%s1769_s15 + $0x48] sm:$0xff]  ;;  %v1457_v57 = vpack.c.bf16 %v570_v50, %v569_v49  ;;  %v539_v59 = vld [vmem:[%s1769_s15 + $0xd0] sm:$0xff] }
  0x54   : > { %1420 = vmatpush3.bf16.msra.mxu0 %v1419_v35  ;;  %v553_v56 = vld [vmem:[%s1769_s15 + $0x140] sm:$0xff]  ;;  %v554_v58 = vld [vmem:[%s1769_s15 + $0x148] sm:$0xff]  ;;  %v540_v60 = vld [vmem:[%s1769_s15 + $0xd8] sm:$0xff]  ;;  %v1427_v63 = vpack.c.bf16 %v522_v55, %v521_v54 }
  0x55   : > { %1452 = vmatpush3.bf16.msra.mxu1 %v1451_v39  ;;  %1422 = vmatprep.subr.bf16.mxu0 %v1421_v40  ;;  %v571_v61 = vld [vmem:[%s1769_s15 + $0x1d0] sm:$0xff]  ;;  %v572_v62 = vld [vmem:[%s1769_s15 + $0x1d8] sm:$0xff]  ;;  %v1459_v0 = vpack.c.bf16 %v554_v58, %v553_v56  ;;  %v1429_v1 = vpack.c.bf16 %v540_v60, %v539_v59  ;;  %v541_v7 = vld [vmem:[%s1769_s15 + $0xe0] sm:$0xff] }
  0x56   : > { %1454 = vmatprep.subr.bf16.mxu1 %v1453_v44  ;;  %v523_v2 = vld [vmem:[%s1769_s15 + $0x50] sm:$0xff]  ;;  %v524_v3 = vld [vmem:[%s1769_s15 + $0x58] sm:$0xff]  ;;  %v1461_v5 = vpack.c.bf16 %v572_v62, %v571_v61  ;;  %v542_v8 = vld [vmem:[%s1769_s15 + $0xe8] sm:$0xff] }
  0x57   : > { %v555_v4 = vld [vmem:[%s1769_s15 + $0x150] sm:$0xff]  ;;  %v556_v6 = vld [vmem:[%s1769_s15 + $0x158] sm:$0xff]  ;;  %v573_v9 = vld [vmem:[%s1769_s15 + $0x1e0] sm:$0xff]  ;;  %v1431_v11 = vpack.c.bf16 %v524_v3, %v523_v2  ;;  %v1433_v15 = vpack.c.bf16 %v542_v8, %v541_v7 }
  0x58   : > { %1424 = vmatpush3.bf16.msra.mxu0 %v1423_v51  ;;  %v574_v10 = vld [vmem:[%s1769_s15 + $0x1e8] sm:$0xff]  ;;  %v525_v12 = vld [vmem:[%s1769_s15 + $0x60] sm:$0xff]  ;;  %v1463_v14 = vpack.c.bf16 %v556_v6, %v555_v4  ;;  %v452_v18 = vld [vmem:[%s1771_s16 + $0x18] sm:$0xff] }
  0x59   : > { %1456 = vmatpush3.bf16.msra.mxu1 %v1455_v52  ;;  %1426 = vmatprep.subr.bf16.mxu0 %v1425_v53  ;;  %v526_v13 = vld [vmem:[%s1769_s15 + $0x68] sm:$0xff]  ;;  %v557_v16 = vld [vmem:[%s1769_s15 + $0x160] sm:$0xff]  ;;  %v1465_v19 = vpack.c.bf16 %v574_v10, %v573_v9  ;;  %v543_v21 = vld [vmem:[%s1769_s15 + $0xf0] sm:$0xff] }
  0x5a   : > { %1458 = vmatprep.subr.bf16.mxu1 %v1457_v57  ;;  %v450_v17 = vld [vmem:[%s1771_s16 + $0x8] sm:$0xff]  ;;  %v544_v22 = vld [vmem:[%s1769_s15 + $0xf8] sm:$0xff]  ;;  %v575_v23 = vld [vmem:[%s1769_s15 + $0x1f0] sm:$0xff]  ;;  %786 = vmatprep.mubr.f32.mxu1 %v452_v18  ;;  %v1435_v25 = vpack.c.bf16 %v526_v13, %v525_v12 }
  0x5b   : > { %v558_v20 = vld [vmem:[%s1769_s15 + $0x168] sm:$0xff]  ;;  %641 = vmatprep.mubr.f32.mxu0 %v450_v17  ;;  %v576_v24 = vld [vmem:[%s1769_s15 + $0x1f8] sm:$0xff]  ;;  %v1437_v27 = vpack.c.bf16 %v544_v22, %v543_v21  ;;  %v527_v28 = vld [vmem:[%s1769_s15 + $0x70] sm:$0xff] }
  0x5c   : > { %1428 = vmatpush3.bf16.msra.mxu0 %v1427_v63  ;;  %v1467_v26 = vpack.c.bf16 %v558_v20, %v557_v16  ;;  %v528_v29 = vld [vmem:[%s1769_s15 + $0x78] sm:$0xff]  ;;  %v1469_v30 = vpack.c.bf16 %v576_v24, %v575_v23  ;;  %v559_v31 = vld [vmem:[%s1769_s15 + $0x170] sm:$0xff]  ;;  %v449_v35 = vld [vmem:[%s1771_s16] sm:$0xff] }
  0x5d   : > { %1460 = vmatpush3.bf16.msra.mxu1 %v1459_v0  ;;  %1430 = vmatprep.subr.bf16.mxu0 %v1429_v1  ;;  %v560_v32 = vld [vmem:[%s1769_s15 + $0x178] sm:$0xff]  ;;  %v1439_v33 = vpack.c.bf16 %v528_v29, %v527_v28  ;;  %v451_v36 = vld [vmem:[%s1771_s16 + $0x10] sm:$0xff]  ;;  %v454_v37 = vld [vmem:[%s1771_s16 + $0x28] sm:$0xff] }
  0x5e   : > { %1462 = vmatprep.subr.bf16.mxu1 %v1461_v5  ;;  %v1471_v34 = vpack.c.bf16 %v560_v32, %v559_v31  ;;  %v456_v38 = vld [vmem:[%s1771_s16 + $0x38] sm:$0xff]  ;;  %v453_v39 = vld [vmem:[%s1771_s16 + $0x20] sm:$0xff]  ;;  %v455_v40 = vld [vmem:[%s1771_s16 + $0x30] sm:$0xff] }
  0x5f   : > { %v458_v41 = vld [vmem:[%s1771_s16 + $0x48] sm:$0xff]  ;;  %v460_v42 = vld [vmem:[%s1771_s16 + $0x58] sm:$0xff]  ;;  %v457_v43 = vld [vmem:[%s1771_s16 + $0x40] sm:$0xff] }
  0x60   : > { %1432 = vmatpush3.bf16.msra.mxu0 %v1431_v11  ;;  %v459_v44 = vld [vmem:[%s1771_s16 + $0x50] sm:$0xff]  ;;  %v462_v45 = vld [vmem:[%s1771_s16 + $0x68] sm:$0xff]  ;;  %v464_v46 = vld [vmem:[%s1771_s16 + $0x78] sm:$0xff] }
  0x61   : > { %1464 = vmatpush3.bf16.msra.mxu1 %v1463_v14  ;;  %1434 = vmatprep.subr.bf16.mxu0 %v1433_v15  ;;  %v461_v47 = vld [vmem:[%s1771_s16 + $0x60] sm:$0xff]  ;;  %v463_v48 = vld [vmem:[%s1771_s16 + $0x70] sm:$0xff]  ;;  %v466_v49 = vld [vmem:[%s1771_s16 + $0x88] sm:$0xff] }
  0x62   : > { %1466 = vmatprep.subr.bf16.mxu1 %v1465_v19  ;;  %v468_v50 = vld [vmem:[%s1771_s16 + $0x98] sm:$0xff]  ;;  %v465_v51 = vld [vmem:[%s1771_s16 + $0x80] sm:$0xff]  ;;  %v467_v52 = vld [vmem:[%s1771_s16 + $0x90] sm:$0xff] }
  0x63   : > { %v470_v53 = vld [vmem:[%s1771_s16 + $0xa8] sm:$0xff]  ;;  %v472_v54 = vld [vmem:[%s1771_s16 + $0xb8] sm:$0xff]  ;;  %v469_v55 = vld [vmem:[%s1771_s16 + $0xa0] sm:$0xff] }
  0x64   : > { %1436 = vmatpush3.bf16.msra.mxu0 %v1435_v25  ;;  %v471_v56 = vld [vmem:[%s1771_s16 + $0xb0] sm:$0xff]  ;;  %v474_v57 = vld [vmem:[%s1771_s16 + $0xc8] sm:$0xff]  ;;  %v476_v58 = vld [vmem:[%s1771_s16 + $0xd8] sm:$0xff] }
  0x65   : > { %1468 = vmatpush3.bf16.msra.mxu1 %v1467_v26  ;;  %1438 = vmatprep.subr.bf16.mxu0 %v1437_v27  ;;  %v473_v59 = vld [vmem:[%s1771_s16 + $0xc0] sm:$0xff]  ;;  %v475_v60 = vld [vmem:[%s1771_s16 + $0xd0] sm:$0xff]  ;;  %v478_v61 = vld [vmem:[%s1771_s16 + $0xe8] sm:$0xff] }
  0x66   : > { %1470 = vmatprep.subr.bf16.mxu1 %v1469_v30  ;;  %v480_v62 = vld [vmem:[%s1771_s16 + $0xf8] sm:$0xff]  ;;  %v477_v63 = vld [vmem:[%s1771_s16 + $0xe0] sm:$0xff]  ;;  %v479_v0 = vld [vmem:[%s1771_s16 + $0xf0] sm:$0xff] }
  0x67   : > { %v482_v1 = vld [vmem:[%s1771_s16 + $0x108] sm:$0xff]  ;;  %v484_v2 = vld [vmem:[%s1771_s16 + $0x118] sm:$0xff]  ;;  %v481_v3 = vld [vmem:[%s1771_s16 + $0x100] sm:$0xff] }
  0x68   : > { %1440 = vmatpush3.bf16.msra.mxu0 %v1439_v33  ;;  %v483_v4 = vld [vmem:[%s1771_s16 + $0x110] sm:$0xff]  ;;  %v486_v5 = vld [vmem:[%s1771_s16 + $0x128] sm:$0xff]  ;;  %v488_v6 = vld [vmem:[%s1771_s16 + $0x138] sm:$0xff] }
  0x69   : > { %1472 = vmatpush3.bf16.msra.mxu1 %v1471_v34  ;;  %v485_v7 = vld [vmem:[%s1771_s16 + $0x120] sm:$0xff]  ;;  %v487_v8 = vld [vmem:[%s1771_s16 + $0x130] sm:$0xff]  ;;  %v490_v9 = vld [vmem:[%s1771_s16 + $0x148] sm:$0xff] }
  0x6a   : > { %v492_v10 = vld [vmem:[%s1771_s16 + $0x158] sm:$0xff]  ;;  %v489_v11 = vld [vmem:[%s1771_s16 + $0x140] sm:$0xff]  ;;  %v491_v12 = vld [vmem:[%s1771_s16 + $0x150] sm:$0xff] }
  0x6b   : > { %642 = vmatmul.mubr.f32.vlgmr.msra.gmra.mrb[0].mxu0 %v449_v35  ;;  %v494_v13 = vld [vmem:[%s1771_s16 + $0x168] sm:$0xff]  ;;  %v496_v14 = vld [vmem:[%s1771_s16 + $0x178] sm:$0xff]  ;;  %v493_v15 = vld [vmem:[%s1771_s16 + $0x160] sm:$0xff] }
  0x6c   : > { %787 = vmatmul.mubr.f32.vlgmr.msra.gmra.mrb[0].mxu1 %v451_v36  ;;  %646 = vmatprep.mubr.f32.mxu0 %v454_v37  ;;  %v495_v16 = vld [vmem:[%s1771_s16 + $0x170] sm:$0xff]  ;;  %v498_v17 = vld [vmem:[%s1771_s16 + $0x188] sm:$0xff]  ;;  %v500_v18 = vld [vmem:[%s1771_s16 + $0x198] sm:$0xff] }
  0x6d   : > { %791 = vmatprep.mubr.f32.mxu1 %v456_v38  ;;  %v497_v19 = vld [vmem:[%s1771_s16 + $0x180] sm:$0xff]  ;;  %v499_v20 = vld [vmem:[%s1771_s16 + $0x190] sm:$0xff]  ;;  %v502_v21 = vld [vmem:[%s1771_s16 + $0x1a8] sm:$0xff] }
  0x6e   : > { %v504_v22 = vld [vmem:[%s1771_s16 + $0x1b8] sm:$0xff]  ;;  %v501_v23 = vld [vmem:[%s1771_s16 + $0x1a0] sm:$0xff]  ;;  %v503_v24 = vld [vmem:[%s1771_s16 + $0x1b0] sm:$0xff] }
  0x6f   : > { %647 = vmatmul.mubr.f32.gmra.mrb[2].mxu0 %v453_v39  ;;  %v506_v25 = vld [vmem:[%s1771_s16 + $0x1c8] sm:$0xff]  ;;  %v508_v26 = vld [vmem:[%s1771_s16 + $0x1d8] sm:$0xff]  ;;  %v505_v27 = vld [vmem:[%s1771_s16 + $0x1c0] sm:$0xff] }
  0x70   : > { %792 = vmatmul.mubr.f32.gmra.mrb[2].mxu1 %v455_v40  ;;  %651 = vmatprep.mubr.f32.mxu0 %v458_v41  ;;  %v507_v28 = vld [vmem:[%s1771_s16 + $0x1d0] sm:$0xff]  ;;  %v510_v29 = vld [vmem:[%s1771_s16 + $0x1e8] sm:$0xff]  ;;  %v512_v30 = vld [vmem:[%s1771_s16 + $0x1f8] sm:$0xff] }
  0x71   : > { %796 = vmatprep.mubr.f32.mxu1 %v460_v42  ;;  %v509_v31 = vld [vmem:[%s1771_s16 + $0x1e0] sm:$0xff]  ;;  %v511_v32 = vld [vmem:[%s1771_s16 + $0x1f0] sm:$0xff] }
  0x72   : > { %v433_v39 = vld [vmem:[#allocation2] sm:$0xff] }
  0x73   : > { %652 = vmatmul.mubr.f32.gmra.mrb[4].mxu0 %v457_v43 }
  0x74   : > { %797 = vmatmul.mubr.f32.gmra.mrb[4].mxu1 %v459_v44  ;;  %656 = vmatprep.mubr.f32.mxu0 %v462_v45 }
  0x75   : > { %801 = vmatprep.mubr.f32.mxu1 %v464_v46 }
  0x77   : > { %657 = vmatmul.mubr.f32.gmra.mrb[6].mxu0 %v461_v47 }
  0x78   : > { %802 = vmatmul.mubr.f32.gmra.mrb[6].mxu1 %v463_v48  ;;  %661 = vmatprep.mubr.f32.mxu0 %v466_v49  ;;  %v434_v48 = vld [vmem:[#allocation2 + $0x8] sm:$0xff] }
  0x79   : > { %806 = vmatprep.mubr.f32.mxu1 %v468_v50 }
  0x7b   : > { %662 = vmatmul.mubr.f32.gmra.mrb[8].mxu0 %v465_v51 }
  0x7c   : > { %807 = vmatmul.mubr.f32.gmra.mrb[8].mxu1 %v467_v52  ;;  %666 = vmatprep.mubr.f32.mxu0 %v470_v53 }
  0x7d   : > { %811 = vmatprep.mubr.f32.mxu1 %v472_v54 }
  0x7f   : > { %667 = vmatmul.mubr.f32.gmra.mrb[10].mxu0 %v469_v55 }
  0x80   : > { %812 = vmatmul.mubr.f32.gmra.mrb[10].mxu1 %v471_v56  ;;  %671 = vmatprep.mubr.f32.mxu0 %v474_v57  ;;  %v435_v57 = vld [vmem:[#allocation2 + $0x10] sm:$0xff] }
  0x81   : > { %816 = vmatprep.mubr.f32.mxu1 %v476_v58 }
  0x83   : > { %672 = vmatmul.mubr.f32.gmra.mrb[12].mxu0 %v473_v59 }
  0x84   : > { %817 = vmatmul.mubr.f32.gmra.mrb[12].mxu1 %v475_v60  ;;  %676 = vmatprep.mubr.f32.mxu0 %v478_v61 }
  0x85   : > { %821 = vmatprep.mubr.f32.mxu1 %v480_v62 }
  0x87   : > { %677 = vmatmul.mubr.f32.gmra.mrb[14].mxu0 %v477_v63 }
  0x88   : > { %822 = vmatmul.mubr.f32.gmra.mrb[14].mxu1 %v479_v0  ;;  %681 = vmatprep.mubr.f32.mxu0 %v482_v1 }
  0x89   : > { %826 = vmatprep.mubr.f32.mxu1 %v484_v2  ;;  %v436_v2 = vld [vmem:[#allocation2 + $0x18] sm:$0xff] }
  0x8b   : > { %682 = vmatmul.mubr.f32.gmra.mrb[16].mxu0 %v481_v3 }
  0x8c   : > { %827 = vmatmul.mubr.f32.gmra.mrb[16].mxu1 %v483_v4  ;;  %686 = vmatprep.mubr.f32.mxu0 %v486_v5 }
  0x8d   : > { %831 = vmatprep.mubr.f32.mxu1 %v488_v6 }
  0x8f   : > { %687 = vmatmul.mubr.f32.gmra.mrb[18].mxu0 %v485_v7 }
  0x90   : > { %832 = vmatmul.mubr.f32.gmra.mrb[18].mxu1 %v487_v8  ;;  %691 = vmatprep.mubr.f32.mxu0 %v490_v9 }
  0x91   : > { %836 = vmatprep.mubr.f32.mxu1 %v492_v10 }
  0x93   : > { %692 = vmatmul.mubr.f32.gmra.mrb[20].mxu0 %v489_v11  ;;  %v437_v11 = vld [vmem:[#allocation2 + $0x20] sm:$0xff] }
  0x94   : > { %837 = vmatmul.mubr.f32.gmra.mrb[20].mxu1 %v491_v12  ;;  %696 = vmatprep.mubr.f32.mxu0 %v494_v13 }
  0x95   : > { %841 = vmatprep.mubr.f32.mxu1 %v496_v14 }
  0x97   : > { %697 = vmatmul.mubr.f32.gmra.mrb[22].mxu0 %v493_v15 }
  0x98   : > { %842 = vmatmul.mubr.f32.gmra.mrb[22].mxu1 %v495_v16  ;;  %701 = vmatprep.mubr.f32.mxu0 %v498_v17 }
  0x99   : > { %846 = vmatprep.mubr.f32.mxu1 %v500_v18 }
  0x9b   : > { %702 = vmatmul.mubr.f32.gmra.mrb[24].mxu0 %v497_v19 }
  0x9c   : > { %847 = vmatmul.mubr.f32.gmra.mrb[24].mxu1 %v499_v20  ;;  %706 = vmatprep.mubr.f32.mxu0 %v502_v21  ;;  %v438_v20 = vld [vmem:[#allocation2 + $0x28] sm:$0xff] }
  0x9d   : > { %851 = vmatprep.mubr.f32.mxu1 %v504_v22 }
  0x9f   : > { %707 = vmatmul.mubr.f32.gmra.mrb[26].mxu0 %v501_v23 }
  0xa0   : > { %852 = vmatmul.mubr.f32.gmra.mrb[26].mxu1 %v503_v24  ;;  %711 = vmatprep.mubr.f32.mxu0 %v506_v25 }
  0xa1   : > { %856 = vmatprep.mubr.f32.mxu1 %v508_v26 }
  0xa3   : > { %712 = vmatmul.mubr.f32.gmra.mrb[28].mxu0 %v505_v27 }
  0xa4   : > { %857 = vmatmul.mubr.f32.gmra.mrb[28].mxu1 %v507_v28  ;;  %716 = vmatprep.mubr.f32.mxu0 %v510_v29  ;;  %v439_v29 = vld [vmem:[#allocation2 + $0x30] sm:$0xff] }
  0xa5   : > { %861 = vmatprep.mubr.f32.mxu1 %v512_v30 }
  0xa7   : > { %717 = vmatmul.mubr.f32.gmra.mrb[30].mxu0 %v509_v31 }
  0xa8   : > { %862 = vmatmul.mubr.f32.gmra.mrb[30].mxu1 %v511_v32 }
 0x13e   : > { %v1281_v33 = vpop.f32.mrb[0].mxu0 }
 0x13f   : > { %v1361_v34 = vpop.f32.mrb[0].mxu1  ;;  %v1282_v35 = vpop.f32.mrb[1].mxu0 }
 0x140   : > { %v1283_v36 = vadd.f32 %v1282_v35, %v1281_v33  ;;  %v1362_v37 = vpop.f32.mrb[1].mxu1 }
 0x141   : > { %v1363_v38 = vadd.f32 %v1362_v37, %v1361_v34 }
 0x142   : > { %v1284_v40 = vpop.f32.mrb[2].mxu0 }
 0x143   : > { %v789_v41 = vadd.f32 %v1363_v38, %v1283_v36  ;;  %v1364_v42 = vpop.f32.mrb[2].mxu1  ;;  %v1285_v43 = vpop.f32.mrb[3].mxu0  ;;  %v440_v38 = vld [vmem:[#allocation2 + $0x38] sm:$0xff] }
 0x144   : > { %v1286_v44 = vadd.f32 %v1285_v43, %v1284_v40  ;;  %v1365_v45 = vpop.f32.mrb[3].mxu1 }
 0x145   : > { %v867_v46 = vadd.f32 %v789_v41, %v433_v39  ;;  %v1366_v47 = vadd.f32 %v1365_v45, %v1364_v42 }
 0x146   : > { %v1287_v49 = vpop.f32.mrb[4].mxu0 }
 0x147   : > { %883 = vst [vmem:[#allocation2] sm:$0xff] %v867_v46  ;;  %v794_v50 = vadd.f32 %v1366_v47, %v1286_v44  ;;  %v1367_v51 = vpop.f32.mrb[4].mxu1  ;;  %v1288_v52 = vpop.f32.mrb[5].mxu0  ;;  %v441_v47 = vld [vmem:[#allocation2 + $0x40] sm:$0xff] }
 0x148   : > { %v1289_v53 = vadd.f32 %v1288_v52, %v1287_v49  ;;  %v1368_v54 = vpop.f32.mrb[5].mxu1 }
 0x149   : > { %v868_v55 = vadd.f32 %v794_v50, %v434_v48  ;;  %v1369_v56 = vadd.f32 %v1368_v54, %v1367_v51 }
 0x14a   : > { %v1290_v58 = vpop.f32.mrb[6].mxu0 }
 0x14b   : > { %884 = vst [vmem:[#allocation2 + $0x8] sm:$0xff] %v868_v55  ;;  %v799_v59 = vadd.f32 %v1369_v56, %v1289_v53  ;;  %v1370_v60 = vpop.f32.mrb[6].mxu1  ;;  %v1291_v61 = vpop.f32.mrb[7].mxu0  ;;  %v442_v56 = vld [vmem:[#allocation2 + $0x48] sm:$0xff] }
 0x14c   : > { %v1292_v62 = vadd.f32 %v1291_v61, %v1290_v58  ;;  %v1371_v63 = vpop.f32.mrb[7].mxu1 }
 0x14d   : > { %v869_v0 = vadd.f32 %v799_v59, %v435_v57  ;;  %v1372_v1 = vadd.f32 %v1371_v63, %v1370_v60 }
 0x14e   : > { %v1293_v3 = vpop.f32.mrb[8].mxu0 }
 0x14f   : > { %885 = vst [vmem:[#allocation2 + $0x10] sm:$0xff] %v869_v0  ;;  %v804_v4 = vadd.f32 %v1372_v1, %v1292_v62  ;;  %v1373_v5 = vpop.f32.mrb[8].mxu1  ;;  %v1294_v6 = vpop.f32.mrb[9].mxu0  ;;  %v443_v1 = vld [vmem:[#allocation2 + $0x50] sm:$0xff] }
 0x150   : > { %v1295_v7 = vadd.f32 %v1294_v6, %v1293_v3  ;;  %v1374_v8 = vpop.f32.mrb[9].mxu1 }
 0x151   : > { %v870_v9 = vadd.f32 %v804_v4, %v436_v2  ;;  %v1375_v10 = vadd.f32 %v1374_v8, %v1373_v5 }
 0x152   : > { %v1296_v12 = vpop.f32.mrb[10].mxu0 }
 0x153   : > { %886 = vst [vmem:[#allocation2 + $0x18] sm:$0xff] %v870_v9  ;;  %v809_v13 = vadd.f32 %v1375_v10, %v1295_v7  ;;  %v1376_v14 = vpop.f32.mrb[10].mxu1  ;;  %v1297_v15 = vpop.f32.mrb[11].mxu0  ;;  %v444_v10 = vld [vmem:[#allocation2 + $0x58] sm:$0xff] }
 0x154   : > { %v1298_v16 = vadd.f32 %v1297_v15, %v1296_v12  ;;  %v1377_v17 = vpop.f32.mrb[11].mxu1 }
 0x155   : > { %v871_v18 = vadd.f32 %v809_v13, %v437_v11  ;;  %v1378_v19 = vadd.f32 %v1377_v17, %v1376_v14 }
 0x156   : > { %v1299_v21 = vpop.f32.mrb[12].mxu0 }
 0x157   : > { %887 = vst [vmem:[#allocation2 + $0x20] sm:$0xff] %v871_v18  ;;  %v814_v22 = vadd.f32 %v1378_v19, %v1298_v16  ;;  %v1379_v23 = vpop.f32.mrb[12].mxu1  ;;  %v1300_v24 = vpop.f32.mrb[13].mxu0  ;;  %v445_v19 = vld [vmem:[#allocation2 + $0x60] sm:$0xff] }
 0x158   : > { %v1301_v25 = vadd.f32 %v1300_v24, %v1299_v21  ;;  %v1380_v26 = vpop.f32.mrb[13].mxu1 }
 0x159   : > { %v872_v27 = vadd.f32 %v814_v22, %v438_v20  ;;  %v1381_v28 = vadd.f32 %v1380_v26, %v1379_v23 }
 0x15a   : > { %v1302_v30 = vpop.f32.mrb[14].mxu0 }
 0x15b   : > { %888 = vst [vmem:[#allocation2 + $0x28] sm:$0xff] %v872_v27  ;;  %v819_v31 = vadd.f32 %v1381_v28, %v1301_v25  ;;  %v1382_v32 = vpop.f32.mrb[14].mxu1  ;;  %v1303_v33 = vpop.f32.mrb[15].mxu0  ;;  %v446_v28 = vld [vmem:[#allocation2 + $0x68] sm:$0xff] }
 0x15c   : > { %v1304_v34 = vadd.f32 %v1303_v33, %v1302_v30  ;;  %v1383_v35 = vpop.f32.mrb[15].mxu1 }
 0x15d   : > { %v873_v36 = vadd.f32 %v819_v31, %v439_v29  ;;  %v1384_v37 = vadd.f32 %v1383_v35, %v1382_v32 }
 0x15e   : > { %v1305_v39 = vpop.f32.mrb[16].mxu0 }
 0x15f   : > { %889 = vst [vmem:[#allocation2 + $0x30] sm:$0xff] %v873_v36  ;;  %v824_v40 = vadd.f32 %v1384_v37, %v1304_v34  ;;  %v1385_v41 = vpop.f32.mrb[16].mxu1  ;;  %v1306_v42 = vpop.f32.mrb[17].mxu0  ;;  %v447_v37 = vld [vmem:[#allocation2 + $0x70] sm:$0xff] }
 0x160   : > { %v1307_v43 = vadd.f32 %v1306_v42, %v1305_v39  ;;  %v1386_v44 = vpop.f32.mrb[17].mxu1 }
 0x161   : > { %v874_v45 = vadd.f32 %v824_v40, %v440_v38  ;;  %v1387_v46 = vadd.f32 %v1386_v44, %v1385_v41 }
 0x162   : > { %v1308_v48 = vpop.f32.mrb[18].mxu0 }
 0x163   : > { %890 = vst [vmem:[#allocation2 + $0x38] sm:$0xff] %v874_v45  ;;  %v829_v49 = vadd.f32 %v1387_v46, %v1307_v43  ;;  %v1388_v50 = vpop.f32.mrb[18].mxu1  ;;  %v1309_v51 = vpop.f32.mrb[19].mxu0  ;;  %v448_v46 = vld [vmem:[#allocation2 + $0x78] sm:$0xff] }
 0x164   : > { %v1310_v52 = vadd.f32 %v1309_v51, %v1308_v48  ;;  %v1389_v53 = vpop.f32.mrb[19].mxu1  ;;  %v905_v51 = vld [vmem:[#allocation2 + $0x10] sm:$0xff] (!%p1240_p11) }
 0x165   : > { %v875_v54 = vadd.f32 %v829_v49, %v441_v47  ;;  %v1390_v55 = vadd.f32 %v1389_v53, %v1388_v50  ;;  %v903_v49 = vld [vmem:[#allocation2] sm:$0xff] (!%p1240_p11)  ;;  %v904_v50 = vld [vmem:[#allocation2 + $0x8] sm:$0xff] (!%p1240_p11) }
 0x166   : > { %v1311_v57 = vpop.f32.mrb[20].mxu0 }
 0x167   : > { %891 = vst [vmem:[#allocation2 + $0x40] sm:$0xff] %v875_v54  ;;  %v834_v58 = vadd.f32 %v1390_v55, %v1310_v52  ;;  %v1391_v59 = vpop.f32.mrb[20].mxu1  ;;  %v1312_v60 = vpop.f32.mrb[21].mxu0  ;;  %v1241_v52 = vld [vmem:[%s2071_s2] ss:$0 sm:$0xff] (!%p1240_p11)  ;;  %v906_v55 = vld [vmem:[#allocation2 + $0x18] sm:$0xff] (!%p1240_p11) }
 0x168   : > { %v1313_v61 = vadd.f32 %v1312_v60, %v1311_v57  ;;  %v1392_v62 = vpop.f32.mrb[21].mxu1  ;;  %v926_v53 = vadd.f32 (!%p1240_p11), %v1241_v52, %v903_v49  ;;  %v927_v54 = vadd.f32 (!%p1240_p11), %v1241_v52, %v904_v50  ;;  %v907_v57 = vld [vmem:[#allocation2 + $0x20] sm:$0xff] (!%p1240_p11)  ;;  %v908_v60 = vld [vmem:[#allocation2 + $0x28] sm:$0xff] (!%p1240_p11) }
 0x169   : > { %v876_v63 = vadd.f32 %v834_v58, %v442_v56  ;;  %v1393_v0 = vadd.f32 %v1392_v62, %v1391_v59  ;;  %v928_v56 = vadd.f32 (!%p1240_p11), %v1241_v52, %v905_v51  ;;  %v929_v58 = vadd.f32 (!%p1240_p11), %v1241_v52, %v906_v55 }
 0x16a   : > { %v1314_v2 = vpop.f32.mrb[22].mxu0  ;;  %v942_v59 = vadd.f32 (!%p1240_p11), %v927_v54, %v926_v53 }
 0x16b   : > { %892 = vst [vmem:[#allocation2 + $0x48] sm:$0xff] %v876_v63  ;;  %v839_v3 = vadd.f32 %v1393_v0, %v1313_v61  ;;  %v1394_v4 = vpop.f32.mrb[22].mxu1  ;;  %v1315_v5 = vpop.f32.mrb[23].mxu0  ;;  %v930_v61 = vadd.f32 (!%p1240_p11), %v1241_v52, %v907_v57  ;;  %v909_v63 = vld [vmem:[#allocation2 + $0x30] sm:$0xff] (!%p1240_p11)  ;;  %v931_v0 = vadd.f32 (!%p1240_p11), %v1241_v52, %v908_v60 }
 0x16c   : > { %v1316_v6 = vadd.f32 %v1315_v5, %v1314_v2  ;;  %v1395_v7 = vpop.f32.mrb[23].mxu1  ;;  %v943_v62 = vadd.f32 (!%p1240_p11), %v942_v59, %v928_v56  ;;  %v910_v2 = vld [vmem:[#allocation2 + $0x38] sm:$0xff] (!%p1240_p11) }
 0x16d   : > { %v877_v8 = vadd.f32 %v839_v3, %v443_v1  ;;  %v1396_v9 = vadd.f32 %v1395_v7, %v1394_v4  ;;  %v932_v3 = vadd.f32 (!%p1240_p11), %v1241_v52, %v909_v63 }
 0x16e   : > { %v1317_v11 = vpop.f32.mrb[24].mxu0  ;;  %v944_v1 = vadd.f32 (!%p1240_p11), %v943_v62, %v929_v58  ;;  %v911_v5 = vld [vmem:[#allocation2 + $0x40] sm:$0xff] (!%p1240_p11) }
 0x16f   : > { %893 = vst [vmem:[#allocation2 + $0x50] sm:$0xff] %v877_v8  ;;  %v844_v12 = vadd.f32 %v1396_v9, %v1316_v6  ;;  %v1397_v13 = vpop.f32.mrb[24].mxu1  ;;  %v1318_v14 = vpop.f32.mrb[25].mxu0  ;;  %v933_v6 = vadd.f32 (!%p1240_p11), %v1241_v52, %v910_v2  ;;  %v934_v9 = vadd.f32 (!%p1240_p11), %v1241_v52, %v911_v5 }
 0x170   : > { %v1319_v15 = vadd.f32 %v1318_v14, %v1317_v11  ;;  %v1398_v16 = vpop.f32.mrb[25].mxu1  ;;  %v945_v4 = vadd.f32 (!%p1240_p11), %v944_v1, %v930_v61 }
 0x171   : > { %v878_v17 = vadd.f32 %v844_v12, %v444_v10  ;;  %v1399_v18 = vadd.f32 %v1398_v16, %v1397_v13 }
 0x172   : > { %v1320_v20 = vpop.f32.mrb[26].mxu0  ;;  %v946_v7 = vadd.f32 (!%p1240_p11), %v945_v4, %v931_v0  ;;  %v912_v8 = vld [vmem:[#allocation2 + $0x48] sm:$0xff] (!%p1240_p11) }
 0x173   : > { %894 = vst [vmem:[#allocation2 + $0x58] sm:$0xff] %v878_v17  ;;  %v849_v21 = vadd.f32 %v1399_v18, %v1319_v15  ;;  %v1400_v22 = vpop.f32.mrb[26].mxu1  ;;  %v1321_v23 = vpop.f32.mrb[27].mxu0  ;;  %v935_v12 = vadd.f32 (!%p1240_p11), %v1241_v52, %v912_v8 }
 0x174   : > { %v1322_v24 = vadd.f32 %v1321_v23, %v1320_v20  ;;  %v1401_v25 = vpop.f32.mrb[27].mxu1  ;;  %v947_v10 = vadd.f32 (!%p1240_p11), %v946_v7, %v932_v3 }
 0x175   : > { %v879_v26 = vadd.f32 %v849_v21, %v445_v19  ;;  %v1402_v27 = vadd.f32 %v1401_v25, %v1400_v22 }
 0x176   : > { %v1323_v29 = vpop.f32.mrb[28].mxu0  ;;  %v913_v11 = vld [vmem:[#allocation2 + $0x50] sm:$0xff] (!%p1240_p11)  ;;  %v948_v13 = vadd.f32 (!%p1240_p11), %v947_v10, %v933_v6 }
 0x177   : > { %895 = vst [vmem:[#allocation2 + $0x60] sm:$0xff] %v879_v26  ;;  %v854_v30 = vadd.f32 %v1402_v27, %v1322_v24  ;;  %v1403_v31 = vpop.f32.mrb[28].mxu1  ;;  %v1324_v32 = vpop.f32.mrb[29].mxu0  ;;  %v936_v15 = vadd.f32 (!%p1240_p11), %v1241_v52, %v913_v11 }
 0x178   : > { %v1325_v33 = vadd.f32 %v1324_v32, %v1323_v29  ;;  %v1404_v34 = vpop.f32.mrb[29].mxu1  ;;  %v949_v16 = vadd.f32 (!%p1240_p11), %v948_v13, %v934_v9 }
 0x179   : > { %v880_v35 = vadd.f32 %v854_v30, %v446_v28  ;;  %v1405_v36 = vadd.f32 %v1404_v34, %v1403_v31 }
 0x17a   : > { %v1326_v38 = vpop.f32.mrb[30].mxu0  ;;  %v914_v14 = vld [vmem:[#allocation2 + $0x58] sm:$0xff] (!%p1240_p11)  ;;  %v950_v19 = vadd.f32 (!%p1240_p11), %v949_v16, %v935_v12 }
 0x17b   : > { %896 = vst [vmem:[#allocation2 + $0x68] sm:$0xff] %v880_v35  ;;  %v859_v39 = vadd.f32 %v1405_v36, %v1325_v33  ;;  %v1406_v40 = vpop.f32.mrb[30].mxu1  ;;  %v1327_v41 = vpop.f32.mrb[31].mxu0  ;;  %v937_v18 = vadd.f32 (!%p1240_p11), %v1241_v52, %v914_v14 }
 0x17c   : > { %v1328_v42 = vadd.f32 %v1327_v41, %v1326_v38  ;;  %v1407_v43 = vpop.f32.mrb[31].mxu1  ;;  %v951_v22 = vadd.f32 (!%p1240_p11), %v950_v19, %v936_v15 }
 0x17d   : > { %v881_v44 = vadd.f32 %v859_v39, %v447_v37  ;;  %v1408_v45 = vadd.f32 %v1407_v43, %v1406_v40  ;;  %902 = sbr.rel (%p1240_p11) target bundleno = 503 (0x1f7), region = 71 }
 0x17e   : > { %v915_v17 = vld [vmem:[#allocation2 + $0x60] sm:$0xff] (!%p1240_p11)  ;;  %v952_v25 = vadd.f32 (!%p1240_p11), %v951_v22, %v937_v18 }
 0x17f   : > { %897 = vst [vmem:[#allocation2 + $0x70] sm:$0xff] %v881_v44  ;;  %v864_v47 = vadd.f32 %v1408_v45, %v1328_v42  ;;  %v938_v21 = vadd.f32 (!%p1240_p11), %v1241_v52, %v915_v17 }
 0x181   : > { %v882_v48 = vadd.f32 %v864_v47, %v448_v46  ;;  %v953_v28 = vadd.f32 (!%p1240_p11), %v952_v25, %v938_v21 }
 0x182   : > { %v916_v20 = vld [vmem:[#allocation2 + $0x68] sm:$0xff] (!%p1240_p11) }
 0x183   : > { %898 = vst [vmem:[#allocation2 + $0x78] sm:$0xff] %v882_v48  ;;  %v939_v24 = vadd.f32 (!%p1240_p11), %v1241_v52, %v916_v20 }
 0x185   : > { %v954_v30 = vadd.f32 %v953_v28, %v939_v24 }
 0x186   : > { %v917_v23 = vld [vmem:[#allocation2 + $0x70] sm:$0xff] }
 0x187   : > { %v940_v27 = vadd.f32 %v1241_v52, %v917_v23 }
 0x189   : > { %v955_v31 = vadd.f32 %v954_v30, %v940_v27 }
 0x18a   : > { %v918_v26 = vld [vmem:[#allocation2 + $0x78] sm:$0xff] }
 0x18b   : > { %v941_v29 = vadd.f32 %v1241_v52, %v918_v26 }
 0x18d   : > { %v956_v32 = vadd.f32 %v955_v31, %v941_v29 }
 0x18f   : > { %v957_v33 = vrot.slane %v956_v32, 4 }
 0x191   : > { %v958_v34 = vadd.f32 %v957_v33, %v956_v32  ;;  %v1943_v32 = vld [vmem:[%s2072_s3] ss:$0 sm:$0xff] }
 0x193   : > { %v959_v35 = vrot.slane %v958_v34, 2 }
 0x195   : > { %v960_v36 = vadd.f32 %v959_v35, %v958_v34 }
 0x197   : > { %v961_v37 = vrot.slane %v960_v36, 1 }
 0x199   : > { %v962_v38 = vadd.f32 %v961_v37, %v960_v36  ;;  %v1952_v37 = vld [vmem:[%s2073_s4] ss:$0 sm:$0xff] }
 0x19b   : > { %v963_v39 = vmul.f32 0.0078125, %v962_v38 }
 0x19d   : > { %v964_v40 = vsub.f32 %v926_v53, %v963_v39  ;;  %v965_v41 = vsub.f32 %v927_v54, %v963_v39  ;;  %v966_v42 = vsub.f32 %v928_v56, %v963_v39  ;;  %v967_v43 = vsub.f32 %v929_v58, %v963_v39 }
 0x19e   : > { %v968_v46 = vsub.f32 %v930_v61, %v963_v39  ;;  %v969_v48 = vsub.f32 %v931_v0, %v963_v39  ;;  %v970_v51 = vsub.f32 %v932_v3, %v963_v39  ;;  %v971_v57 = vsub.f32 %v933_v6, %v963_v39 }
 0x19f   : > { %v980_v44 = vmul.f32 %v964_v40, %v964_v40  ;;  %v981_v45 = vmul.f32 %v965_v41, %v965_v41  ;;  %v982_v47 = vmul.f32 %v966_v42, %v966_v42  ;;  %v983_v49 = vmul.f32 %v967_v43, %v967_v43 }
 0x1a0   : > { %v984_v52 = vmul.f32 %v968_v46, %v968_v46  ;;  %v985_v59 = vmul.f32 %v969_v48, %v969_v48  ;;  %v1906_v62 = vsub.f32 %v934_v9, %v963_v39  ;;  %v986_v63 = vmul.f32 %v970_v51, %v970_v51 }
 0x1a1   : > { %v996_v50 = vadd.f32 %v981_v45, %v980_v44  ;;  %v1908_v54 = vsub.f32 %v935_v12, %v963_v39  ;;  %v987_v56 = vmul.f32 %v971_v57, %v971_v57  ;;  %v1910_v1 = vsub.f32 %v936_v15, %v963_v39 }
 0x1a2   : > { %v988_v61 = vmul.f32 %v1906_v62, %v1906_v62  ;;  %v1914_v2 = vsub.f32 %v937_v18, %v963_v39  ;;  %v1918_v5 = vsub.f32 %v938_v21, %v963_v39  ;;  %v1922_v8 = vsub.f32 %v939_v24, %v963_v39 }
 0x1a3   : > { %v997_v55 = vadd.f32 %v996_v50, %v982_v47  ;;  %v989_v3 = vmul.f32 %v1908_v54, %v1908_v54  ;;  %v990_v6 = vmul.f32 %v1910_v1, %v1910_v1  ;;  %v1926_v11 = vsub.f32 %v940_v27, %v963_v39 }
 0x1a4   : > { %v991_v9 = vmul.f32 %v1914_v2, %v1914_v2  ;;  %v992_v12 = vmul.f32 %v1918_v5, %v1918_v5  ;;  %v1930_v14 = vsub.f32 %v941_v29, %v963_v39  ;;  %v993_v15 = vmul.f32 %v1922_v8, %v1922_v8 }
 0x1a5   : > { %v998_v60 = vadd.f32 %v997_v55, %v983_v49  ;;  %v994_v17 = vmul.f32 %v1926_v11, %v1926_v11 }
 0x1a6   : > { %v995_v19 = vmul.f32 %v1930_v14, %v1930_v14 }
 0x1a7   : > { %v999_v53 = vadd.f32 %v998_v60, %v984_v52 }
 0x1a9   : > { %v1000_v58 = vadd.f32 %v999_v53, %v985_v59 }
 0x1ab   : > { %v1001_v0 = vadd.f32 %v1000_v58, %v986_v63 }
 0x1ad   : > { %v1002_v4 = vadd.f32 %v1001_v0, %v987_v56 }
 0x1af   : > { %v1003_v7 = vadd.f32 %v1002_v4, %v988_v61 }
 0x1b1   : > { %v1004_v10 = vadd.f32 %v1003_v7, %v989_v3 }
 0x1b3   : > { %v1005_v13 = vadd.f32 %v1004_v10, %v990_v6 }
 0x1b5   : > { %v1006_v16 = vadd.f32 %v1005_v13, %v991_v9 }
 0x1b7   : > { %v1007_v18 = vadd.f32 %v1006_v16, %v992_v12 }
 0x1b9   : > { %v1008_v20 = vadd.f32 %v1007_v18, %v993_v15 }
 0x1bb   : > { %v1009_v21 = vadd.f32 %v1008_v20, %v994_v17 }
 0x1bd   : > { %v1010_v22 = vadd.f32 %v1009_v21, %v995_v19 }
 0x1bf   : > { %v1011_v23 = vrot.slane %v1010_v22, 4 }
 0x1c1   : > { %v1012_v24 = vadd.f32 %v1011_v23, %v1010_v22 }
 0x1c3   : > { %v1013_v25 = vrot.slane %v1012_v24, 2 }
 0x1c5   : > { %v1014_v26 = vadd.f32 %v1013_v25, %v1012_v24 }
 0x1c7   : > { %v1015_v27 = vrot.slane %v1014_v26, 1 }
 0x1c9   : > { %v1016_v28 = vadd.f32 %v1015_v27, %v1014_v26 }
 0x1cb   : > { %v1017_v29 = vmul.f32 0.0078125, %v1016_v28 }
 0x1cd   : > { %v1018_v30 = vadd.f32 1e-05, %v1017_v29 }
 0x1cf   : > { %1514 = vrsqrt.f32 %v1018_v30 }
 0x1d9   : > { %v1938_v31 = vpop.eup %1514 }
 0x1da   : > { %v1020_v33 = vmul.f32 %v1938_v31, %v964_v40  ;;  %v1021_v34 = vmul.f32 %v1938_v31, %v965_v41  ;;  %v1022_v35 = vmul.f32 %v1938_v31, %v966_v42  ;;  %v1023_v36 = vmul.f32 %v1938_v31, %v967_v43 }
 0x1db   : > { %v1024_v38 = vmul.f32 %v1938_v31, %v968_v46  ;;  %v1025_v39 = vmul.f32 %v1938_v31, %v969_v48  ;;  %v1026_v44 = vmul.f32 %v1938_v31, %v970_v51  ;;  %v1027_v45 = vmul.f32 %v1938_v31, %v971_v57 }
 0x1dc   : > { %v1043_v40 = vmul.f32 %v1943_v32, %v1020_v33  ;;  %v1044_v41 = vmul.f32 %v1943_v32, %v1021_v34  ;;  %v1045_v42 = vmul.f32 %v1943_v32, %v1022_v35  ;;  %v1046_v43 = vmul.f32 %v1943_v32, %v1023_v36 }
 0x1dd   : > { %v1047_v47 = vmul.f32 %v1943_v32, %v1024_v38  ;;  %v1048_v49 = vmul.f32 %v1943_v32, %v1025_v39  ;;  %v1049_v46 = vmul.f32 %v1943_v32, %v1026_v44  ;;  %v1050_v48 = vmul.f32 %v1943_v32, %v1027_v45 }
 0x1de   : > { %v1066_v50 = vadd.f32 %v1952_v37, %v1043_v40  ;;  %v1067_v51 = vadd.f32 %v1952_v37, %v1044_v41  ;;  %v1068_v52 = vadd.f32 %v1952_v37, %v1045_v42  ;;  %v1069_v55 = vadd.f32 %v1952_v37, %v1046_v43 }
 0x1df   : > { %v1070_v57 = vadd.f32 %v1952_v37, %v1047_v47  ;;  %v1071_v59 = vadd.f32 %v1952_v37, %v1048_v49  ;;  %v1072_v60 = vadd.f32 %v1952_v37, %v1049_v46  ;;  %v1073_v63 = vadd.f32 %v1952_v37, %v1050_v48 }
 0x1e0   : > { %vm1082_vm0 = vcmp.ge.f32.partialorder %v1066_v50, 0.0  ;;  %v1098_v53 = vmul.f32 0.2, %v1066_v50  ;;  %vm1083_vm1 = vcmp.ge.f32.partialorder %v1067_v51, 0.0  ;;  %v1099_v56 = vmul.f32 0.2, %v1067_v51 }
 0x1e1   : > { %vm1084_vm2 = vcmp.ge.f32.partialorder %v1068_v52, 0.0  ;;  %v1100_v58 = vmul.f32 0.2, %v1068_v52  ;;  %vm1085_vm3 = vcmp.ge.f32.partialorder %v1069_v55, 0.0  ;;  %v1101_v61 = vmul.f32 0.2, %v1069_v55 }
 0x1e2   : > { %v1114_v0 = vsel %vm1082_vm0, %v1066_v50, %v1098_v53  ;;  %v1115_v3 = vsel %vm1083_vm1, %v1067_v51, %v1099_v56  ;;  %vm1086_vm4 = vcmp.ge.f32.partialorder %v1070_v57, 0.0  ;;  %v1102_v4 = vmul.f32 0.2, %v1070_v57 }
 0x1e3   : > { %1130 = vst [vmem:[%s2074_s5] sm:$0xff] %v1114_v0  ;;  %1131 = vst [vmem:[%s2074_s5 + $0x8] sm:$0xff] %v1115_v3  ;;  %v1116_v6 = vsel %vm1084_vm2, %v1068_v52, %v1100_v58  ;;  %v1117_v7 = vsel %vm1085_vm3, %v1069_v55, %v1101_v61  ;;  %vm1087_vm5 = vcmp.ge.f32.partialorder %v1071_v59, 0.0  ;;  %v1103_v9 = vmul.f32 0.2, %v1071_v59 }
 0x1e4   : > { %1132 = vst [vmem:[%s2074_s5 + $0x10] sm:$0xff] %v1116_v6  ;;  %1133 = vst [vmem:[%s2074_s5 + $0x18] sm:$0xff] %v1117_v7  ;;  %v1118_v10 = vsel %vm1086_vm4, %v1070_v57, %v1102_v4  ;;  %vm1088_vm6 = vcmp.ge.f32.partialorder %v1072_v60, 0.0  ;;  %v1104_v12 = vmul.f32 0.2, %v1072_v60  ;;  %vm1089_vm7 = vcmp.ge.f32.partialorder %v1073_v63, 0.0 }
 0x1e5   : > { %1134 = vst [vmem:[%s2074_s5 + $0x20] sm:$0xff] %v1118_v10  ;;  %v1119_v13 = vsel %vm1087_vm5, %v1071_v59, %v1103_v9  ;;  %v1105_v15 = vmul.f32 0.2, %v1073_v63  ;;  %v1028_v16 = vmul.f32 %v1938_v31, %v1906_v62  ;;  %v1029_v17 = vmul.f32 %v1938_v31, %v1908_v54 }
 0x1e6   : > { %1135 = vst [vmem:[%s2074_s5 + $0x28] sm:$0xff] %v1119_v13  ;;  %v1120_v18 = vsel %vm1088_vm6, %v1072_v60, %v1104_v12  ;;  %v1030_v19 = vmul.f32 %v1938_v31, %v1910_v1  ;;  %v1031_v20 = vmul.f32 %v1938_v31, %v1914_v2  ;;  %v1032_v21 = vmul.f32 %v1938_v31, %v1918_v5 }
 0x1e7   : > { %1136 = vst [vmem:[%s2074_s5 + $0x30] sm:$0xff] %v1120_v18  ;;  %v1121_v62 = vsel %vm1089_vm7, %v1073_v63, %v1105_v15  ;;  %v1051_v54 = vmul.f32 %v1943_v32, %v1028_v16  ;;  %v1052_v22 = vmul.f32 %v1943_v32, %v1029_v17  ;;  %v1033_v23 = vmul.f32 %v1938_v31, %v1922_v8 }
 0x1e8   : > { %1137 = vst [vmem:[%s2074_s5 + $0x38] sm:$0xff] %v1121_v62  ;;  %v1053_v1 = vmul.f32 %v1943_v32, %v1030_v19  ;;  %v1054_v2 = vmul.f32 %v1943_v32, %v1031_v20  ;;  %v1055_v5 = vmul.f32 %v1943_v32, %v1032_v21  ;;  %v1034_v24 = vmul.f32 %v1938_v31, %v1926_v11 }
 0x1e9   : > { %v1074_v25 = vadd.f32 %v1952_v37, %v1051_v54  ;;  %v1075_v26 = vadd.f32 %v1952_v37, %v1052_v22  ;;  %v1056_v27 = vmul.f32 %v1943_v32, %v1033_v23  ;;  %v1035_v8 = vmul.f32 %v1938_v31, %v1930_v14 }
 0x1ea   : > { %v1076_v28 = vadd.f32 %v1952_v37, %v1053_v1  ;;  %v1077_v29 = vadd.f32 %v1952_v37, %v1054_v2  ;;  %v1078_v30 = vadd.f32 %v1952_v37, %v1055_v5  ;;  %v1057_v33 = vmul.f32 %v1943_v32, %v1034_v24 }
 0x1eb   : > { %vm1090_vm8 = vcmp.ge.f32.partialorder %v1074_v25, 0.0  ;;  %v1106_v34 = vmul.f32 0.2, %v1074_v25  ;;  %vm1091_vm9 = vcmp.ge.f32.partialorder %v1075_v26, 0.0  ;;  %v1107_v11 = vmul.f32 0.2, %v1075_v26 }
 0x1ec   : > { %vm1092_vm10 = vcmp.ge.f32.partialorder %v1076_v28, 0.0  ;;  %v1108_v35 = vmul.f32 0.2, %v1076_v28  ;;  %vm1093_vm11 = vcmp.ge.f32.partialorder %v1077_v29, 0.0  ;;  %v1109_v36 = vmul.f32 0.2, %v1077_v29 }
 0x1ed   : > { %v1122_v38 = vsel %vm1090_vm8, %v1074_v25, %v1106_v34  ;;  %v1123_v39 = vsel %vm1091_vm9, %v1075_v26, %v1107_v11  ;;  %vm1094_vm12 = vcmp.ge.f32.partialorder %v1078_v30, 0.0  ;;  %v1110_v14 = vmul.f32 0.2, %v1078_v30 }
 0x1ee   : > { %1138 = vst [vmem:[%s2074_s5 + $0x40] sm:$0xff] %v1122_v38  ;;  %1139 = vst [vmem:[%s2074_s5 + $0x48] sm:$0xff] %v1123_v39  ;;  %v1124_v31 = vsel %vm1092_vm10, %v1076_v28, %v1108_v35  ;;  %v1125_v44 = vsel %vm1093_vm11, %v1077_v29, %v1109_v36  ;;  %v1079_v45 = vadd.f32 %v1952_v37, %v1056_v27 }
 0x1ef   : > { %v1080_v40 = vadd.f32 %v1952_v37, %v1057_v33  ;;  %1140 = vst [vmem:[%s2074_s5 + $0x50] sm:$0xff] %v1124_v31  ;;  %1141 = vst [vmem:[%s2074_s5 + $0x58] sm:$0xff] %v1125_v44  ;;  %v1126_v41 = vsel %vm1094_vm12, %v1078_v30, %v1110_v14  ;;  %v1058_v42 = vmul.f32 %v1943_v32, %v1035_v8 }
 0x1f0   : > { %1142 = vst [vmem:[%s2074_s5 + $0x60] sm:$0xff] %v1126_v41  ;;  %vm1095_vm13 = vcmp.ge.f32.partialorder %v1079_v45, 0.0  ;;  %v1111_v43 = vmul.f32 0.2, %v1079_v45 }
 0x1f1   : > { %vm1096_vm14 = vcmp.ge.f32.partialorder %v1080_v40, 0.0  ;;  %v1112_v47 = vmul.f32 0.2, %v1080_v40  ;;  %v1081_v49 = vadd.f32 %v1952_v37, %v1058_v42 }
 0x1f2   : > { %v1127_v46 = vsel %vm1095_vm13, %v1079_v45, %v1111_v43 }
 0x1f3   : > { %v1128_v48 = vsel %vm1096_vm14, %v1080_v40, %v1112_v47  ;;  %1143 = vst [vmem:[%s2074_s5 + $0x68] sm:$0xff] %v1127_v46  ;;  %vm1097_vm15 = vcmp.ge.f32.partialorder %v1081_v49, 0.0  ;;  %v1113_v32 = vmul.f32 0.2, %v1081_v49 }
 0x1f4   : > { %1144 = vst [vmem:[%s2074_s5 + $0x70] sm:$0xff] %v1128_v48 }
 0x1f5   : > { %v1129_v50 = vsel %vm1097_vm15, %v1081_v49, %v1113_v32 }
 0x1f6   : > { %1145 = vst [vmem:[%s2074_s5 + $0x78] sm:$0xff] %v1129_v50 }
 0x1f7 PF: > { %s15_s22 = sadd.s32 1, %s1554_s22   ;;  %s2075_s18 = smov %s1542_s19 }
 0x1f8   : > { %p12_p12 = scmp.ge.s32.totalorder %s15_s22, 4   ;;  %s2076_s19 = smov %s1622_s26 }
 0x1f9   : > { %s2077_s20 = smov %s1550_s21  ;;  %s2078_s21 = smov %s2080_s23 }
 0x1fa   :  { %14 = sbr.rel (!%p12_p12) target bundleno = 3 (0x3), region = 109 }

// kernel: patch_discriminator.7
= control target key start
LH: loop header
LB: loop body
LE: loop exit
PB: predicated region body
PF: predicated region fallthrough
CT: control target
= control target key end

     0   :  { %s1208_s18 = smov 0   ;;  %s1210_s19 = smov 0   ;;  %s1484_s0 = inlined_call_operand.vmem [shape: f32[32,2048], index: 0, kind: input, shape index: {}]   ;;  %s1485_s1 = inlined_call_operand.vmem [shape: f32[2048,256], index: 1, kind: input, shape index: {}]   ;;  %s1486_s2 = inlined_call_operand.vmem [shape: f32[1,256], index: 2, kind: input, shape index: {}]   ;;  %s1487_s3 = inlined_call_operand.vmem [shape: f32[1,256], index: 3, kind: input, shape index: {}]   ;;  %s1488_s4 = inlined_call_operand.vmem [shape: f32[1,256], index: 4, kind: input, shape index: {}]   ;;  %s1489_s5 = inlined_call_operand.vmem [shape: f32[32,256], index: 5, kind: output, shape index: {}]  }
   0x1   :  { %s1212_s20 = smov 0   ;;  %s1214_s21 = smov 0  }
   0x2   :  { %s1216_s22 = smov 0  }
   0x3 LB: > { %s24_s23 = sadd.s32 1, %s1171_s21  ;;  %p43_p1 = scmp.ne.s32.totalorder %s1163_s19, %s1159_s18  ;;  %s1175_s22 = sphi %s1216_s22, %s15_s22   ;;  %s1171_s21 = sphi %s1214_s21, %s1493_s21   ;;  %s1167_s20 = sphi %s1212_s20, %s1492_s20   ;;  %s1163_s19 = sphi %s1210_s19, %s1491_s19   ;;  %s1159_s18 = sphi %s1208_s18, %s1490_s18  }
   0x4   : > { %p25_p0 = scmp.ge.s32.totalorder %s24_s23, 4  ;;  %p44_p2 = scmp.eq.s32.totalorder %s1175_s22, 0 }
   0x5   : > { %s36_s25 = sadd.s32 1, %s1163_s19  ;;  %p939_p5 = scmp.ge.s32.totalorder %s1175_s22, 4 }
   0x6   : > { %s1495_s23 = smov (%p25_p0, %s24_s23), 0  ;;  %p45_p3 = por %p44_p2, %p43_p1 }
   0x7   : > { %s32_s24 = ssub.s32 %s1171_s21, %s1495_s23  ;;  %193 = sbr.rel (%p939_p5) target bundleno = 26 (0x1a), region = 28 }
   0x8   : > { %p34_p4 = scmp.eq.s32.totalorder %s32_s24, 0 }
   0xa   : > { %s1243_s26 = scalar_select %p34_p4, %s1163_s19, %s36_s25  }
   0xe   : > { %196 = sbr.rel (!%p45_p3) target bundleno = 26 (0x1a), region = 32  ;;  %s198_s27 = sand.u32 (%p45_p3), 1, %s1163_s19  }
   0xf   : > { %s954_s28 = sshll.u32 (%p45_p3), %s1171_s21, 5  ;;  %s940_s29 = sshll.u32 (%p45_p3), %s198_s27, 7 }
  0x10   : > { %s1251_s7 = scalar_lea.vmem (%p45_p3), %s1484_s0, %s954_s28  ;;  %s200_s8 = scalar_lea.vmem (%p45_p3), [#allocation3], %s940_s29 }
  0x11   : > { %v219_v0 = vld [vmem:[%s1251_s7] sm:$0xff] (%p45_p3)  ;;  %v221_v1 = vld [vmem:[%s1251_s7 + $0x8] sm:$0xff] (%p45_p3)  ;;  %v223_v2 = vld [vmem:[%s1251_s7 + $0x10] sm:$0xff] (%p45_p3) }
  0x12   : > { %220 = vst [vmem:[%s200_s8] sm:$0xff] (%p45_p3), %v219_v0  ;;  %222 = vst [vmem:[%s200_s8 + $0x8] sm:$0xff] (%p45_p3), %v221_v1  ;;  %v225_v3 = vld [vmem:[%s1251_s7 + $0x18] sm:$0xff] (%p45_p3)  ;;  %v227_v4 = vld [vmem:[%s1251_s7 + $0x80] sm:$0xff] (%p45_p3) }
  0x13   : > { %224 = vst [vmem:[%s200_s8 + $0x10] sm:$0xff] (%p45_p3), %v223_v2  ;;  %v229_v5 = vld [vmem:[%s1251_s7 + $0x88] sm:$0xff] (%p45_p3)  ;;  %226 = vst [vmem:[%s200_s8 + $0x18] sm:$0xff] (%p45_p3), %v225_v3  ;;  %v231_v6 = vld [vmem:[%s1251_s7 + $0x90] sm:$0xff] (%p45_p3) }
  0x14   : > { %228 = vst [vmem:[%s200_s8 + $0x20] sm:$0xff] (%p45_p3), %v227_v4  ;;  %230 = vst [vmem:[%s200_s8 + $0x28] sm:$0xff] (%p45_p3), %v229_v5  ;;  %v233_v7 = vld [vmem:[%s1251_s7 + $0x98] sm:$0xff] (%p45_p3)  ;;  %v235_v8 = vld [vmem:[%s1251_s7 + $0x100] sm:$0xff] (%p45_p3) }
  0x15   : > { %232 = vst [vmem:[%s200_s8 + $0x30] sm:$0xff] %v231_v6  ;;  %234 = vst [vmem:[%s200_s8 + $0x38] sm:$0xff] %v233_v7  ;;  %v237_v9 = vld [vmem:[%s1251_s7 + $0x108] sm:$0xff]  ;;  %v239_v10 = vld [vmem:[%s1251_s7 + $0x110] sm:$0xff] }
  0x16   : > { %236 = vst [vmem:[%s200_s8 + $0x40] sm:$0xff] %v235_v8  ;;  %v241_v11 = vld [vmem:[%s1251_s7 + $0x118] sm:$0xff]  ;;  %238 = vst [vmem:[%s200_s8 + $0x48] sm:$0xff] %v237_v9  ;;  %v243_v12 = vld [vmem:[%s1251_s7 + $0x180] sm:$0xff] }
  0x17   : > { %240 = vst [vmem:[%s200_s8 + $0x50] sm:$0xff] %v239_v10  ;;  %242 = vst [vmem:[%s200_s8 + $0x58] sm:$0xff] %v241_v11  ;;  %v245_v13 = vld [vmem:[%s1251_s7 + $0x188] sm:$0xff]  ;;  %v247_v14 = vld [vmem:[%s1251_s7 + $0x190] sm:$0xff] }
  0x18   : > { %244 = vst [vmem:[%s200_s8 + $0x60] sm:$0xff] %v243_v12  ;;  %246 = vst [vmem:[%s200_s8 + $0x68] sm:$0xff] %v245_v13  ;;  %v249_v15 = vld [vmem:[%s1251_s7 + $0x198] sm:$0xff] }
  0x19   : > { %248 = vst [vmem:[%s200_s8 + $0x70] sm:$0xff] %v247_v14  ;;  %250 = vst [vmem:[%s200_s8 + $0x78] sm:$0xff] %v249_v15 }
  0x1a PF: > { %p943_p6 = scmp.ge.s32.totalorder %s1175_s22, 1  ;;  %p265_p7 = scmp.lt.s32.totalorder %s1175_s22, 5 }
  0x1c   : > { %p266_p8 = pnand %p943_p6, %p265_p7 }
  0x1d   : > { %s272_s9 = sand.u32 (!%p266_p8), 1, %s1159_s18   ;;  %s945_s10 = sshll.u32 (!%p266_p8), %s1167_s20, 6 }
  0x1e   : > { %269 = sbr.rel (%p266_p8) target bundleno = 418 (0x1a2), region = 59  ;;  %s944_s11 = sshll.u32 (!%p266_p8), %s272_s9, 7 }
  0x1f   : > { %p309_p9 = scmp.lt.s32.totalorder (!%p266_p8), %s945_s10, 255  ;;  %s1278_s16 = scalar_lea.vmem (!%p266_p8), [#allocation3], %s944_s11 }
  0x20   : > { %p948_p10 = scmp.ne.s32.totalorder (!%p266_p8), %s1167_s20, 0 }
  0x25   : > { %s1497_s10 = smov (!%p309_p9, %s945_s10), 255  ;;  %325 = sbr.rel (%p948_p10) target bundleno = 44 (0x2c), region = 67 }
  0x26   : > { %s955_s12 = sshll.u32 %s1497_s10, 4  ;;  %v1177_v16 = vmov (!%p948_p10), 0.0  }
  0x27   : > { %s1276_s15 = scalar_lea.vmem %s1485_s1, %s955_s12  ;;  %326 = vst [vmem:[#allocation2] sm:$0xff] (!%p948_p10), %v1177_v16  ;;  %327 = vst [vmem:[#allocation2 + $0x8] sm:$0xff] (!%p948_p10), %v1177_v16 }
  0x28   : > { %328 = vst [vmem:[#allocation2 + $0x10] sm:$0xff] (!%p948_p10), %v1177_v16  ;;  %329 = vst [vmem:[#allocation2 + $0x18] sm:$0xff] (!%p948_p10), %v1177_v16 }
  0x29   : > { %330 = vst [vmem:[#allocation2 + $0x20] sm:$0xff] (!%p948_p10), %v1177_v16  ;;  %331 = vst [vmem:[#allocation2 + $0x28] sm:$0xff] (!%p948_p10), %v1177_v16 }
  0x2a   : > { %332 = vst [vmem:[#allocation2 + $0x30] sm:$0xff] (!%p948_p10), %v1177_v16  ;;  %333 = vst [vmem:[#allocation2 + $0x38] sm:$0xff] (!%p948_p10), %v1177_v16 }
  0x2c PF: > { %v359_v17 = vld [vmem:[%s1276_s15 + $0x8] sm:$0xff]  ;;  %v361_v18 = vld [vmem:[%s1276_s15 + $0x18] sm:$0xff]  ;;  %v358_v22 = vld [vmem:[%s1276_s15] sm:$0xff]  ;;  %p949_p11 = scmp.ne.s32.totalorder %s1167_s20, 3 }
  0x2d   : > { %v423_v19 = vld [vmem:[%s1276_s15 + $0x208] sm:$0xff]  ;;  %v956_v20 = vpack.c.bf16 %v361_v18, %v359_v17  ;;  %v425_v21 = vld [vmem:[%s1276_s15 + $0x218] sm:$0xff]  ;;  %v360_v23 = vld [vmem:[%s1276_s15 + $0x10] sm:$0xff] }
  0x2e   : > { %v1020_v24 = vpack.c.bf16 %v425_v21, %v423_v19  ;;  %v958_v25 = vpack.c.bf16 %v360_v23, %v358_v22  ;;  %v422_v26 = vld [vmem:[%s1276_s15 + $0x200] sm:$0xff]  ;;  %v424_v27 = vld [vmem:[%s1276_s15 + $0x210] sm:$0xff]  ;;  %v363_v28 = vld [vmem:[%s1276_s15 + $0x28] sm:$0xff] }
  0x2f   : > { %957 = vmatprep.subr.bf16.mxu1 %v956_v20  ;;  %v1022_v29 = vpack.c.bf16 %v424_v27, %v422_v26  ;;  %v365_v30 = vld [vmem:[%s1276_s15 + $0x38] sm:$0xff]  ;;  %v427_v31 = vld [vmem:[%s1276_s15 + $0x228] sm:$0xff]  ;;  %v362_v35 = vld [vmem:[%s1276_s15 + $0x20] sm:$0xff] }
  0x30   : > { %v429_v32 = vld [vmem:[%s1276_s15 + $0x238] sm:$0xff]  ;;  %1021 = vmatprep.subr.bf16.mxu0 %v1020_v24  ;;  %959 = vmatpush1.bf16.msra.mxu1 %v958_v25  ;;  %v960_v33 = vpack.c.bf16 %v365_v30, %v363_v28  ;;  %v364_v36 = vld [vmem:[%s1276_s15 + $0x30] sm:$0xff]  ;;  %v426_v37 = vld [vmem:[%s1276_s15 + $0x220] sm:$0xff] }
  0x31   : > { %v1024_v34 = vpack.c.bf16 %v429_v32, %v427_v31  ;;  %1023 = vmatpush1.bf16.msra.mxu0 %v1022_v29  ;;  %v962_v38 = vpack.c.bf16 %v364_v36, %v362_v35  ;;  %v428_v39 = vld [vmem:[%s1276_s15 + $0x230] sm:$0xff]  ;;  %v367_v40 = vld [vmem:[%s1276_s15 + $0x48] sm:$0xff]  ;;  %v369_v41 = vld [vmem:[%s1276_s15 + $0x58] sm:$0xff] }
  0x32   : > { %961 = vmatprep.subr.bf16.mxu1 %v960_v33  ;;  %v1026_v42 = vpack.c.bf16 %v428_v39, %v426_v37  ;;  %v964_v43 = vpack.c.bf16 %v369_v41, %v367_v40  ;;  %v431_v44 = vld [vmem:[%s1276_s15 + $0x248] sm:$0xff]  ;;  %v433_v45 = vld [vmem:[%s1276_s15 + $0x258] sm:$0xff]  ;;  %v366_v46 = vld [vmem:[%s1276_s15 + $0x40] sm:$0xff] }
  0x33   : > { %1025 = vmatprep.subr.bf16.mxu0 %v1024_v34  ;;  %v1028_v47 = vpack.c.bf16 %v433_v45, %v431_v44  ;;  %v368_v48 = vld [vmem:[%s1276_s15 + $0x50] sm:$0xff]  ;;  %v430_v49 = vld [vmem:[%s1276_s15 + $0x240] sm:$0xff]  ;;  %v371_v52 = vld [vmem:[%s1276_s15 + $0x68] sm:$0xff] }
  0x34   : > { %v432_v50 = vld [vmem:[%s1276_s15 + $0x250] sm:$0xff]  ;;  %963 = vmatpush1.bf16.msra.mxu1 %v962_v38  ;;  %v966_v51 = vpack.c.bf16 %v368_v48, %v366_v46  ;;  %v373_v53 = vld [vmem:[%s1276_s15 + $0x78] sm:$0xff]  ;;  %v435_v54 = vld [vmem:[%s1276_s15 + $0x268] sm:$0xff] }
  0x35   : > { %1027 = vmatpush1.bf16.msra.mxu0 %v1026_v42  ;;  %965 = vmatprep.subr.bf16.mxu1 %v964_v43  ;;  %v1030_v55 = vpack.c.bf16 %v432_v50, %v430_v49  ;;  %v968_v56 = vpack.c.bf16 %v373_v53, %v371_v52  ;;  %v437_v57 = vld [vmem:[%s1276_s15 + $0x278] sm:$0xff]  ;;  %v370_v58 = vld [vmem:[%s1276_s15 + $0x60] sm:$0xff]  ;;  %v372_v59 = vld [vmem:[%s1276_s15 + $0x70] sm:$0xff] }
  0x36   : > { %1029 = vmatprep.subr.bf16.mxu0 %v1028_v47  ;;  %v1032_v60 = vpack.c.bf16 %v437_v57, %v435_v54  ;;  %v434_v61 = vld [vmem:[%s1276_s15 + $0x260] sm:$0xff]  ;;  %v436_v62 = vld [vmem:[%s1276_s15 + $0x270] sm:$0xff]  ;;  %v375_v63 = vld [vmem:[%s1276_s15 + $0x88] sm:$0xff]  ;;  %v970_v3 = vpack.c.bf16 %v372_v59, %v370_v58 }
  0x37   : > { %v377_v0 = vld [vmem:[%s1276_s15 + $0x98] sm:$0xff]  ;;  %v439_v1 = vld [vmem:[%s1276_s15 + $0x288] sm:$0xff]  ;;  %v1034_v4 = vpack.c.bf16 %v436_v62, %v434_v61  ;;  %v374_v6 = vld [vmem:[%s1276_s15 + $0x80] sm:$0xff] }
  0x38   : > { %v441_v2 = vld [vmem:[%s1276_s15 + $0x298] sm:$0xff]  ;;  %967 = vmatpush1.bf16.msra.mxu1 %v966_v51  ;;  %v972_v5 = vpack.c.bf16 %v377_v0, %v375_v63  ;;  %v376_v7 = vld [vmem:[%s1276_s15 + $0x90] sm:$0xff]  ;;  %v438_v8 = vld [vmem:[%s1276_s15 + $0x280] sm:$0xff] }
  0x39   : > { %1031 = vmatpush1.bf16.msra.mxu0 %v1030_v55  ;;  %969 = vmatprep.subr.bf16.mxu1 %v968_v56  ;;  %v1036_v9 = vpack.c.bf16 %v441_v2, %v439_v1  ;;  %v440_v10 = vld [vmem:[%s1276_s15 + $0x290] sm:$0xff]  ;;  %v379_v11 = vld [vmem:[%s1276_s15 + $0xa8] sm:$0xff]  ;;  %v381_v12 = vld [vmem:[%s1276_s15 + $0xb8] sm:$0xff]  ;;  %v974_v15 = vpack.c.bf16 %v376_v7, %v374_v6 }
  0x3a   : > { %1033 = vmatprep.subr.bf16.mxu0 %v1032_v60  ;;  %v443_v13 = vld [vmem:[%s1276_s15 + $0x2a8] sm:$0xff]  ;;  %v445_v14 = vld [vmem:[%s1276_s15 + $0x2b8] sm:$0xff]  ;;  %v1038_v16 = vpack.c.bf16 %v440_v10, %v438_v8  ;;  %v976_v17 = vpack.c.bf16 %v381_v12, %v379_v11  ;;  %v378_v18 = vld [vmem:[%s1276_s15 + $0xa0] sm:$0xff] }
  0x3b   : > { %v380_v19 = vld [vmem:[%s1276_s15 + $0xb0] sm:$0xff]  ;;  %v442_v20 = vld [vmem:[%s1276_s15 + $0x2a0] sm:$0xff]  ;;  %v1040_v21 = vpack.c.bf16 %v445_v14, %v443_v13  ;;  %v383_v23 = vld [vmem:[%s1276_s15 + $0xc8] sm:$0xff] }
  0x3c   : > { %971 = vmatpush1.bf16.msra.mxu1 %v970_v3  ;;  %v444_v22 = vld [vmem:[%s1276_s15 + $0x2b0] sm:$0xff]  ;;  %v385_v24 = vld [vmem:[%s1276_s15 + $0xd8] sm:$0xff]  ;;  %v447_v25 = vld [vmem:[%s1276_s15 + $0x2c8] sm:$0xff]  ;;  %v978_v27 = vpack.c.bf16 %v380_v19, %v378_v18 }
  0x3d   : > { %1035 = vmatpush1.bf16.msra.mxu0 %v1034_v4  ;;  %973 = vmatprep.subr.bf16.mxu1 %v972_v5  ;;  %v449_v26 = vld [vmem:[%s1276_s15 + $0x2d8] sm:$0xff]  ;;  %v1042_v28 = vpack.c.bf16 %v444_v22, %v442_v20  ;;  %v980_v29 = vpack.c.bf16 %v385_v24, %v383_v23  ;;  %v382_v30 = vld [vmem:[%s1276_s15 + $0xc0] sm:$0xff]  ;;  %v384_v31 = vld [vmem:[%s1276_s15 + $0xd0] sm:$0xff] }
  0x3e   : > { %1037 = vmatprep.subr.bf16.mxu0 %v1036_v9  ;;  %v446_v32 = vld [vmem:[%s1276_s15 + $0x2c0] sm:$0xff]  ;;  %v1044_v33 = vpack.c.bf16 %v449_v26, %v447_v25  ;;  %v448_v34 = vld [vmem:[%s1276_s15 + $0x2d0] sm:$0xff]  ;;  %v387_v35 = vld [vmem:[%s1276_s15 + $0xe8] sm:$0xff]  ;;  %v982_v39 = vpack.c.bf16 %v384_v31, %v382_v30 }
  0x3f   : > { %v389_v36 = vld [vmem:[%s1276_s15 + $0xf8] sm:$0xff]  ;;  %v451_v37 = vld [vmem:[%s1276_s15 + $0x2e8] sm:$0xff]  ;;  %v1046_v40 = vpack.c.bf16 %v448_v34, %v446_v32  ;;  %v386_v42 = vld [vmem:[%s1276_s15 + $0xe0] sm:$0xff] }
  0x40   : > { %975 = vmatpush1.bf16.msra.mxu1 %v974_v15  ;;  %v453_v38 = vld [vmem:[%s1276_s15 + $0x2f8] sm:$0xff]  ;;  %v984_v41 = vpack.c.bf16 %v389_v36, %v387_v35  ;;  %v388_v43 = vld [vmem:[%s1276_s15 + $0xf0] sm:$0xff]  ;;  %v450_v44 = vld [vmem:[%s1276_s15 + $0x2e0] sm:$0xff] }
  0x41   : > { %1039 = vmatpush1.bf16.msra.mxu0 %v1038_v16  ;;  %977 = vmatprep.subr.bf16.mxu1 %v976_v17  ;;  %v1048_v45 = vpack.c.bf16 %v453_v38, %v451_v37  ;;  %v452_v46 = vld [vmem:[%s1276_s15 + $0x2f0] sm:$0xff]  ;;  %v391_v47 = vld [vmem:[%s1276_s15 + $0x108] sm:$0xff]  ;;  %v393_v48 = vld [vmem:[%s1276_s15 + $0x118] sm:$0xff]  ;;  %v986_v51 = vpack.c.bf16 %v388_v43, %v386_v42 }
  0x42   : > { %1041 = vmatprep.subr.bf16.mxu0 %v1040_v21  ;;  %v455_v49 = vld [vmem:[%s1276_s15 + $0x308] sm:$0xff]  ;;  %v457_v50 = vld [vmem:[%s1276_s15 + $0x318] sm:$0xff]  ;;  %v1050_v52 = vpack.c.bf16 %v452_v46, %v450_v44  ;;  %v988_v53 = vpack.c.bf16 %v393_v48, %v391_v47  ;;  %v390_v54 = vld [vmem:[%s1276_s15 + $0x100] sm:$0xff] }
  0x43   : > { %v392_v55 = vld [vmem:[%s1276_s15 + $0x110] sm:$0xff]  ;;  %v454_v56 = vld [vmem:[%s1276_s15 + $0x300] sm:$0xff]  ;;  %v1052_v57 = vpack.c.bf16 %v457_v50, %v455_v49  ;;  %v395_v59 = vld [vmem:[%s1276_s15 + $0x128] sm:$0xff] }
  0x44   : > { %979 = vmatpush1.bf16.msra.mxu1 %v978_v27  ;;  %v456_v58 = vld [vmem:[%s1276_s15 + $0x310] sm:$0xff]  ;;  %v397_v60 = vld [vmem:[%s1276_s15 + $0x138] sm:$0xff]  ;;  %v459_v61 = vld [vmem:[%s1276_s15 + $0x328] sm:$0xff]  ;;  %v990_v63 = vpack.c.bf16 %v392_v55, %v390_v54 }
  0x45   : > { %1043 = vmatpush1.bf16.msra.mxu0 %v1042_v28  ;;  %981 = vmatprep.subr.bf16.mxu1 %v980_v29  ;;  %v461_v62 = vld [vmem:[%s1276_s15 + $0x338] sm:$0xff]  ;;  %v1054_v0 = vpack.c.bf16 %v456_v58, %v454_v56  ;;  %v992_v1 = vpack.c.bf16 %v397_v60, %v395_v59  ;;  %v394_v2 = vld [vmem:[%s1276_s15 + $0x120] sm:$0xff]  ;;  %v396_v3 = vld [vmem:[%s1276_s15 + $0x130] sm:$0xff] }
  0x46   : > { %1045 = vmatprep.subr.bf16.mxu0 %v1044_v33  ;;  %v458_v4 = vld [vmem:[%s1276_s15 + $0x320] sm:$0xff]  ;;  %v1056_v5 = vpack.c.bf16 %v461_v62, %v459_v61  ;;  %v460_v6 = vld [vmem:[%s1276_s15 + $0x330] sm:$0xff]  ;;  %v399_v7 = vld [vmem:[%s1276_s15 + $0x148] sm:$0xff]  ;;  %v994_v11 = vpack.c.bf16 %v396_v3, %v394_v2 }
  0x47   : > { %v401_v8 = vld [vmem:[%s1276_s15 + $0x158] sm:$0xff]  ;;  %v463_v9 = vld [vmem:[%s1276_s15 + $0x348] sm:$0xff]  ;;  %v1058_v12 = vpack.c.bf16 %v460_v6, %v458_v4  ;;  %v398_v14 = vld [vmem:[%s1276_s15 + $0x140] sm:$0xff] }
  0x48   : > { %983 = vmatpush1.bf16.msra.mxu1 %v982_v39  ;;  %v465_v10 = vld [vmem:[%s1276_s15 + $0x358] sm:$0xff]  ;;  %v996_v13 = vpack.c.bf16 %v401_v8, %v399_v7  ;;  %v400_v15 = vld [vmem:[%s1276_s15 + $0x150] sm:$0xff]  ;;  %v462_v16 = vld [vmem:[%s1276_s15 + $0x340] sm:$0xff] }
  0x49   : > { %1047 = vmatpush1.bf16.msra.mxu0 %v1046_v40  ;;  %985 = vmatprep.subr.bf16.mxu1 %v984_v41  ;;  %v1060_v17 = vpack.c.bf16 %v465_v10, %v463_v9  ;;  %v464_v18 = vld [vmem:[%s1276_s15 + $0x350] sm:$0xff]  ;;  %v403_v19 = vld [vmem:[%s1276_s15 + $0x168] sm:$0xff]  ;;  %v405_v20 = vld [vmem:[%s1276_s15 + $0x178] sm:$0xff]  ;;  %v998_v23 = vpack.c.bf16 %v400_v15, %v398_v14 }
  0x4a   : > { %1049 = vmatprep.subr.bf16.mxu0 %v1048_v45  ;;  %v467_v21 = vld [vmem:[%s1276_s15 + $0x368] sm:$0xff]  ;;  %v469_v22 = vld [vmem:[%s1276_s15 + $0x378] sm:$0xff]  ;;  %v402_v24 = vld [vmem:[%s1276_s15 + $0x160] sm:$0xff]  ;;  %v1062_v25 = vpack.c.bf16 %v464_v18, %v462_v16  ;;  %v1000_v26 = vpack.c.bf16 %v405_v20, %v403_v19 }
  0x4b   : > { %v404_v27 = vld [vmem:[%s1276_s15 + $0x170] sm:$0xff]  ;;  %v466_v28 = vld [vmem:[%s1276_s15 + $0x360] sm:$0xff]  ;;  %v1064_v30 = vpack.c.bf16 %v469_v22, %v467_v21  ;;  %v407_v31 = vld [vmem:[%s1276_s15 + $0x188] sm:$0xff] }
  0x4c   : > { %987 = vmatpush1.bf16.msra.mxu1 %v986_v51  ;;  %v468_v29 = vld [vmem:[%s1276_s15 + $0x370] sm:$0xff]  ;;  %v409_v32 = vld [vmem:[%s1276_s15 + $0x198] sm:$0xff]  ;;  %v343_v33 = vld [vmem:[%s1278_s16 + $0x8] sm:$0xff]  ;;  %v1002_v37 = vpack.c.bf16 %v404_v27, %v402_v24 }
  0x4d   : > { %1051 = vmatpush1.bf16.msra.mxu0 %v1050_v52  ;;  %989 = vmatprep.subr.bf16.mxu1 %v988_v53  ;;  %v471_v34 = vld [vmem:[%s1276_s15 + $0x388] sm:$0xff]  ;;  %v473_v35 = vld [vmem:[%s1276_s15 + $0x398] sm:$0xff]  ;;  %v1066_v38 = vpack.c.bf16 %v468_v29, %v466_v28  ;;  %v1004_v39 = vpack.c.bf16 %v409_v32, %v407_v31  ;;  %v406_v40 = vld [vmem:[%s1276_s15 + $0x180] sm:$0xff] }
  0x4e   : > { %1053 = vmatprep.subr.bf16.mxu0 %v1052_v57  ;;  %550 = vmatprep.mubr.f32.mxu1 %v343_v33  ;;  %v345_v36 = vld [vmem:[%s1278_s16 + $0x18] sm:$0xff]  ;;  %v408_v41 = vld [vmem:[%s1276_s15 + $0x190] sm:$0xff]  ;;  %v470_v42 = vld [vmem:[%s1276_s15 + $0x380] sm:$0xff]  ;;  %v1068_v43 = vpack.c.bf16 %v473_v35, %v471_v34 }
  0x4f   : > { %639 = vmatprep.mubr.f32.mxu0 %v345_v36  ;;  %v472_v44 = vld [vmem:[%s1276_s15 + $0x390] sm:$0xff]  ;;  %v411_v45 = vld [vmem:[%s1276_s15 + $0x1a8] sm:$0xff]  ;;  %v413_v46 = vld [vmem:[%s1276_s15 + $0x1b8] sm:$0xff]  ;;  %v1006_v49 = vpack.c.bf16 %v408_v41, %v406_v40 }
  0x50   : > { %991 = vmatpush1.bf16.msra.mxu1 %v990_v63  ;;  %v475_v47 = vld [vmem:[%s1276_s15 + $0x3a8] sm:$0xff]  ;;  %v477_v48 = vld [vmem:[%s1276_s15 + $0x3b8] sm:$0xff]  ;;  %v1070_v50 = vpack.c.bf16 %v472_v44, %v470_v42  ;;  %v1008_v51 = vpack.c.bf16 %v413_v46, %v411_v45  ;;  %v410_v52 = vld [vmem:[%s1276_s15 + $0x1a0] sm:$0xff] }
  0x51   : > { %1055 = vmatpush1.bf16.msra.mxu0 %v1054_v0  ;;  %993 = vmatprep.subr.bf16.mxu1 %v992_v1  ;;  %v412_v53 = vld [vmem:[%s1276_s15 + $0x1b0] sm:$0xff]  ;;  %v474_v54 = vld [vmem:[%s1276_s15 + $0x3a0] sm:$0xff]  ;;  %v1072_v55 = vpack.c.bf16 %v477_v48, %v475_v47  ;;  %v415_v57 = vld [vmem:[%s1276_s15 + $0x1c8] sm:$0xff] }
  0x52   : > { %1057 = vmatprep.subr.bf16.mxu0 %v1056_v5  ;;  %v476_v56 = vld [vmem:[%s1276_s15 + $0x3b0] sm:$0xff]  ;;  %v417_v58 = vld [vmem:[%s1276_s15 + $0x1d8] sm:$0xff]  ;;  %v479_v59 = vld [vmem:[%s1276_s15 + $0x3c8] sm:$0xff]  ;;  %v1010_v61 = vpack.c.bf16 %v412_v53, %v410_v52 }
  0x53   : > { %v481_v60 = vld [vmem:[%s1276_s15 + $0x3d8] sm:$0xff]  ;;  %v1074_v62 = vpack.c.bf16 %v476_v56, %v474_v54  ;;  %v1012_v63 = vpack.c.bf16 %v417_v58, %v415_v57  ;;  %v414_v0 = vld [vmem:[%s1276_s15 + $0x1c0] sm:$0xff]  ;;  %v416_v1 = vld [vmem:[%s1276_s15 + $0x1d0] sm:$0xff] }
  0x54   : > { %995 = vmatpush1.bf16.msra.mxu1 %v994_v11  ;;  %v478_v2 = vld [vmem:[%s1276_s15 + $0x3c0] sm:$0xff]  ;;  %v1076_v3 = vpack.c.bf16 %v481_v60, %v479_v59  ;;  %v480_v4 = vld [vmem:[%s1276_s15 + $0x3d0] sm:$0xff]  ;;  %v419_v5 = vld [vmem:[%s1276_s15 + $0x1e8] sm:$0xff]  ;;  %v1014_v9 = vpack.c.bf16 %v416_v1, %v414_v0 }
  0x55   : > { %1059 = vmatpush1.bf16.msra.mxu0 %v1058_v12  ;;  %997 = vmatprep.subr.bf16.mxu1 %v996_v13  ;;  %v421_v6 = vld [vmem:[%s1276_s15 + $0x1f8] sm:$0xff]  ;;  %v483_v7 = vld [vmem:[%s1276_s15 + $0x3e8] sm:$0xff]  ;;  %v1078_v10 = vpack.c.bf16 %v480_v4, %v478_v2  ;;  %v418_v12 = vld [vmem:[%s1276_s15 + $0x1e0] sm:$0xff] }
  0x56   : > { %1061 = vmatprep.subr.bf16.mxu0 %v1060_v17  ;;  %v485_v8 = vld [vmem:[%s1276_s15 + $0x3f8] sm:$0xff]  ;;  %v1016_v11 = vpack.c.bf16 %v421_v6, %v419_v5  ;;  %v420_v13 = vld [vmem:[%s1276_s15 + $0x1f0] sm:$0xff]  ;;  %v482_v15 = vld [vmem:[%s1276_s15 + $0x3e0] sm:$0xff] }
  0x57   : > { %v1080_v14 = vpack.c.bf16 %v485_v8, %v483_v7  ;;  %v484_v16 = vld [vmem:[%s1276_s15 + $0x3f0] sm:$0xff]  ;;  %v1018_v17 = vpack.c.bf16 %v420_v13, %v418_v12  ;;  %v342_v19 = vld [vmem:[%s1278_s16] sm:$0xff]  ;;  %v347_v21 = vld [vmem:[%s1278_s16 + $0x28] sm:$0xff] }
  0x58   : > { %999 = vmatpush1.bf16.msra.mxu1 %v998_v23  ;;  %v1082_v18 = vpack.c.bf16 %v484_v16, %v482_v15  ;;  %v344_v20 = vld [vmem:[%s1278_s16 + $0x10] sm:$0xff]  ;;  %v349_v22 = vld [vmem:[%s1278_s16 + $0x38] sm:$0xff]  ;;  %v346_v23 = vld [vmem:[%s1278_s16 + $0x20] sm:$0xff] }
  0x59   : > { %1063 = vmatpush1.bf16.msra.mxu0 %v1062_v25  ;;  %1001 = vmatprep.subr.bf16.mxu1 %v1000_v26  ;;  %v348_v24 = vld [vmem:[%s1278_s16 + $0x30] sm:$0xff]  ;;  %v351_v25 = vld [vmem:[%s1278_s16 + $0x48] sm:$0xff]  ;;  %v353_v26 = vld [vmem:[%s1278_s16 + $0x58] sm:$0xff] }
  0x5a   : > { %1065 = vmatprep.subr.bf16.mxu0 %v1064_v30  ;;  %v350_v27 = vld [vmem:[%s1278_s16 + $0x40] sm:$0xff]  ;;  %v352_v28 = vld [vmem:[%s1278_s16 + $0x50] sm:$0xff]  ;;  %v355_v29 = vld [vmem:[%s1278_s16 + $0x68] sm:$0xff] }
  0x5b   : > { %v357_v30 = vld [vmem:[%s1278_s16 + $0x78] sm:$0xff]  ;;  %v354_v31 = vld [vmem:[%s1278_s16 + $0x60] sm:$0xff]  ;;  %v356_v32 = vld [vmem:[%s1278_s16 + $0x70] sm:$0xff] }
  0x5c   : > { %1003 = vmatpush1.bf16.msra.mxu1 %v1002_v37  ;;  %v334_v34 = vld [vmem:[#allocation2] sm:$0xff]  ;;  %v336_v44 = vld [vmem:[#allocation2 + $0x10] sm:$0xff]  ;;  %v337_v48 = vld [vmem:[#allocation2 + $0x18] sm:$0xff] }
  0x5d   : > { %1067 = vmatpush1.bf16.msra.mxu0 %v1066_v38  ;;  %1005 = vmatprep.subr.bf16.mxu1 %v1004_v39  ;;  %v335_v38 = vld [vmem:[#allocation2 + $0x8] sm:$0xff]  ;;  %v338_v54 = vld [vmem:[#allocation2 + $0x20] sm:$0xff]  ;;  %v340_v0 = vld [vmem:[#allocation2 + $0x30] sm:$0xff] }
  0x5e   : > { %1069 = vmatprep.subr.bf16.mxu0 %v1068_v43  ;;  %v339_v58 = vld [vmem:[#allocation2 + $0x28] sm:$0xff]  ;;  %v341_v4 = vld [vmem:[#allocation2 + $0x38] sm:$0xff] }
  0x60   : > { %1007 = vmatpush1.bf16.msra.mxu1 %v1006_v49 }
  0x61   : > { %1071 = vmatpush1.bf16.msra.mxu0 %v1070_v50  ;;  %1009 = vmatprep.subr.bf16.mxu1 %v1008_v51 }
  0x62   : > { %1073 = vmatprep.subr.bf16.mxu0 %v1072_v55 }
  0x64   : > { %1011 = vmatpush1.bf16.msra.mxu1 %v1010_v61 }
  0x65   : > { %1075 = vmatpush1.bf16.msra.mxu0 %v1074_v62  ;;  %1013 = vmatprep.subr.bf16.mxu1 %v1012_v63 }
  0x66   : > { %1077 = vmatprep.subr.bf16.mxu0 %v1076_v3 }
  0x68   : > { %1015 = vmatpush1.bf16.msra.mxu1 %v1014_v9  ;;  %v694_v9 = vlaneseq (!%p949_p11) }
  0x69   : > { %1079 = vmatpush1.bf16.msra.mxu0 %v1078_v10  ;;  %1017 = vmatprep.subr.bf16.mxu1 %v1016_v11  ;;  %v692_v11 = vld [vmem:[%s1486_s2] sm:$0x3] (!%p949_p11) }
  0x6a   : > { %1081 = vmatprep.subr.bf16.mxu0 %v1080_v14  ;;  %v695_v10 = vshrl.u32 (!%p949_p11), %v694_v9, 7 }
  0x6c   : > { %1019 = vmatpush1.bf16.msra.mxu1 %v1018_v17  ;;  %v1429_v12 = vsub.s32 (!%p949_p11), 0, %v695_v10  ;;  %v1431_v13 = vsub.s32 (!%p949_p11), 1, %v695_v10 }
  0x6d   : > { %1083 = vmatpush1.bf16.msra.mxu0 %v1082_v18 }
  0x6e   : > { %v697_v17 = vrot.slane (!%p949_p11), %v692_v11, %v1429_v12 }
  0x6f   : > { %551 = vmatmul.mubr.f32.vlgmr.msra.gmra.mrb[0].mxu1 %v342_v19 }
  0x70   : > { %640 = vmatmul.mubr.f32.vlgmr.msra.gmra.mrb[0].mxu0 %v344_v20  ;;  %556 = vmatprep.mubr.f32.mxu1 %v347_v21  ;;  %v701_v21 = vrot.slane (!%p949_p11), %v692_v11, %v1431_v13 }
  0x71   : > { %645 = vmatprep.mubr.f32.mxu0 %v349_v22 }
  0x73   : > { %557 = vmatmul.mubr.f32.gmra.mrb[2].mxu1 %v346_v23 }
  0x74   : > { %646 = vmatmul.mubr.f32.gmra.mrb[2].mxu0 %v348_v24  ;;  %562 = vmatprep.mubr.f32.mxu1 %v351_v25 }
  0x75   : > { %651 = vmatprep.mubr.f32.mxu0 %v353_v26 }
  0x77   : > { %563 = vmatmul.mubr.f32.gmra.mrb[4].mxu1 %v350_v27 }
  0x78   : > { %652 = vmatmul.mubr.f32.gmra.mrb[4].mxu0 %v352_v28  ;;  %568 = vmatprep.mubr.f32.mxu1 %v355_v29 }
  0x79   : > { %657 = vmatprep.mubr.f32.mxu0 %v357_v30 }
  0x7b   : > { %569 = vmatmul.mubr.f32.gmra.mrb[6].mxu1 %v354_v31 }
  0x7c   : > { %658 = vmatmul.mubr.f32.gmra.mrb[6].mxu0 %v356_v32 }
 0x142   : > { %v552_v33 = vpop.f32.mrb[0].mxu1 }
 0x143   : > { %v641_v35 = vpop.f32.mrb[0].mxu0  ;;  %v554_v36 = vpop.f32.mrb[1].mxu1 }
 0x144   : > { %v642_v37 = vadd.f32 %v641_v35, %v552_v33  ;;  %v643_v39 = vpop.f32.mrb[1].mxu0 }
 0x145   : > { %v644_v40 = vadd.f32 %v643_v39, %v554_v36 }
 0x146   : > { %v664_v41 = vadd.f32 %v642_v37, %v334_v34  ;;  %v558_v42 = vpop.f32.mrb[2].mxu1 }
 0x147   : > { %v665_v43 = vadd.f32 %v644_v40, %v335_v38  ;;  %v647_v45 = vpop.f32.mrb[2].mxu0  ;;  %v560_v46 = vpop.f32.mrb[3].mxu1 }
 0x148   : > { %672 = vst [vmem:[#allocation2] sm:$0xff] %v664_v41  ;;  %v648_v47 = vadd.f32 %v647_v45, %v558_v42  ;;  %v649_v49 = vpop.f32.mrb[3].mxu0 }
 0x149   : > { %673 = vst [vmem:[#allocation2 + $0x8] sm:$0xff] %v665_v43  ;;  %v650_v50 = vadd.f32 %v649_v49, %v560_v46 }
 0x14a   : > { %v666_v51 = vadd.f32 %v648_v47, %v336_v44  ;;  %v564_v52 = vpop.f32.mrb[4].mxu1 }
 0x14b   : > { %v667_v53 = vadd.f32 %v650_v50, %v337_v48  ;;  %v653_v55 = vpop.f32.mrb[4].mxu0  ;;  %v566_v56 = vpop.f32.mrb[5].mxu1 }
 0x14c   : > { %674 = vst [vmem:[#allocation2 + $0x10] sm:$0xff] %v666_v51  ;;  %v654_v57 = vadd.f32 %v653_v55, %v564_v52  ;;  %v655_v59 = vpop.f32.mrb[5].mxu0 }
 0x14d   : > { %675 = vst [vmem:[#allocation2 + $0x18] sm:$0xff] %v667_v53  ;;  %v656_v60 = vadd.f32 %v655_v59, %v566_v56 }
 0x14e   : > { %v668_v61 = vadd.f32 %v654_v57, %v338_v54  ;;  %v570_v62 = vpop.f32.mrb[6].mxu1 }
 0x14f   : > { %v669_v63 = vadd.f32 %v656_v60, %v339_v58  ;;  %v659_v1 = vpop.f32.mrb[6].mxu0  ;;  %v572_v2 = vpop.f32.mrb[7].mxu1  ;;  %683 = sbr.rel (%p949_p11) target bundleno = 418 (0x1a2), region = 71  ;;  %v684_v14 = vld [vmem:[#allocation2] sm:$0xff] (!%p949_p11) }
 0x150   : > { %676 = vst [vmem:[#allocation2 + $0x20] sm:$0xff] %v668_v61  ;;  %v660_v3 = vadd.f32 %v659_v1, %v570_v62  ;;  %v661_v5 = vpop.f32.mrb[7].mxu0  ;;  %v685_v18 = vld [vmem:[#allocation2 + $0x8] sm:$0xff] (!%p949_p11)  ;;  %v704_v23 = vadd.f32 (!%p949_p11), %v697_v17, %v684_v14 }
 0x151   : > { %677 = vst [vmem:[#allocation2 + $0x28] sm:$0xff] %v669_v63  ;;  %v662_v6 = vadd.f32 %v661_v5, %v572_v2  ;;  %v705_v27 = vadd.f32 (!%p949_p11), %v701_v21, %v685_v18 }
 0x152   : > { %v670_v7 = vadd.f32 %v660_v3, %v340_v0 }
 0x153   : > { %v671_v8 = vadd.f32 %v662_v6, %v341_v4  ;;  %v686_v15 = vld [vmem:[#allocation2 + $0x10] sm:$0xff] (!%p949_p11) }
 0x154   : > { %678 = vst [vmem:[#allocation2 + $0x30] sm:$0xff] %v670_v7  ;;  %v687_v19 = vld [vmem:[#allocation2 + $0x18] sm:$0xff] (!%p949_p11)  ;;  %v706_v24 = vadd.f32 (!%p949_p11), %v697_v17, %v686_v15 }
 0x155   : > { %679 = vst [vmem:[#allocation2 + $0x38] sm:$0xff] %v671_v8  ;;  %v707_v28 = vadd.f32 (!%p949_p11), %v701_v21, %v687_v19 }
 0x156   : > { %v712_v31 = vadd.f32 %v706_v24, %v704_v23 }
 0x157   : > { %v688_v16 = vld [vmem:[#allocation2 + $0x20] sm:$0xff]  ;;  %v721_v33 = vadd.f32 %v707_v28, %v705_v27 }
 0x158   : > { %v689_v20 = vld [vmem:[#allocation2 + $0x28] sm:$0xff]  ;;  %v708_v25 = vadd.f32 %v697_v17, %v688_v16 }
 0x159   : > { %v709_v29 = vadd.f32 %v701_v21, %v689_v20 }
 0x15a   : > { %v713_v34 = vadd.f32 %v712_v31, %v708_v25 }
 0x15b   : > { %v690_v22 = vld [vmem:[#allocation2 + $0x30] sm:$0xff]  ;;  %v722_v35 = vadd.f32 %v721_v33, %v709_v29 }
 0x15c   : > { %v691_v26 = vld [vmem:[#allocation2 + $0x38] sm:$0xff]  ;;  %v710_v30 = vadd.f32 %v697_v17, %v690_v22 }
 0x15d   : > { %v711_v32 = vadd.f32 %v701_v21, %v691_v26 }
 0x15e   : > { %v714_v36 = vadd.f32 %v713_v34, %v710_v30 }
 0x15f   : > { %v723_v37 = vadd.f32 %v722_v35, %v711_v32 }
 0x160   : > { %v715_v38 = vrot.slane %v714_v36, 4 }
 0x161   : > { %v724_v39 = vrot.slane %v723_v37, 4 }
 0x162   : > { %v716_v40 = vadd.f32 %v715_v38, %v714_v36 }
 0x163   : > { %v725_v41 = vadd.f32 %v724_v39, %v723_v37 }
 0x164   : > { %v717_v42 = vrot.slane %v716_v40, 2 }
 0x165   : > { %v726_v43 = vrot.slane %v725_v41, 2 }
 0x166   : > { %v718_v44 = vadd.f32 %v717_v42, %v716_v40 }
 0x167   : > { %v727_v45 = vadd.f32 %v726_v43, %v725_v41 }
 0x168   : > { %v719_v46 = vrot.slane %v718_v44, 1 }
 0x169   : > { %v728_v47 = vrot.slane %v727_v45, 1 }
 0x16a   : > { %v720_v48 = vadd.f32 %v719_v46, %v718_v44 }
 0x16b   : > { %v729_v49 = vadd.f32 %v728_v47, %v727_v45 }
 0x16c   : > { %v730_v50 = vmul.f32 0.03125, %v720_v48 }
 0x16d   : > { %v731_v51 = vmul.f32 0.03125, %v729_v49 }
 0x16e   : > { %v732_v52 = vsub.f32 %v704_v23, %v730_v50  ;;  %v734_v53 = vsub.f32 %v706_v24, %v730_v50  ;;  %v736_v54 = vsub.f32 %v708_v25, %v730_v50  ;;  %v738_v55 = vsub.f32 %v710_v30, %v730_v50 }
 0x16f   : > { %v733_v56 = vsub.f32 %v705_v27, %v731_v51  ;;  %v735_v57 = vsub.f32 %v707_v28, %v731_v51  ;;  %v737_v58 = vsub.f32 %v709_v29, %v731_v51  ;;  %v739_v59 = vsub.f32 %v711_v32, %v731_v51  ;;  %v780_v28 = vld [vmem:[%s1487_s3] sm:$0x3] }
 0x170   : > { %v740_v60 = vmul.f32 %v732_v52, %v732_v52  ;;  %v742_v61 = vmul.f32 %v734_v53, %v734_v53  ;;  %v744_v62 = vmul.f32 %v736_v54, %v736_v54  ;;  %v746_v2 = vmul.f32 %v738_v55, %v738_v55  ;;  %v800_v29 = vld [vmem:[%s1488_s4] sm:$0x3] }
 0x171   : > { %v741_v63 = vmul.f32 %v733_v56, %v733_v56  ;;  %v743_v0 = vmul.f32 %v735_v57, %v735_v57  ;;  %v745_v1 = vmul.f32 %v737_v58, %v737_v58  ;;  %v747_v4 = vmul.f32 %v739_v59, %v739_v59 }
 0x172   : > { %v748_v3 = vadd.f32 %v742_v61, %v740_v60  ;;  %v785_v30 = vrot.slane %v780_v28, %v1429_v12  ;;  %v805_v32 = vrot.slane %v800_v29, %v1429_v12  ;;  %v789_v33 = vrot.slane %v780_v28, %v1431_v13 }
 0x173   : > { %v757_v5 = vadd.f32 %v743_v0, %v741_v63  ;;  %v809_v34 = vrot.slane %v800_v29, %v1431_v13 }
 0x174   : > { %v749_v6 = vadd.f32 %v748_v3, %v744_v62 }
 0x175   : > { %v758_v7 = vadd.f32 %v757_v5, %v745_v1 }
 0x176   : > { %v750_v8 = vadd.f32 %v749_v6, %v746_v2 }
 0x177   : > { %v759_v9 = vadd.f32 %v758_v7, %v747_v4 }
 0x178   : > { %v751_v10 = vrot.slane %v750_v8, 4 }
 0x179   : > { %v760_v11 = vrot.slane %v759_v9, 4 }
 0x17a   : > { %v752_v14 = vadd.f32 %v751_v10, %v750_v8 }
 0x17b   : > { %v761_v15 = vadd.f32 %v760_v11, %v759_v9 }
 0x17c   : > { %v753_v16 = vrot.slane %v752_v14, 2 }
 0x17d   : > { %v762_v17 = vrot.slane %v761_v15, 2 }
 0x17e   : > { %v754_v18 = vadd.f32 %v753_v16, %v752_v14 }
 0x17f   : > { %v763_v19 = vadd.f32 %v762_v17, %v761_v15 }
 0x180   : > { %v755_v20 = vrot.slane %v754_v18, 1 }
 0x181   : > { %v764_v21 = vrot.slane %v763_v19, 1 }
 0x182   : > { %v756_v22 = vadd.f32 %v755_v20, %v754_v18 }
 0x183   : > { %v765_v23 = vadd.f32 %v764_v21, %v763_v19 }
 0x184   : > { %v766_v24 = vmul.f32 0.03125, %v756_v22 }
 0x185   : > { %v767_v25 = vmul.f32 0.03125, %v765_v23 }
 0x186   : > { %v768_v26 = vadd.f32 1e-05, %v766_v24 }
 0x187   : > { %v769_v27 = vadd.f32 1e-05, %v767_v25 }
 0x188   : > { %1133 = vrsqrt.f32 %v768_v26 }
 0x189   : > { %1135 = vrsqrt.f32 %v769_v27 }
 0x192   : > { %v1134_v31 = vpop.eup %1133 }
 0x193   : > { %v1136_v35 = vpop.eup %1135  ;;  %v772_v36 = vmul.f32 %v1134_v31, %v732_v52  ;;  %v774_v37 = vmul.f32 %v1134_v31, %v734_v53  ;;  %v776_v38 = vmul.f32 %v1134_v31, %v736_v54  ;;  %v778_v39 = vmul.f32 %v1134_v31, %v738_v55 }
 0x194   : > { %v773_v40 = vmul.f32 %v1136_v35, %v733_v56  ;;  %v775_v41 = vmul.f32 %v1136_v35, %v735_v57  ;;  %v777_v42 = vmul.f32 %v1136_v35, %v737_v58  ;;  %v779_v43 = vmul.f32 %v1136_v35, %v739_v59 }
 0x195   : > { %v792_v44 = vmul.f32 %v785_v30, %v772_v36  ;;  %v794_v45 = vmul.f32 %v785_v30, %v774_v37  ;;  %v796_v46 = vmul.f32 %v785_v30, %v776_v38  ;;  %v798_v47 = vmul.f32 %v785_v30, %v778_v39 }
 0x196   : > { %v793_v48 = vmul.f32 %v789_v33, %v773_v40  ;;  %v795_v49 = vmul.f32 %v789_v33, %v775_v41  ;;  %v797_v12 = vmul.f32 %v789_v33, %v777_v42  ;;  %v799_v50 = vmul.f32 %v789_v33, %v779_v43 }
 0x197   : > { %v812_v51 = vadd.f32 %v805_v32, %v792_v44  ;;  %v814_v60 = vadd.f32 %v805_v32, %v794_v45  ;;  %v816_v13 = vadd.f32 %v805_v32, %v796_v46  ;;  %v818_v61 = vadd.f32 %v805_v32, %v798_v47 }
 0x198   : > { %v813_v52 = vadd.f32 %v809_v34, %v793_v48  ;;  %v815_v53 = vadd.f32 %v809_v34, %v795_v49  ;;  %v817_v54 = vadd.f32 %v809_v34, %v797_v12  ;;  %v819_v55 = vadd.f32 %v809_v34, %v799_v50 }
 0x199   : > { %vm820_vm0 = vcmp.ge.f32.partialorder %v812_v51, 0.0  ;;  %v828_v56 = vmul.f32 0.2, %v812_v51  ;;  %vm822_vm1 = vcmp.ge.f32.partialorder %v814_v60, 0.0  ;;  %v830_v57 = vmul.f32 0.2, %v814_v60 }
 0x19a   : > { %vm821_vm2 = vcmp.ge.f32.partialorder %v813_v52, 0.0  ;;  %v829_v58 = vmul.f32 0.2, %v813_v52  ;;  %vm823_vm3 = vcmp.ge.f32.partialorder %v815_v53, 0.0  ;;  %v831_v59 = vmul.f32 0.2, %v815_v53 }
 0x19b   : > { %v836_v62 = vsel %vm820_vm0, %v812_v51, %v828_v56  ;;  %v838_v63 = vsel %vm822_vm1, %v814_v60, %v830_v57  ;;  %vm824_vm4 = vcmp.ge.f32.partialorder %v816_v13, 0.0  ;;  %v832_v0 = vmul.f32 0.2, %v816_v13 }
 0x19c   : > { %844 = vst [vmem:[%s1489_s5] sm:$0xff] %v836_v62  ;;  %v837_v1 = vsel %vm821_vm2, %v813_v52, %v829_v58  ;;  %846 = vst [vmem:[%s1489_s5 + $0x10] sm:$0xff] %v838_v63  ;;  %v839_v2 = vsel %vm823_vm3, %v815_v53, %v831_v59  ;;  %vm825_vm5 = vcmp.ge.f32.partialorder %v817_v54, 0.0  ;;  %v833_v3 = vmul.f32 0.2, %v817_v54 }
 0x19d   : > { %845 = vst [vmem:[%s1489_s5 + $0x8] sm:$0xff] %v837_v1  ;;  %847 = vst [vmem:[%s1489_s5 + $0x18] sm:$0xff] %v839_v2  ;;  %v840_v4 = vsel %vm824_vm4, %v816_v13, %v832_v0  ;;  %vm826_vm6 = vcmp.ge.f32.partialorder %v818_v61, 0.0  ;;  %v834_v5 = vmul.f32 0.2, %v818_v61  ;;  %vm827_vm7 = vcmp.ge.f32.partialorder %v819_v55, 0.0 }
 0x19e   : > { %848 = vst [vmem:[%s1489_s5 + $0x20] sm:$0xff] %v840_v4  ;;  %v841_v6 = vsel %vm825_vm5, %v817_v54, %v833_v3  ;;  %v835_v7 = vmul.f32 0.2, %v819_v55 }
 0x19f   : > { %849 = vst [vmem:[%s1489_s5 + $0x28] sm:$0xff] %v841_v6  ;;  %v842_v8 = vsel %vm826_vm6, %v818_v61, %v834_v5 }
 0x1a0   : > { %850 = vst [vmem:[%s1489_s5 + $0x30] sm:$0xff] %v842_v8  ;;  %v843_v9 = vsel %vm827_vm7, %v819_v55, %v835_v7 }
 0x1a1   : > { %851 = vst [vmem:[%s1489_s5 + $0x38] sm:$0xff] %v843_v9 }
 0x1a2 PF: > { %s15_s22 = sadd.s32 1, %s1175_s22   ;;  %s1490_s18 = smov %s1163_s19 }
 0x1a3   : > { %p12_p12 = scmp.ge.s32.totalorder %s15_s22, 6   ;;  %s1491_s19 = smov %s1243_s26 }
 0x1a4   : > { %s1492_s20 = smov %s1171_s21  ;;  %s1493_s21 = smov %s1495_s23 }
 0x1a5   :  { %14 = sbr.rel (!%p12_p12) target bundleno = 3 (0x3), region = 109 }

// kernel: patch_discriminator.8
= control target key start
LH: loop header
LB: loop body
LE: loop exit
PB: predicated region body
PF: predicated region fallthrough
CT: control target
= control target key end

     0   :  { %s1749_s18 = smov 0   ;;  %s1751_s19 = smov 0   ;;  %s2249_s0 = inlined_call_operand.vmem [shape: f32[18,4096], index: 0, kind: input, shape index: {}]   ;;  %s2250_s1 = inlined_call_operand.vmem [shape: f32[4096,512], index: 1, kind: input, shape index: {}]   ;;  %s2251_s2 = inlined_call_operand.vmem [shape: f32[1,512], index: 2, kind: input, shape index: {}]   ;;  %s2252_s3 = inlined_call_operand.vmem [shape: f32[1,512], index: 3, kind: input, shape index: {}]   ;;  %s2253_s4 = inlined_call_operand.vmem [shape: f32[1,512], index: 4, kind: input, shape index: {}]   ;;  %s2254_s5 = inlined_call_operand.vmem [shape: f32[18,512], index: 5, kind: output, shape index: {}]  }
   0x1   :  { %s1753_s20 = smov 0   ;;  %s1755_s21 = smov 0  }
   0x2   :  { %s1757_s22 = smov 0  }
   0x3 LB: > { %s24_s23 = sadd.s32 1, %s1712_s21  ;;  %p43_p1 = scmp.ne.s32.totalorder %s1704_s19, %s1700_s18  ;;  %s1716_s22 = sphi %s1757_s22, %s15_s22   ;;  %s1712_s21 = sphi %s1755_s21, %s2258_s21   ;;  %s1708_s20 = sphi %s1753_s20, %s2257_s20   ;;  %s1704_s19 = sphi %s1751_s19, %s2256_s19   ;;  %s1700_s18 = sphi %s1749_s18, %s2255_s18  }
   0x4   : > { %p25_p0 = scmp.ge.s32.totalorder %s24_s23, 8  ;;  %p44_p2 = scmp.eq.s32.totalorder %s1716_s22, 0 }
   0x5   : > { %s36_s25 = sadd.s32 1, %s1704_s19  ;;  %p1344_p5 = scmp.ge.s32.totalorder %s1716_s22, 8 }
   0x6   : > { %s2260_s23 = smov (%p25_p0, %s24_s23), 0  ;;  %p45_p3 = por %p44_p2, %p43_p1 }
   0x7   : > { %s32_s24 = ssub.s32 %s1712_s21, %s2260_s23  ;;  %193 = sbr.rel (%p1344_p5) target bundleno = 25 (0x19), region = 28 }
   0x8   : > { %p34_p4 = scmp.eq.s32.totalorder %s32_s24, 0 }
   0xa   : > { %s1784_s26 = scalar_select %p34_p4, %s1704_s19, %s36_s25  }
   0xe   : > { %196 = sbr.rel (!%p45_p3) target bundleno = 25 (0x19), region = 32  ;;  %s198_s27 = sand.u32 (%p45_p3), 1, %s1704_s19  }
   0xf   : > { %s1357_s28 = sshll.u32 (%p45_p3), %s1712_s21, 5  ;;  %s1627_s29 = smul.u32 (%p45_p3), 96, %s198_s27 }
  0x10   : > { %s206_s7 = scalar_lea.vmem (%p45_p3), %s2249_s0, %s1357_s28 }
  0x11   : > { %v219_v0 = vld [vmem:[%s206_s7] sm:$0xff] (%p45_p3)  ;;  %v221_v1 = vld [vmem:[%s206_s7 + $0x8] sm:$0xff] (%p45_p3)  ;;  %v223_v2 = vld [vmem:[%s206_s7 + $0x10] sm:$0xff] (%p45_p3)  ;;  %s200_s8 = scalar_lea.vmem (%p45_p3), [#allocation3], %s1627_s29 }
  0x12   : > { %v225_v3 = vld [vmem:[%s206_s7 + $0x18] sm:$0xff] (%p45_p3)  ;;  %v227_v4 = vld [vmem:[%s206_s7 + $0x100] sm:$0xff] (%p45_p3)  ;;  %v229_v5 = vld [vmem:[%s206_s7 + $0x108] sm:$0xff] (%p45_p3)  ;;  %220 = vst [vmem:[%s200_s8] sm:$0xff] (%p45_p3), %v219_v0 }
  0x13   : > { %222 = vst [vmem:[%s200_s8 + $0x8] sm:$0xff] (%p45_p3), %v221_v1  ;;  %224 = vst [vmem:[%s200_s8 + $0x10] sm:$0xff] (%p45_p3), %v223_v2  ;;  %v231_v6 = vld [vmem:[%s206_s7 + $0x110] sm:$0xff] (%p45_p3)  ;;  %v233_v7 = vld [vmem:[%s206_s7 + $0x118] sm:$0xff] (%p45_p3) }
  0x14   : > { %226 = vst [vmem:[%s200_s8 + $0x18] sm:$0xff] (%p45_p3), %v225_v3  ;;  %228 = vst [vmem:[%s200_s8 + $0x20] sm:$0xff] (%p45_p3), %v227_v4  ;;  %v235_v8 = vld [vmem:[%s206_s7 + $0x200] sm:$0xff] (%p45_p3)  ;;  %v237_v9 = vld [vmem:[%s206_s7 + $0x208] sm:$0xff] (%p45_p3) }
  0x15   : > { %230 = vst [vmem:[%s200_s8 + $0x28] sm:$0xff] %v229_v5  ;;  %232 = vst [vmem:[%s200_s8 + $0x30] sm:$0xff] %v231_v6  ;;  %v239_v10 = vld [vmem:[%s206_s7 + $0x210] sm:$0xff]  ;;  %v241_v11 = vld [vmem:[%s206_s7 + $0x218] sm:$0xff] }
  0x16   : > { %234 = vst [vmem:[%s200_s8 + $0x38] sm:$0xff] %v233_v7  ;;  %236 = vst [vmem:[%s200_s8 + $0x40] sm:$0xff] %v235_v8 }
  0x17   : > { %238 = vst [vmem:[%s200_s8 + $0x48] sm:$0xff] %v237_v9  ;;  %240 = vst [vmem:[%s200_s8 + $0x50] sm:$0xff] %v239_v10 }
  0x18   : > { %242 = vst [vmem:[%s200_s8 + $0x58] sm:$0xff] %v241_v11 }
  0x19 PF: > { %p1347_p6 = scmp.ge.s32.totalorder %s1716_s22, 1  ;;  %p257_p7 = scmp.lt.s32.totalorder %s1716_s22, 9 }
  0x1b   : > { %p258_p8 = pnand %p1347_p6, %p257_p7 }
  0x1c   : > { %s264_s9 = sand.u32 (!%p258_p8), 1, %s1700_s18   ;;  %s1348_s10 = sshll.u32 (!%p258_p8), %s1708_s20, 6 }
  0x1d   : > { %261 = sbr.rel (%p258_p8) target bundleno = 483 (0x1e3), region = 59  ;;  %p301_p9 = scmp.lt.s32.totalorder (!%p258_p8), %s1348_s10, 511 }
  0x1e   : > { %s1628_s11 = smul.u32 (!%p258_p8), 96, %s264_s9  ;;  %p1351_p10 = scmp.ne.s32.totalorder (!%p258_p8), %s1708_s20, 0 }
  0x20   : > { %s1801_s16 = scalar_lea.vmem (!%p258_p8), [#allocation3], %s1628_s11 }
  0x24   : > { %s2262_s10 = smov (!%p301_p9, %s1348_s10), 511  ;;  %317 = sbr.rel (%p1351_p10) target bundleno = 44 (0x2c), region = 67 }
  0x25   : > { %s1358_s12 = sshll.u32 %s2262_s10, 5  ;;  %v1718_v12 = vmov (!%p1351_p10), 0.0  }
  0x26   : > { %s1799_s15 = scalar_lea.vmem %s2250_s1, %s1358_s12  ;;  %318 = vst [vmem:[#allocation2] sm:$0xff] (!%p1351_p10), %v1718_v12  ;;  %319 = vst [vmem:[#allocation2 + $0x8] sm:$0xff] (!%p1351_p10), %v1718_v12 }
  0x27   : > { %320 = vst [vmem:[#allocation2 + $0x10] sm:$0xff] (!%p1351_p10), %v1718_v12  ;;  %321 = vst [vmem:[#allocation2 + $0x18] sm:$0xff] (!%p1351_p10), %v1718_v12 }
  0x28   : > { %322 = vst [vmem:[#allocation2 + $0x20] sm:$0xff] (!%p1351_p10), %v1718_v12  ;;  %323 = vst [vmem:[#allocation2 + $0x28] sm:$0xff] (!%p1351_p10), %v1718_v12 }
  0x29   : > { %324 = vst [vmem:[#allocation2 + $0x30] sm:$0xff] (!%p1351_p10), %v1718_v12  ;;  %325 = vst [vmem:[#allocation2 + $0x38] sm:$0xff] (!%p1351_p10), %v1718_v12 }
  0x2a   : > { %326 = vst [vmem:[#allocation2 + $0x40] sm:$0x3] (!%p1351_p10), %v1718_v12  ;;  %327 = vst [vmem:[#allocation2 + $0x48] sm:$0x3] (!%p1351_p10), %v1718_v12 }
  0x2b   : > { %328 = vst [vmem:[#allocation2 + $0x50] sm:$0x3] %v1718_v12  ;;  %329 = vst [vmem:[#allocation2 + $0x58] sm:$0x3] %v1718_v12 }
  0x2c PF: > { %v355_v13 = vld [vmem:[%s1799_s15 + $0x8] sm:$0xff]  ;;  %v357_v15 = vld [vmem:[%s1799_s15 + $0x18] sm:$0xff]  ;;  %v354_v18 = vld [vmem:[%s1799_s15] sm:$0xff]  ;;  %p1352_p11 = scmp.ne.s32.totalorder %s1708_s20, 7 }
  0x2d   : > { %v359_v14 = vld [vmem:[%s1799_s15 + $0x28] sm:$0xff]  ;;  %v361_v17 = vld [vmem:[%s1799_s15 + $0x38] sm:$0xff]  ;;  %v358_v19 = vld [vmem:[%s1799_s15 + $0x20] sm:$0xff]  ;;  %vm1017_vm0 = vcmask (!%p1352_p11), 1041408  }
  0x2e   : > { %v1359_v16 = vpack.c.bf16 %v359_v14, %v355_v13  ;;  %v1487_v20 = vpack.c.bf16 %v361_v17, %v357_v15  ;;  %v1361_v21 = vpack.c.bf16 %v358_v19, %v354_v18  ;;  %v356_v22 = vld [vmem:[%s1799_s15 + $0x10] sm:$0xff]  ;;  %v363_v24 = vld [vmem:[%s1799_s15 + $0x48] sm:$0xff]  ;;  %v365_v27 = vld [vmem:[%s1799_s15 + $0x58] sm:$0xff] }
  0x2f   : > { %v360_v23 = vld [vmem:[%s1799_s15 + $0x30] sm:$0xff]  ;;  %v367_v26 = vld [vmem:[%s1799_s15 + $0x68] sm:$0xff]  ;;  %v369_v28 = vld [vmem:[%s1799_s15 + $0x78] sm:$0xff] }
  0x30   : > { %1360 = vmatprep.subr.bf16.mxu0 %v1359_v16  ;;  %v1489_v25 = vpack.c.bf16 %v360_v23, %v356_v22  ;;  %1488 = vmatprep.subr.bf16.mxu1 %v1487_v20  ;;  %v1363_v29 = vpack.c.bf16 %v367_v26, %v363_v24  ;;  %v1491_v30 = vpack.c.bf16 %v369_v28, %v365_v27  ;;  %v362_v31 = vld [vmem:[%s1799_s15 + $0x40] sm:$0xff]  ;;  %v364_v33 = vld [vmem:[%s1799_s15 + $0x50] sm:$0xff]  ;;  %v371_v36 = vld [vmem:[%s1799_s15 + $0x88] sm:$0xff] }
  0x31   : > { %1362 = vmatpush1.bf16.msra.mxu0 %v1361_v21  ;;  %v366_v32 = vld [vmem:[%s1799_s15 + $0x60] sm:$0xff]  ;;  %v368_v35 = vld [vmem:[%s1799_s15 + $0x70] sm:$0xff]  ;;  %v375_v37 = vld [vmem:[%s1799_s15 + $0xa8] sm:$0xff] }
  0x32   : > { %1490 = vmatpush1.bf16.msra.mxu1 %v1489_v25  ;;  %v1365_v34 = vpack.c.bf16 %v366_v32, %v362_v31  ;;  %1364 = vmatprep.subr.bf16.mxu0 %v1363_v29  ;;  %v1493_v38 = vpack.c.bf16 %v368_v35, %v364_v33  ;;  %v1367_v39 = vpack.c.bf16 %v375_v37, %v371_v36  ;;  %v373_v40 = vld [vmem:[%s1799_s15 + $0x98] sm:$0xff]  ;;  %v370_v42 = vld [vmem:[%s1799_s15 + $0x80] sm:$0xff]  ;;  %v372_v45 = vld [vmem:[%s1799_s15 + $0x90] sm:$0xff] }
  0x33   : > { %1492 = vmatprep.subr.bf16.mxu1 %v1491_v30  ;;  %v377_v41 = vld [vmem:[%s1799_s15 + $0xb8] sm:$0xff]  ;;  %v374_v44 = vld [vmem:[%s1799_s15 + $0xa0] sm:$0xff]  ;;  %v376_v46 = vld [vmem:[%s1799_s15 + $0xb0] sm:$0xff] }
  0x34   : > { %v1495_v43 = vpack.c.bf16 %v377_v41, %v373_v40  ;;  %v1369_v47 = vpack.c.bf16 %v374_v44, %v370_v42  ;;  %v379_v48 = vld [vmem:[%s1799_s15 + $0xc8] sm:$0xff]  ;;  %v381_v50 = vld [vmem:[%s1799_s15 + $0xd8] sm:$0xff]  ;;  %v1497_v51 = vpack.c.bf16 %v376_v46, %v372_v45  ;;  %v378_v54 = vld [vmem:[%s1799_s15 + $0xc0] sm:$0xff] }
  0x35   : > { %1366 = vmatpush1.bf16.msra.mxu0 %v1365_v34  ;;  %v383_v49 = vld [vmem:[%s1799_s15 + $0xe8] sm:$0xff]  ;;  %v385_v53 = vld [vmem:[%s1799_s15 + $0xf8] sm:$0xff]  ;;  %v382_v55 = vld [vmem:[%s1799_s15 + $0xe0] sm:$0xff] }
  0x36   : > { %1494 = vmatpush1.bf16.msra.mxu1 %v1493_v38  ;;  %1368 = vmatprep.subr.bf16.mxu0 %v1367_v39  ;;  %v1371_v52 = vpack.c.bf16 %v383_v49, %v379_v48  ;;  %v1499_v56 = vpack.c.bf16 %v385_v53, %v381_v50  ;;  %v380_v57 = vld [vmem:[%s1799_s15 + $0xd0] sm:$0xff]  ;;  %v387_v59 = vld [vmem:[%s1799_s15 + $0x108] sm:$0xff]  ;;  %v389_v61 = vld [vmem:[%s1799_s15 + $0x118] sm:$0xff]  ;;  %v1373_v63 = vpack.c.bf16 %v382_v55, %v378_v54 }
  0x37   : > { %1496 = vmatprep.subr.bf16.mxu1 %v1495_v43  ;;  %v384_v58 = vld [vmem:[%s1799_s15 + $0xf0] sm:$0xff]  ;;  %v391_v60 = vld [vmem:[%s1799_s15 + $0x128] sm:$0xff]  ;;  %v393_v62 = vld [vmem:[%s1799_s15 + $0x138] sm:$0xff] }
  0x38   : > { %v1501_v0 = vpack.c.bf16 %v384_v58, %v380_v57  ;;  %v1375_v1 = vpack.c.bf16 %v391_v60, %v387_v59  ;;  %v386_v2 = vld [vmem:[%s1799_s15 + $0x100] sm:$0xff]  ;;  %v388_v4 = vld [vmem:[%s1799_s15 + $0x110] sm:$0xff]  ;;  %v1503_v5 = vpack.c.bf16 %v393_v62, %v389_v61  ;;  %v395_v7 = vld [vmem:[%s1799_s15 + $0x148] sm:$0xff] }
  0x39   : > { %1370 = vmatpush1.bf16.msra.mxu0 %v1369_v47  ;;  %v390_v3 = vld [vmem:[%s1799_s15 + $0x120] sm:$0xff]  ;;  %v392_v6 = vld [vmem:[%s1799_s15 + $0x130] sm:$0xff]  ;;  %v399_v8 = vld [vmem:[%s1799_s15 + $0x168] sm:$0xff] }
  0x3a   : > { %1498 = vmatpush1.bf16.msra.mxu1 %v1497_v51  ;;  %1372 = vmatprep.subr.bf16.mxu0 %v1371_v52  ;;  %v397_v9 = vld [vmem:[%s1799_s15 + $0x158] sm:$0xff]  ;;  %v1377_v11 = vpack.c.bf16 %v390_v3, %v386_v2  ;;  %v1505_v12 = vpack.c.bf16 %v392_v6, %v388_v4  ;;  %v1379_v13 = vpack.c.bf16 %v399_v8, %v395_v7  ;;  %v394_v14 = vld [vmem:[%s1799_s15 + $0x140] sm:$0xff]  ;;  %v396_v16 = vld [vmem:[%s1799_s15 + $0x150] sm:$0xff] }
  0x3b   : > { %1500 = vmatprep.subr.bf16.mxu1 %v1499_v56  ;;  %v401_v10 = vld [vmem:[%s1799_s15 + $0x178] sm:$0xff]  ;;  %v398_v15 = vld [vmem:[%s1799_s15 + $0x160] sm:$0xff]  ;;  %v400_v18 = vld [vmem:[%s1799_s15 + $0x170] sm:$0xff] }
  0x3c   : > { %v1507_v17 = vpack.c.bf16 %v401_v10, %v397_v9  ;;  %v403_v19 = vld [vmem:[%s1799_s15 + $0x188] sm:$0xff]  ;;  %v405_v21 = vld [vmem:[%s1799_s15 + $0x198] sm:$0xff]  ;;  %v1381_v23 = vpack.c.bf16 %v398_v15, %v394_v14  ;;  %v1509_v24 = vpack.c.bf16 %v400_v18, %v396_v16  ;;  %v402_v26 = vld [vmem:[%s1799_s15 + $0x180] sm:$0xff] }
  0x3d   : > { %1374 = vmatpush1.bf16.msra.mxu0 %v1373_v63  ;;  %v407_v20 = vld [vmem:[%s1799_s15 + $0x1a8] sm:$0xff]  ;;  %v409_v22 = vld [vmem:[%s1799_s15 + $0x1b8] sm:$0xff]  ;;  %v406_v27 = vld [vmem:[%s1799_s15 + $0x1a0] sm:$0xff] }
  0x3e   : > { %1502 = vmatpush1.bf16.msra.mxu1 %v1501_v0  ;;  %1376 = vmatprep.subr.bf16.mxu0 %v1375_v1  ;;  %v1383_v25 = vpack.c.bf16 %v407_v20, %v403_v19  ;;  %v404_v28 = vld [vmem:[%s1799_s15 + $0x190] sm:$0xff]  ;;  %v1511_v29 = vpack.c.bf16 %v409_v22, %v405_v21  ;;  %v411_v31 = vld [vmem:[%s1799_s15 + $0x1c8] sm:$0xff]  ;;  %v413_v33 = vld [vmem:[%s1799_s15 + $0x1d8] sm:$0xff]  ;;  %v1385_v35 = vpack.c.bf16 %v406_v27, %v402_v26 }
  0x3f   : > { %1504 = vmatprep.subr.bf16.mxu1 %v1503_v5  ;;  %v408_v30 = vld [vmem:[%s1799_s15 + $0x1b0] sm:$0xff]  ;;  %v415_v32 = vld [vmem:[%s1799_s15 + $0x1e8] sm:$0xff]  ;;  %v417_v34 = vld [vmem:[%s1799_s15 + $0x1f8] sm:$0xff] }
  0x40   : > { %v1513_v36 = vpack.c.bf16 %v408_v30, %v404_v28  ;;  %v1387_v37 = vpack.c.bf16 %v415_v32, %v411_v31  ;;  %v410_v38 = vld [vmem:[%s1799_s15 + $0x1c0] sm:$0xff]  ;;  %v412_v40 = vld [vmem:[%s1799_s15 + $0x1d0] sm:$0xff]  ;;  %v1515_v41 = vpack.c.bf16 %v417_v34, %v413_v33  ;;  %v419_v43 = vld [vmem:[%s1799_s15 + $0x208] sm:$0xff] }
  0x41   : > { %1378 = vmatpush1.bf16.msra.mxu0 %v1377_v11  ;;  %v414_v39 = vld [vmem:[%s1799_s15 + $0x1e0] sm:$0xff]  ;;  %v416_v42 = vld [vmem:[%s1799_s15 + $0x1f0] sm:$0xff]  ;;  %v423_v44 = vld [vmem:[%s1799_s15 + $0x228] sm:$0xff] }
  0x42   : > { %1506 = vmatpush1.bf16.msra.mxu1 %v1505_v12  ;;  %1380 = vmatprep.subr.bf16.mxu0 %v1379_v13  ;;  %v421_v45 = vld [vmem:[%s1799_s15 + $0x218] sm:$0xff]  ;;  %v1389_v47 = vpack.c.bf16 %v414_v39, %v410_v38  ;;  %v1517_v48 = vpack.c.bf16 %v416_v42, %v412_v40  ;;  %v1391_v49 = vpack.c.bf16 %v423_v44, %v419_v43  ;;  %v418_v50 = vld [vmem:[%s1799_s15 + $0x200] sm:$0xff]  ;;  %v420_v52 = vld [vmem:[%s1799_s15 + $0x210] sm:$0xff] }
  0x43   : > { %1508 = vmatprep.subr.bf16.mxu1 %v1507_v17  ;;  %v425_v46 = vld [vmem:[%s1799_s15 + $0x238] sm:$0xff]  ;;  %v422_v51 = vld [vmem:[%s1799_s15 + $0x220] sm:$0xff]  ;;  %v424_v54 = vld [vmem:[%s1799_s15 + $0x230] sm:$0xff] }
  0x44   : > { %v1519_v53 = vpack.c.bf16 %v425_v46, %v421_v45  ;;  %v427_v55 = vld [vmem:[%s1799_s15 + $0x248] sm:$0xff]  ;;  %v429_v57 = vld [vmem:[%s1799_s15 + $0x258] sm:$0xff]  ;;  %v1393_v59 = vpack.c.bf16 %v422_v51, %v418_v50  ;;  %v1521_v60 = vpack.c.bf16 %v424_v54, %v420_v52  ;;  %v426_v62 = vld [vmem:[%s1799_s15 + $0x240] sm:$0xff] }
  0x45   : > { %1382 = vmatpush1.bf16.msra.mxu0 %v1381_v23  ;;  %v431_v56 = vld [vmem:[%s1799_s15 + $0x268] sm:$0xff]  ;;  %v433_v58 = vld [vmem:[%s1799_s15 + $0x278] sm:$0xff]  ;;  %v430_v63 = vld [vmem:[%s1799_s15 + $0x260] sm:$0xff] }
  0x46   : > { %1510 = vmatpush1.bf16.msra.mxu1 %v1509_v24  ;;  %1384 = vmatprep.subr.bf16.mxu0 %v1383_v25  ;;  %v1395_v61 = vpack.c.bf16 %v431_v56, %v427_v55  ;;  %v428_v0 = vld [vmem:[%s1799_s15 + $0x250] sm:$0xff]  ;;  %v1523_v1 = vpack.c.bf16 %v433_v58, %v429_v57  ;;  %v435_v3 = vld [vmem:[%s1799_s15 + $0x288] sm:$0xff]  ;;  %v437_v5 = vld [vmem:[%s1799_s15 + $0x298] sm:$0xff]  ;;  %v1397_v7 = vpack.c.bf16 %v430_v63, %v426_v62 }
  0x47   : > { %1512 = vmatprep.subr.bf16.mxu1 %v1511_v29  ;;  %v432_v2 = vld [vmem:[%s1799_s15 + $0x270] sm:$0xff]  ;;  %v439_v4 = vld [vmem:[%s1799_s15 + $0x2a8] sm:$0xff]  ;;  %v441_v6 = vld [vmem:[%s1799_s15 + $0x2b8] sm:$0xff] }
  0x48   : > { %v1525_v8 = vpack.c.bf16 %v432_v2, %v428_v0  ;;  %v1399_v9 = vpack.c.bf16 %v439_v4, %v435_v3  ;;  %v434_v10 = vld [vmem:[%s1799_s15 + $0x280] sm:$0xff]  ;;  %v436_v12 = vld [vmem:[%s1799_s15 + $0x290] sm:$0xff]  ;;  %v1527_v13 = vpack.c.bf16 %v441_v6, %v437_v5  ;;  %v443_v15 = vld [vmem:[%s1799_s15 + $0x2c8] sm:$0xff] }
  0x49   : > { %1386 = vmatpush1.bf16.msra.mxu0 %v1385_v35  ;;  %v438_v11 = vld [vmem:[%s1799_s15 + $0x2a0] sm:$0xff]  ;;  %v440_v14 = vld [vmem:[%s1799_s15 + $0x2b0] sm:$0xff]  ;;  %v447_v16 = vld [vmem:[%s1799_s15 + $0x2e8] sm:$0xff] }
  0x4a   : > { %1514 = vmatpush1.bf16.msra.mxu1 %v1513_v36  ;;  %1388 = vmatprep.subr.bf16.mxu0 %v1387_v37  ;;  %v445_v17 = vld [vmem:[%s1799_s15 + $0x2d8] sm:$0xff]  ;;  %v1401_v19 = vpack.c.bf16 %v438_v11, %v434_v10  ;;  %v442_v20 = vld [vmem:[%s1799_s15 + $0x2c0] sm:$0xff]  ;;  %v1529_v21 = vpack.c.bf16 %v440_v14, %v436_v12  ;;  %v1403_v22 = vpack.c.bf16 %v447_v16, %v443_v15  ;;  %v444_v24 = vld [vmem:[%s1799_s15 + $0x2d0] sm:$0xff] }
  0x4b   : > { %1516 = vmatprep.subr.bf16.mxu1 %v1515_v41  ;;  %v449_v18 = vld [vmem:[%s1799_s15 + $0x2f8] sm:$0xff]  ;;  %v446_v23 = vld [vmem:[%s1799_s15 + $0x2e0] sm:$0xff]  ;;  %v448_v25 = vld [vmem:[%s1799_s15 + $0x2f0] sm:$0xff] }
  0x4c   : > { %v1531_v26 = vpack.c.bf16 %v449_v18, %v445_v17  ;;  %v451_v27 = vld [vmem:[%s1799_s15 + $0x308] sm:$0xff]  ;;  %v453_v30 = vld [vmem:[%s1799_s15 + $0x318] sm:$0xff]  ;;  %v1405_v32 = vpack.c.bf16 %v446_v23, %v442_v20  ;;  %v1533_v33 = vpack.c.bf16 %v448_v25, %v444_v24  ;;  %v450_v35 = vld [vmem:[%s1799_s15 + $0x300] sm:$0xff] }
  0x4d   : > { %1390 = vmatpush1.bf16.msra.mxu0 %v1389_v47  ;;  %v455_v28 = vld [vmem:[%s1799_s15 + $0x328] sm:$0xff]  ;;  %v457_v31 = vld [vmem:[%s1799_s15 + $0x338] sm:$0xff]  ;;  %v454_v36 = vld [vmem:[%s1799_s15 + $0x320] sm:$0xff] }
  0x4e   : > { %1518 = vmatpush1.bf16.msra.mxu1 %v1517_v48  ;;  %1392 = vmatprep.subr.bf16.mxu0 %v1391_v49  ;;  %v343_v29 = vld [vmem:[%s1801_s16 + $0x8] sm:$0xff]  ;;  %v1407_v34 = vpack.c.bf16 %v455_v28, %v451_v27  ;;  %v452_v37 = vld [vmem:[%s1799_s15 + $0x310] sm:$0xff]  ;;  %v1535_v38 = vpack.c.bf16 %v457_v31, %v453_v30  ;;  %v461_v42 = vld [vmem:[%s1799_s15 + $0x358] sm:$0xff]  ;;  %v1409_v44 = vpack.c.bf16 %v454_v36, %v450_v35 }
  0x4f   : > { %1520 = vmatprep.subr.bf16.mxu1 %v1519_v53  ;;  %674 = vmatprep.mubr.f32.mxu0 %v343_v29  ;;  %v456_v39 = vld [vmem:[%s1799_s15 + $0x330] sm:$0xff]  ;;  %v459_v40 = vld [vmem:[%s1799_s15 + $0x348] sm:$0xff]  ;;  %v465_v43 = vld [vmem:[%s1799_s15 + $0x378] sm:$0xff] }
  0x50   : > { %840 = vmatprep.mubr.f32.mxu1 %v343_v29  ;;  %v463_v41 = vld [vmem:[%s1799_s15 + $0x368] sm:$0xff]  ;;  %v1537_v45 = vpack.c.bf16 %v456_v39, %v452_v37  ;;  %v458_v47 = vld [vmem:[%s1799_s15 + $0x340] sm:$0xff]  ;;  %v460_v49 = vld [vmem:[%s1799_s15 + $0x350] sm:$0xff]  ;;  %v1539_v50 = vpack.c.bf16 %v465_v43, %v461_v42 }
  0x51   : > { %1394 = vmatpush1.bf16.msra.mxu0 %v1393_v59  ;;  %v1411_v46 = vpack.c.bf16 %v463_v41, %v459_v40  ;;  %v462_v48 = vld [vmem:[%s1799_s15 + $0x360] sm:$0xff]  ;;  %v464_v51 = vld [vmem:[%s1799_s15 + $0x370] sm:$0xff]  ;;  %v467_v52 = vld [vmem:[%s1799_s15 + $0x388] sm:$0xff] }
  0x52   : > { %1522 = vmatpush1.bf16.msra.mxu1 %v1521_v60  ;;  %1396 = vmatprep.subr.bf16.mxu0 %v1395_v61  ;;  %v471_v53 = vld [vmem:[%s1799_s15 + $0x3a8] sm:$0xff]  ;;  %v469_v54 = vld [vmem:[%s1799_s15 + $0x398] sm:$0xff]  ;;  %v1413_v56 = vpack.c.bf16 %v462_v48, %v458_v47  ;;  %v1541_v57 = vpack.c.bf16 %v464_v51, %v460_v49  ;;  %v466_v59 = vld [vmem:[%s1799_s15 + $0x380] sm:$0xff] }
  0x53   : > { %1524 = vmatprep.subr.bf16.mxu1 %v1523_v1  ;;  %v473_v55 = vld [vmem:[%s1799_s15 + $0x3b8] sm:$0xff]  ;;  %v1415_v58 = vpack.c.bf16 %v471_v53, %v467_v52  ;;  %v470_v60 = vld [vmem:[%s1799_s15 + $0x3a0] sm:$0xff]  ;;  %v468_v61 = vld [vmem:[%s1799_s15 + $0x390] sm:$0xff] }
  0x54   : > { %v1543_v62 = vpack.c.bf16 %v473_v55, %v469_v54  ;;  %v472_v63 = vld [vmem:[%s1799_s15 + $0x3b0] sm:$0xff]  ;;  %v475_v0 = vld [vmem:[%s1799_s15 + $0x3c8] sm:$0xff]  ;;  %v477_v2 = vld [vmem:[%s1799_s15 + $0x3d8] sm:$0xff]  ;;  %v1417_v4 = vpack.c.bf16 %v470_v60, %v466_v59 }
  0x55   : > { %1398 = vmatpush1.bf16.msra.mxu0 %v1397_v7  ;;  %v479_v1 = vld [vmem:[%s1799_s15 + $0x3e8] sm:$0xff]  ;;  %v481_v3 = vld [vmem:[%s1799_s15 + $0x3f8] sm:$0xff]  ;;  %v1545_v5 = vpack.c.bf16 %v472_v63, %v468_v61  ;;  %v474_v7 = vld [vmem:[%s1799_s15 + $0x3c0] sm:$0xff] }
  0x56   : > { %1526 = vmatpush1.bf16.msra.mxu1 %v1525_v8  ;;  %1400 = vmatprep.subr.bf16.mxu0 %v1399_v9  ;;  %v1419_v6 = vpack.c.bf16 %v479_v1, %v475_v0  ;;  %v478_v8 = vld [vmem:[%s1799_s15 + $0x3e0] sm:$0xff]  ;;  %v476_v9 = vld [vmem:[%s1799_s15 + $0x3d0] sm:$0xff]  ;;  %v1547_v10 = vpack.c.bf16 %v481_v3, %v477_v2  ;;  %v483_v12 = vld [vmem:[%s1799_s15 + $0x408] sm:$0xff] }
  0x57   : > { %1528 = vmatprep.subr.bf16.mxu1 %v1527_v13  ;;  %v480_v11 = vld [vmem:[%s1799_s15 + $0x3f0] sm:$0xff]  ;;  %v487_v13 = vld [vmem:[%s1799_s15 + $0x428] sm:$0xff]  ;;  %v485_v14 = vld [vmem:[%s1799_s15 + $0x418] sm:$0xff]  ;;  %v1421_v16 = vpack.c.bf16 %v478_v8, %v474_v7 }
  0x58   : > { %v489_v15 = vld [vmem:[%s1799_s15 + $0x438] sm:$0xff]  ;;  %v1549_v17 = vpack.c.bf16 %v480_v11, %v476_v9  ;;  %v1423_v18 = vpack.c.bf16 %v487_v13, %v483_v12  ;;  %v486_v20 = vld [vmem:[%s1799_s15 + $0x420] sm:$0xff]  ;;  %v488_v23 = vld [vmem:[%s1799_s15 + $0x430] sm:$0xff] }
  0x59   : > { %1402 = vmatpush1.bf16.msra.mxu0 %v1401_v19  ;;  %v482_v19 = vld [vmem:[%s1799_s15 + $0x400] sm:$0xff]  ;;  %v491_v24 = vld [vmem:[%s1799_s15 + $0x448] sm:$0xff]  ;;  %v497_v27 = vld [vmem:[%s1799_s15 + $0x478] sm:$0xff] }
  0x5a   : > { %1530 = vmatpush1.bf16.msra.mxu1 %v1529_v21  ;;  %1404 = vmatprep.subr.bf16.mxu0 %v1403_v22  ;;  %v484_v21 = vld [vmem:[%s1799_s15 + $0x410] sm:$0xff]  ;;  %v1551_v22 = vpack.c.bf16 %v489_v15, %v485_v14  ;;  %v495_v25 = vld [vmem:[%s1799_s15 + $0x468] sm:$0xff]  ;;  %v342_v28 = vld [vmem:[%s1801_s16] sm:$0xff]  ;;  %v1425_v29 = vpack.c.bf16 %v486_v20, %v482_v19 }
  0x5b   : > { %1532 = vmatprep.subr.bf16.mxu1 %v1531_v26  ;;  %v493_v26 = vld [vmem:[%s1799_s15 + $0x458] sm:$0xff]  ;;  %v1553_v30 = vpack.c.bf16 %v488_v23, %v484_v21  ;;  %v1427_v31 = vpack.c.bf16 %v495_v25, %v491_v24  ;;  %v496_v36 = vld [vmem:[%s1799_s15 + $0x470] sm:$0xff]  ;;  %v499_v37 = vld [vmem:[%s1799_s15 + $0x488] sm:$0xff] }
  0x5c   : > { %v1555_v35 = vpack.c.bf16 %v497_v27, %v493_v26  ;;  %v501_v39 = vld [vmem:[%s1799_s15 + $0x498] sm:$0xff]  ;;  %v504_v48 = vld [vmem:[%s1799_s15 + $0x4b0] sm:$0xff]  ;;  %v507_v49 = vld [vmem:[%s1799_s15 + $0x4c8] sm:$0xff] }
  0x5d   : > { %1406 = vmatpush1.bf16.msra.mxu0 %v1405_v32  ;;  %v490_v32 = vld [vmem:[%s1799_s15 + $0x440] sm:$0xff]  ;;  %v505_v40 = vld [vmem:[%s1799_s15 + $0x4b8] sm:$0xff]  ;;  %v512_v60 = vld [vmem:[%s1799_s15 + $0x4f0] sm:$0xff] }
  0x5e   : > { %1534 = vmatpush1.bf16.msra.mxu1 %v1533_v33  ;;  %1408 = vmatprep.subr.bf16.mxu0 %v1407_v34  ;;  %v494_v33 = vld [vmem:[%s1799_s15 + $0x460] sm:$0xff]  ;;  %v492_v34 = vld [vmem:[%s1799_s15 + $0x450] sm:$0xff]  ;;  %v1559_v47 = vpack.c.bf16 %v505_v40, %v501_v39  ;;  %v509_v51 = vld [vmem:[%s1799_s15 + $0x4d8] sm:$0xff] }
  0x5f   : > { %1536 = vmatprep.subr.bf16.mxu1 %v1535_v38  ;;  %v503_v38 = vld [vmem:[%s1799_s15 + $0x4a8] sm:$0xff]  ;;  %v1429_v41 = vpack.c.bf16 %v494_v33, %v490_v32  ;;  %v1557_v42 = vpack.c.bf16 %v496_v36, %v492_v34  ;;  %v513_v52 = vld [vmem:[%s1799_s15 + $0x4f8] sm:$0xff]  ;;  %v520_v8 = vld [vmem:[%s1799_s15 + $0x530] sm:$0xff] }
  0x60   : > { %v1431_v43 = vpack.c.bf16 %v503_v38, %v499_v37  ;;  %v1563_v59 = vpack.c.bf16 %v513_v52, %v509_v51  ;;  %v515_v61 = vld [vmem:[%s1799_s15 + $0x508] sm:$0xff]  ;;  %v517_v63 = vld [vmem:[%s1799_s15 + $0x518] sm:$0xff]  ;;  %v522_v14 = vld [vmem:[%s1799_s15 + $0x540] sm:$0xff] }
  0x61   : > { %1410 = vmatpush1.bf16.msra.mxu0 %v1409_v44  ;;  %v498_v44 = vld [vmem:[%s1799_s15 + $0x480] sm:$0xff]  ;;  %v521_v0 = vld [vmem:[%s1799_s15 + $0x538] sm:$0xff]  ;;  %v523_v9 = vld [vmem:[%s1799_s15 + $0x548] sm:$0xff] }
  0x62   : > { %1538 = vmatpush1.bf16.msra.mxu1 %v1537_v45  ;;  %1412 = vmatprep.subr.bf16.mxu0 %v1411_v46  ;;  %v502_v45 = vld [vmem:[%s1799_s15 + $0x4a0] sm:$0xff]  ;;  %v500_v46 = vld [vmem:[%s1799_s15 + $0x490] sm:$0xff]  ;;  %v1567_v7 = vpack.c.bf16 %v521_v0, %v517_v63  ;;  %v525_v11 = vld [vmem:[%s1799_s15 + $0x558] sm:$0xff] }
  0x63   : > { %1540 = vmatprep.subr.bf16.mxu1 %v1539_v50  ;;  %v511_v50 = vld [vmem:[%s1799_s15 + $0x4e8] sm:$0xff]  ;;  %v1433_v53 = vpack.c.bf16 %v502_v45, %v498_v44  ;;  %v1561_v54 = vpack.c.bf16 %v504_v48, %v500_v46  ;;  %v529_v12 = vld [vmem:[%s1799_s15 + $0x578] sm:$0xff]  ;;  %v524_v19 = vld [vmem:[%s1799_s15 + $0x550] sm:$0xff] }
  0x64   : > { %v1435_v55 = vpack.c.bf16 %v511_v50, %v507_v49  ;;  %v347_v15 = vld [vmem:[%s1801_s16 + $0x28] sm:$0xff]  ;;  %v346_v20 = vld [vmem:[%s1801_s16 + $0x20] sm:$0xff]  ;;  %v1571_v21 = vpack.c.bf16 %v529_v12, %v525_v11  ;;  %v533_v25 = vld [vmem:[%s1799_s15 + $0x598] sm:$0xff] }
  0x65   : > { %1414 = vmatpush1.bf16.msra.mxu0 %v1413_v56  ;;  %v506_v56 = vld [vmem:[%s1799_s15 + $0x4c0] sm:$0xff]  ;;  %v531_v23 = vld [vmem:[%s1799_s15 + $0x588] sm:$0xff]  ;;  %v537_v26 = vld [vmem:[%s1799_s15 + $0x5b8] sm:$0xff] }
  0x66   : > { %1542 = vmatpush1.bf16.msra.mxu1 %v1541_v57  ;;  %1416 = vmatprep.subr.bf16.mxu0 %v1415_v58  ;;  %v510_v57 = vld [vmem:[%s1799_s15 + $0x4e0] sm:$0xff]  ;;  %v508_v58 = vld [vmem:[%s1799_s15 + $0x4d0] sm:$0xff]  ;;  %v535_v24 = vld [vmem:[%s1799_s15 + $0x5a8] sm:$0xff] }
  0x67   : > { %1544 = vmatprep.subr.bf16.mxu1 %v1543_v62  ;;  %v519_v62 = vld [vmem:[%s1799_s15 + $0x528] sm:$0xff]  ;;  %v1437_v1 = vpack.c.bf16 %v510_v57, %v506_v56  ;;  %v1565_v2 = vpack.c.bf16 %v512_v60, %v508_v58  ;;  %v530_v32 = vld [vmem:[%s1799_s15 + $0x580] sm:$0xff]  ;;  %v532_v34 = vld [vmem:[%s1799_s15 + $0x590] sm:$0xff] }
  0x68   : > { %v1439_v3 = vpack.c.bf16 %v519_v62, %v515_v61  ;;  %v534_v33 = vld [vmem:[%s1799_s15 + $0x5a0] sm:$0xff]  ;;  %v536_v36 = vld [vmem:[%s1799_s15 + $0x5b0] sm:$0xff]  ;;  %v539_v37 = vld [vmem:[%s1799_s15 + $0x5c8] sm:$0xff] }
  0x69   : > { %1418 = vmatpush1.bf16.msra.mxu0 %v1417_v4  ;;  %v514_v4 = vld [vmem:[%s1799_s15 + $0x500] sm:$0xff]  ;;  %v543_v38 = vld [vmem:[%s1799_s15 + $0x5e8] sm:$0xff]  ;;  %v541_v39 = vld [vmem:[%s1799_s15 + $0x5d8] sm:$0xff] }
  0x6a   : > { %1546 = vmatpush1.bf16.msra.mxu1 %v1545_v5  ;;  %1420 = vmatprep.subr.bf16.mxu0 %v1419_v6  ;;  %v518_v5 = vld [vmem:[%s1799_s15 + $0x520] sm:$0xff]  ;;  %v516_v6 = vld [vmem:[%s1799_s15 + $0x510] sm:$0xff]  ;;  %v545_v40 = vld [vmem:[%s1799_s15 + $0x5f8] sm:$0xff]  ;;  %v1451_v44 = vpack.c.bf16 %v543_v38, %v539_v37 }
  0x6b   : > { %1548 = vmatprep.subr.bf16.mxu1 %v1547_v10  ;;  %v527_v10 = vld [vmem:[%s1799_s15 + $0x568] sm:$0xff]  ;;  %v1441_v13 = vpack.c.bf16 %v518_v5, %v514_v4  ;;  %v538_v45 = vld [vmem:[%s1799_s15 + $0x5c0] sm:$0xff]  ;;  %v1579_v48 = vpack.c.bf16 %v545_v40, %v541_v39  ;;  %v544_v49 = vld [vmem:[%s1799_s15 + $0x5f0] sm:$0xff] }
  0x6c   : > { %v542_v46 = vld [vmem:[%s1799_s15 + $0x5e0] sm:$0xff]  ;;  %v547_v50 = vld [vmem:[%s1799_s15 + $0x608] sm:$0xff]  ;;  %v549_v52 = vld [vmem:[%s1799_s15 + $0x618] sm:$0xff] }
  0x6d   : > { %1422 = vmatpush1.bf16.msra.mxu0 %v1421_v16  ;;  %v1569_v16 = vpack.c.bf16 %v520_v8, %v516_v6  ;;  %v551_v51 = vld [vmem:[%s1799_s15 + $0x628] sm:$0xff]  ;;  %v546_v57 = vld [vmem:[%s1799_s15 + $0x600] sm:$0xff]  ;;  %v552_v61 = vld [vmem:[%s1799_s15 + $0x630] sm:$0xff] }
  0x6e   : > { %1550 = vmatpush1.bf16.msra.mxu1 %v1549_v17  ;;  %1424 = vmatprep.subr.bf16.mxu0 %v1423_v18  ;;  %v1443_v17 = vpack.c.bf16 %v527_v10, %v523_v9  ;;  %v526_v18 = vld [vmem:[%s1799_s15 + $0x560] sm:$0xff]  ;;  %v1455_v56 = vpack.c.bf16 %v551_v51, %v547_v50  ;;  %v555_v62 = vld [vmem:[%s1799_s15 + $0x648] sm:$0xff]  ;;  %v557_v0 = vld [vmem:[%s1799_s15 + $0x658] sm:$0xff] }
  0x6f   : > { %1552 = vmatprep.subr.bf16.mxu1 %v1551_v22  ;;  %v528_v22 = vld [vmem:[%s1799_s15 + $0x570] sm:$0xff]  ;;  %v1445_v27 = vpack.c.bf16 %v526_v18, %v522_v14  ;;  %v550_v58 = vld [vmem:[%s1799_s15 + $0x620] sm:$0xff]  ;;  %v559_v63 = vld [vmem:[%s1799_s15 + $0x668] sm:$0xff] }
  0x70   : > { %675 = vmatmul.mubr.f32.vlgmr.msra.gmra.mrb[0].mxu0 %v342_v28  ;;  %v1459_v4 = vpack.c.bf16 %v559_v63, %v555_v62  ;;  %v554_v5 = vld [vmem:[%s1799_s15 + $0x640] sm:$0xff]  ;;  %v560_v9 = vld [vmem:[%s1799_s15 + $0x670] sm:$0xff]  ;;  %v563_v10 = vld [vmem:[%s1799_s15 + $0x688] sm:$0xff] }
  0x71   : > { %1426 = vmatpush1.bf16.msra.mxu0 %v1425_v29  ;;  %841 = vmatmul.mubr.f32.vlgmr.msra.gmra.mrb[0].mxu1 %v342_v28  ;;  %v351_v28 = vld [vmem:[%s1801_s16 + $0x48] sm:$0x3]  ;;  %v350_v29 = vld [vmem:[%s1801_s16 + $0x40] sm:$0x3]  ;;  %v565_v12 = vld [vmem:[%s1799_s15 + $0x698] sm:$0xff] }
  0x72   : > { %1554 = vmatpush1.bf16.msra.mxu1 %v1553_v30  ;;  %1428 = vmatprep.subr.bf16.mxu0 %v1427_v31  ;;  %v1573_v30 = vpack.c.bf16 %v528_v22, %v524_v19  ;;  %v1447_v31 = vpack.c.bf16 %v535_v24, %v531_v23  ;;  %v558_v6 = vld [vmem:[%s1799_s15 + $0x660] sm:$0xff]  ;;  %v567_v11 = vld [vmem:[%s1799_s15 + $0x6a8] sm:$0xff]  ;;  %v564_v19 = vld [vmem:[%s1799_s15 + $0x690] sm:$0xff] }
  0x73   : > { %1556 = vmatprep.subr.bf16.mxu1 %v1555_v35  ;;  %680 = vmatprep.mubr.f32.mxu0 %v347_v15  ;;  %v1575_v35 = vpack.c.bf16 %v537_v26, %v533_v25  ;;  %v1461_v14 = vpack.c.bf16 %v558_v6, %v554_v5  ;;  %v566_v18 = vld [vmem:[%s1799_s15 + $0x6a0] sm:$0xff]  ;;  %v571_v22 = vld [vmem:[%s1799_s15 + $0x6c8] sm:$0xff]  ;;  %v573_v24 = vld [vmem:[%s1799_s15 + $0x6d8] sm:$0xff] }
  0x74   : > { %846 = vmatprep.mubr.f32.mxu1 %v347_v15  ;;  %681 = vmatmul.mubr.f32.gmra.mrb[2].mxu0 %v346_v20  ;;  %v575_v23 = vld [vmem:[%s1799_s15 + $0x6e8] sm:$0xff]  ;;  %v577_v25 = vld [vmem:[%s1799_s15 + $0x6f8] sm:$0xff]  ;;  %v600_v5 = vld [vmem:[%s1799_s15 + $0x7b0] sm:$0xff] }
  0x75   : > { %1430 = vmatpush1.bf16.msra.mxu0 %v1429_v41  ;;  %847 = vmatmul.mubr.f32.gmra.mrb[2].mxu1 %v346_v20  ;;  %v345_v41 = vld [vmem:[%s1801_s16 + $0x18] sm:$0xff]  ;;  %v603_v6 = vld [vmem:[%s1799_s15 + $0x7c8] sm:$0xff] }
  0x76   : > { %1558 = vmatpush1.bf16.msra.mxu1 %v1557_v42  ;;  %1432 = vmatprep.subr.bf16.mxu0 %v1431_v43  ;;  %v1449_v42 = vpack.c.bf16 %v534_v33, %v530_v32  ;;  %v1577_v43 = vpack.c.bf16 %v536_v36, %v532_v34  ;;  %v1595_v32 = vpack.c.bf16 %v577_v25, %v573_v24  ;;  %v576_v33 = vld [vmem:[%s1799_s15 + $0x6f0] sm:$0xff]  ;;  %v579_v34 = vld [vmem:[%s1799_s15 + $0x708] sm:$0xff]  ;;  %v581_v36 = vld [vmem:[%s1799_s15 + $0x718] sm:$0xff] }
  0x77   : > { %1560 = vmatprep.subr.bf16.mxu1 %v1559_v47  ;;  %686 = vmatprep.mubr.f32.mxu0 %v351_v28  ;;  %v540_v47 = vld [vmem:[%s1799_s15 + $0x5d0] sm:$0xff]  ;;  %v585_v37 = vld [vmem:[%s1799_s15 + $0x738] sm:$0xff]  ;;  %v330_v25 = vld [vmem:[#allocation2] sm:$0xff] }
  0x78   : > { %852 = vmatprep.mubr.f32.mxu1 %v351_v28  ;;  %687 = vmatmul.mubr.f32.gmra.mrb[4].mxu0 %v350_v29  ;;  %v1467_v28 = vpack.c.bf16 %v575_v23, %v571_v22  ;;  %v348_v22 = vld [vmem:[%s1801_s16 + $0x30] sm:$0xff]  ;;  %v353_v23 = vld [vmem:[%s1801_s16 + $0x58] sm:$0x3] }
  0x79   : > { %1434 = vmatpush1.bf16.msra.mxu0 %v1433_v53  ;;  %853 = vmatmul.mubr.f32.gmra.mrb[4].mxu1 %v350_v29  ;;  %v553_v53 = vld [vmem:[%s1799_s15 + $0x638] sm:$0xff]  ;;  %v570_v29 = vld [vmem:[%s1799_s15 + $0x6c0] sm:$0xff]  ;;  %v352_v24 = vld [vmem:[%s1801_s16 + $0x50] sm:$0x3] }
  0x7a   : > { %1562 = vmatpush1.bf16.msra.mxu1 %v1561_v54  ;;  %1436 = vmatprep.subr.bf16.mxu0 %v1435_v55  ;;  %v1453_v54 = vpack.c.bf16 %v542_v46, %v538_v45  ;;  %v1581_v55 = vpack.c.bf16 %v544_v49, %v540_v47  ;;  %v1583_v60 = vpack.c.bf16 %v553_v53, %v549_v52  ;;  %v584_v45 = vld [vmem:[%s1799_s15 + $0x730] sm:$0xff]  ;;  %v587_v46 = vld [vmem:[%s1799_s15 + $0x748] sm:$0xff]  ;;  %v593_v49 = vld [vmem:[%s1799_s15 + $0x778] sm:$0xff] }
  0x7b   : > { %1564 = vmatprep.subr.bf16.mxu1 %v1563_v59  ;;  %757 = vmatprep.mubr.f32.mxu0 %v345_v41  ;;  %v548_v59 = vld [vmem:[%s1799_s15 + $0x610] sm:$0xff]  ;;  %v591_v47 = vld [vmem:[%s1799_s15 + $0x768] sm:$0xff]  ;;  %v586_v53 = vld [vmem:[%s1799_s15 + $0x740] sm:$0xff] }
  0x7c   : > { %923 = vmatprep.mubr.f32.mxu1 %v345_v41  ;;  %v578_v41 = vld [vmem:[%s1799_s15 + $0x700] sm:$0xff]  ;;  %v1475_v52 = vpack.c.bf16 %v591_v47, %v587_v46 }
  0x7d   : > { %1438 = vmatpush1.bf16.msra.mxu0 %v1437_v1  ;;  %v561_v1 = vld [vmem:[%s1799_s15 + $0x678] sm:$0xff] }
  0x7e   : > { %1566 = vmatpush1.bf16.msra.mxu1 %v1565_v2  ;;  %1440 = vmatprep.subr.bf16.mxu0 %v1439_v3  ;;  %v1457_v2 = vpack.c.bf16 %v550_v58, %v546_v57  ;;  %v1585_v3 = vpack.c.bf16 %v552_v61, %v548_v59  ;;  %v1587_v8 = vpack.c.bf16 %v561_v1, %v557_v0  ;;  %v592_v57 = vld [vmem:[%s1799_s15 + $0x770] sm:$0xff]  ;;  %v595_v58 = vld [vmem:[%s1799_s15 + $0x788] sm:$0xff]  ;;  %v601_v61 = vld [vmem:[%s1799_s15 + $0x7b8] sm:$0xff] }
  0x7f   : > { %1568 = vmatprep.subr.bf16.mxu1 %v1567_v7  ;;  %v556_v7 = vld [vmem:[%s1799_s15 + $0x650] sm:$0xff]  ;;  %v599_v59 = vld [vmem:[%s1799_s15 + $0x7a8] sm:$0xff]  ;;  %v594_v1 = vld [vmem:[%s1799_s15 + $0x780] sm:$0xff] }
  0x80   : > { %v1589_v15 = vpack.c.bf16 %v560_v9, %v556_v7  ;;  %v1479_v0 = vpack.c.bf16 %v599_v59, %v595_v58  ;;  %v607_v7 = vld [vmem:[%s1799_s15 + $0x7e8] sm:$0xff]  ;;  %v609_v9 = vld [vmem:[%s1799_s15 + $0x7f8] sm:$0xff] }
  0x81   : > { %1442 = vmatpush1.bf16.msra.mxu0 %v1441_v13  ;;  %v569_v13 = vld [vmem:[%s1799_s15 + $0x6b8] sm:$0xff] }
  0x82   : > { %1570 = vmatpush1.bf16.msra.mxu1 %v1569_v16  ;;  %1444 = vmatprep.subr.bf16.mxu0 %v1443_v17  ;;  %v1463_v16 = vpack.c.bf16 %v567_v11, %v563_v10  ;;  %v562_v17 = vld [vmem:[%s1799_s15 + $0x680] sm:$0xff]  ;;  %v1591_v20 = vpack.c.bf16 %v569_v13, %v565_v12  ;;  %v1483_v12 = vpack.c.bf16 %v607_v7, %v603_v6 }
  0x83   : > { %1572 = vmatprep.subr.bf16.mxu1 %v1571_v21  ;;  %v568_v21 = vld [vmem:[%s1799_s15 + $0x6b0] sm:$0xff]  ;;  %v1465_v26 = vpack.c.bf16 %v566_v18, %v562_v17  ;;  %v602_v13 = vld [vmem:[%s1799_s15 + $0x7c0] sm:$0xff] }
  0x84   : > { %v608_v17 = vld [vmem:[%s1799_s15 + $0x7f0] sm:$0xff] }
  0x85   : > { %1446 = vmatpush1.bf16.msra.mxu0 %v1445_v27  ;;  %v1593_v27 = vpack.c.bf16 %v568_v21, %v564_v19  ;;  %v349_v21 = vld [vmem:[%s1801_s16 + $0x38] sm:$0xff] }
  0x86   : > { %1574 = vmatpush1.bf16.msra.mxu1 %v1573_v30  ;;  %1448 = vmatprep.subr.bf16.mxu0 %v1447_v31  ;;  %v574_v30 = vld [vmem:[%s1799_s15 + $0x6e0] sm:$0xff]  ;;  %v572_v31 = vld [vmem:[%s1799_s15 + $0x6d0] sm:$0xff] }
  0x87   : > { %1576 = vmatprep.subr.bf16.mxu1 %v1575_v35  ;;  %v583_v35 = vld [vmem:[%s1799_s15 + $0x728] sm:$0xff]  ;;  %v1469_v38 = vpack.c.bf16 %v574_v30, %v570_v29  ;;  %v1597_v39 = vpack.c.bf16 %v576_v33, %v572_v31  ;;  %v333_v29 = vld [vmem:[#allocation2 + $0x18] sm:$0xff] }
  0x88   : > { %v1471_v40 = vpack.c.bf16 %v583_v35, %v579_v34 }
  0x89   : > { %1450 = vmatpush1.bf16.msra.mxu0 %v1449_v42  ;;  %v582_v42 = vld [vmem:[%s1799_s15 + $0x720] sm:$0xff] }
  0x8a   : > { %1578 = vmatpush1.bf16.msra.mxu1 %v1577_v43  ;;  %1452 = vmatprep.subr.bf16.mxu0 %v1451_v44  ;;  %v580_v43 = vld [vmem:[%s1799_s15 + $0x710] sm:$0xff]  ;;  %v1599_v44 = vpack.c.bf16 %v585_v37, %v581_v36  ;;  %v1473_v50 = vpack.c.bf16 %v582_v42, %v578_v41  ;;  %v334_v36 = vld [vmem:[#allocation2 + $0x20] sm:$0xff]  ;;  %v337_v41 = vld [vmem:[#allocation2 + $0x38] sm:$0xff] }
  0x8b   : > { %1580 = vmatprep.subr.bf16.mxu1 %v1579_v48  ;;  %v589_v48 = vld [vmem:[%s1799_s15 + $0x758] sm:$0xff]  ;;  %v1601_v51 = vpack.c.bf16 %v584_v45, %v580_v43 }
  0x8d   : > { %1454 = vmatpush1.bf16.msra.mxu0 %v1453_v54  ;;  %v590_v54 = vld [vmem:[%s1799_s15 + $0x760] sm:$0xff] }
  0x8e   : > { %1582 = vmatpush1.bf16.msra.mxu1 %v1581_v55  ;;  %1456 = vmatprep.subr.bf16.mxu0 %v1455_v56  ;;  %v588_v55 = vld [vmem:[%s1799_s15 + $0x750] sm:$0xff]  ;;  %v1603_v56 = vpack.c.bf16 %v593_v49, %v589_v48  ;;  %v1477_v62 = vpack.c.bf16 %v590_v54, %v586_v53  ;;  %v338_v48 = vld [vmem:[#allocation2 + $0x40] sm:$0x3]  ;;  %v341_v53 = vld [vmem:[#allocation2 + $0x58] sm:$0x3] }
  0x8f   : > { %1584 = vmatprep.subr.bf16.mxu1 %v1583_v60  ;;  %v597_v60 = vld [vmem:[%s1799_s15 + $0x798] sm:$0xff]  ;;  %v1605_v63 = vpack.c.bf16 %v592_v57, %v588_v55 }
  0x91   : > { %1458 = vmatpush1.bf16.msra.mxu0 %v1457_v2  ;;  %v598_v2 = vld [vmem:[%s1799_s15 + $0x7a0] sm:$0xff] }
  0x92   : > { %1586 = vmatpush1.bf16.msra.mxu1 %v1585_v3  ;;  %1460 = vmatprep.subr.bf16.mxu0 %v1459_v4  ;;  %v596_v3 = vld [vmem:[%s1799_s15 + $0x790] sm:$0xff]  ;;  %v1607_v4 = vpack.c.bf16 %v601_v61, %v597_v60  ;;  %v1481_v10 = vpack.c.bf16 %v598_v2, %v594_v1  ;;  %v984_v61 = vlaneseq (!%p1352_p11) }
  0x93   : > { %1588 = vmatprep.subr.bf16.mxu1 %v1587_v8  ;;  %v605_v8 = vld [vmem:[%s1799_s15 + $0x7d8] sm:$0xff]  ;;  %v1609_v11 = vpack.c.bf16 %v600_v5, %v596_v3 }
  0x95   : > { %1462 = vmatpush1.bf16.msra.mxu0 %v1461_v14  ;;  %v606_v14 = vld [vmem:[%s1799_s15 + $0x7e0] sm:$0xff] }
  0x96   : > { %1590 = vmatpush1.bf16.msra.mxu1 %v1589_v15  ;;  %1464 = vmatprep.subr.bf16.mxu0 %v1463_v16  ;;  %v1611_v15 = vpack.c.bf16 %v609_v9, %v605_v8  ;;  %v604_v16 = vld [vmem:[%s1799_s15 + $0x7d0] sm:$0xff]  ;;  %v1485_v18 = vpack.c.bf16 %v606_v14, %v602_v13 }
  0x97   : > { %1592 = vmatprep.subr.bf16.mxu1 %v1591_v20  ;;  %v1613_v19 = vpack.c.bf16 %v608_v17, %v604_v16  ;;  %v344_v20 = vld [vmem:[%s1801_s16 + $0x10] sm:$0xff] }
  0x99   : > { %1466 = vmatpush1.bf16.msra.mxu0 %v1465_v26  ;;  %v332_v26 = vld [vmem:[#allocation2 + $0x10] sm:$0xff] }
  0x9a   : > { %1594 = vmatpush1.bf16.msra.mxu1 %v1593_v27  ;;  %1468 = vmatprep.subr.bf16.mxu0 %v1467_v28  ;;  %v331_v27 = vld [vmem:[#allocation2 + $0x8] sm:$0xff] }
  0x9b   : > { %1596 = vmatprep.subr.bf16.mxu1 %v1595_v32 }
  0x9d   : > { %1470 = vmatpush1.bf16.msra.mxu0 %v1469_v38  ;;  %v336_v38 = vld [vmem:[#allocation2 + $0x30] sm:$0xff] }
  0x9e   : > { %1598 = vmatpush1.bf16.msra.mxu1 %v1597_v39  ;;  %1472 = vmatprep.subr.bf16.mxu0 %v1471_v40  ;;  %v335_v39 = vld [vmem:[#allocation2 + $0x28] sm:$0xff] }
  0x9f   : > { %1600 = vmatprep.subr.bf16.mxu1 %v1599_v44 }
  0xa1   : > { %1474 = vmatpush1.bf16.msra.mxu0 %v1473_v50  ;;  %v340_v50 = vld [vmem:[#allocation2 + $0x50] sm:$0x3] }
  0xa2   : > { %1602 = vmatpush1.bf16.msra.mxu1 %v1601_v51  ;;  %1476 = vmatprep.subr.bf16.mxu0 %v1475_v52  ;;  %v339_v51 = vld [vmem:[#allocation2 + $0x48] sm:$0x3] }
  0xa3   : > { %1604 = vmatprep.subr.bf16.mxu1 %v1603_v56 }
  0xa5   : > { %1478 = vmatpush1.bf16.msra.mxu0 %v1477_v62  ;;  %v985_v62 = vshrl.u32 (!%p1352_p11), %v984_v61, 7 }
  0xa6   : > { %1606 = vmatpush1.bf16.msra.mxu1 %v1605_v63  ;;  %1480 = vmatprep.subr.bf16.mxu0 %v1479_v0  ;;  %v982_v63 = vld [vmem:[%s2251_s2] sm:$0xf] (!%p1352_p11) }
  0xa7   : > { %1608 = vmatprep.subr.bf16.mxu1 %v1607_v4  ;;  %v2076_v2 = vsub.s32 (!%p1352_p11), 0, %v985_v62  ;;  %v2078_v3 = vsub.s32 (!%p1352_p11), 1, %v985_v62  ;;  %v2080_v4 = vsub.s32 (!%p1352_p11), 2, %v985_v62 }
  0xa9   : > { %1482 = vmatpush1.bf16.msra.mxu0 %v1481_v10  ;;  %v987_v8 = vrot.slane (!%p1352_p11), %v982_v63, %v2076_v2  ;;  %v991_v10 = vrot.slane (!%p1352_p11), %v982_v63, %v2078_v3  ;;  %v995_v14 = vrot.slane (!%p1352_p11), %v982_v63, %v2080_v4 }
  0xaa   : > { %1610 = vmatpush1.bf16.msra.mxu1 %v1609_v11  ;;  %1484 = vmatprep.subr.bf16.mxu0 %v1483_v12 }
  0xab   : > { %1612 = vmatprep.subr.bf16.mxu1 %v1611_v15  ;;  %v2085_v15 = vsub.s32 (!%p1352_p11), 3, %v985_v62 }
  0xad   : > { %1486 = vmatpush1.bf16.msra.mxu0 %v1485_v18 }
  0xae   : > { %1614 = vmatpush1.bf16.msra.mxu1 %v1613_v19 }
  0xb0   : > { %758 = vmatmul.mubr.f32.vlgmr.msra.gmra.mrb[0].mxu0 %v344_v20 }
  0xb1   : > { %924 = vmatmul.mubr.f32.vlgmr.msra.gmra.mrb[0].mxu1 %v344_v20  ;;  %763 = vmatprep.mubr.f32.mxu0 %v349_v21 }
  0xb2   : > { %929 = vmatprep.mubr.f32.mxu1 %v349_v21 }
  0xb4   : > { %764 = vmatmul.mubr.f32.gmra.mrb[2].mxu0 %v348_v22 }
  0xb5   : > { %930 = vmatmul.mubr.f32.gmra.mrb[2].mxu1 %v348_v22  ;;  %769 = vmatprep.mubr.f32.mxu0 %v353_v23 }
  0xb6   : > { %935 = vmatprep.mubr.f32.mxu1 %v353_v23 }
  0xb8   : > { %770 = vmatmul.mubr.f32.gmra.mrb[4].mxu0 %v352_v24 }
  0xb9   : > { %936 = vmatmul.mubr.f32.gmra.mrb[4].mxu1 %v352_v24 }
 0x183   : > { %v759_v28 = vpop.f32.mrb[0].mxu0 }
 0x184   : > { %v942_v30 = vadd.f32 %v759_v28, %v330_v25  ;;  %v925_v31 = vpop.f32.mrb[0].mxu1  ;;  %v761_v32 = vpop.f32.mrb[1].mxu0 }
 0x185   : > { %v944_v33 = vadd.f32 %v925_v31, %v332_v26  ;;  %v943_v34 = vadd.f32 %v761_v32, %v331_v27  ;;  %v927_v35 = vpop.f32.mrb[1].mxu1 }
 0x186   : > { %954 = vst [vmem:[#allocation2] sm:$0xff] %v942_v30  ;;  %v945_v37 = vadd.f32 %v927_v35, %v333_v29 }
 0x187   : > { %956 = vst [vmem:[#allocation2 + $0x10] sm:$0xff] %v944_v33  ;;  %955 = vst [vmem:[#allocation2 + $0x8] sm:$0xff] %v943_v34  ;;  %v765_v40 = vpop.f32.mrb[2].mxu0  ;;  %v999_v33 = vrot.slane (!%p1352_p11), %v982_v63, %v2085_v15 }
 0x188   : > { %957 = vst [vmem:[#allocation2 + $0x18] sm:$0xff] %v945_v37  ;;  %v946_v42 = vadd.f32 %v765_v40, %v334_v36  ;;  %v931_v43 = vpop.f32.mrb[2].mxu1  ;;  %v767_v44 = vpop.f32.mrb[3].mxu0 }
 0x189   : > { %v948_v45 = vadd.f32 %v931_v43, %v336_v38  ;;  %v947_v46 = vadd.f32 %v767_v44, %v335_v39  ;;  %v933_v47 = vpop.f32.mrb[3].mxu1 }
 0x18a   : > { %958 = vst [vmem:[#allocation2 + $0x20] sm:$0xff] %v946_v42  ;;  %v949_v49 = vadd.f32 %v933_v47, %v337_v41  ;;  %969 = sbr.rel (%p1352_p11) target bundleno = 483 (0x1e3), region = 71 }
 0x18b   : > { %960 = vst [vmem:[#allocation2 + $0x30] sm:$0xff] %v948_v45  ;;  %959 = vst [vmem:[#allocation2 + $0x28] sm:$0xff] %v947_v46  ;;  %v771_v52 = vpop.f32.mrb[4].mxu0 }
 0x18c   : > { %961 = vst [vmem:[#allocation2 + $0x38] sm:$0xff] %v949_v49  ;;  %v950_v54 = vadd.f32 %v771_v52, %v338_v48  ;;  %v937_v55 = vpop.f32.mrb[4].mxu1  ;;  %v773_v56 = vpop.f32.mrb[5].mxu0 }
 0x18d   : > { %v952_v57 = vadd.f32 %v937_v55, %v340_v50  ;;  %v951_v58 = vadd.f32 %v773_v56, %v339_v51  ;;  %v939_v59 = vpop.f32.mrb[5].mxu1  ;;  %v970_v0 = vld [vmem:[#allocation2] sm:$0xff] (!%p1352_p11) }
 0x18e   : > { %962 = vst [vmem:[#allocation2 + $0x40] sm:$0x3] %v950_v54  ;;  %v953_v60 = vadd.f32 %v939_v59, %v341_v53  ;;  %v971_v6 = vld [vmem:[#allocation2 + $0x8] sm:$0xff] (!%p1352_p11)  ;;  %v972_v11 = vld [vmem:[#allocation2 + $0x10] sm:$0xff] (!%p1352_p11)  ;;  %v1004_v16 = vadd.f32 (!%p1352_p11), %v987_v8, %v970_v0 }
 0x18f   : > { %964 = vst [vmem:[#allocation2 + $0x50] sm:$0x3] %v952_v57  ;;  %963 = vst [vmem:[#allocation2 + $0x48] sm:$0x3] %v951_v58  ;;  %v1005_v19 = vadd.f32 (!%p1352_p11), %v991_v10, %v971_v6  ;;  %v1006_v22 = vadd.f32 (!%p1352_p11), %v995_v14, %v972_v11  ;;  %v973_v27 = vld [vmem:[#allocation2 + $0x18] sm:$0xff] (!%p1352_p11) }
 0x190   : > { %965 = vst [vmem:[#allocation2 + $0x58] sm:$0x3] %v953_v60  ;;  %v2091_v38 = vadd.f32 (!%p1352_p11), %v999_v33, %v973_v27 }
 0x191   : > { %v974_v1 = vld [vmem:[#allocation2 + $0x20] sm:$0xff] }
 0x192   : > { %v975_v7 = vld [vmem:[#allocation2 + $0x28] sm:$0xff]  ;;  %v976_v12 = vld [vmem:[#allocation2 + $0x30] sm:$0xff]  ;;  %v1008_v17 = vadd.f32 %v987_v8, %v974_v1 }
 0x193   : > { %v1009_v20 = vadd.f32 %v991_v10, %v975_v7  ;;  %v1010_v23 = vadd.f32 %v995_v14, %v976_v12  ;;  %v977_v28 = vld [vmem:[#allocation2 + $0x38] sm:$0xff] }
 0x194   : > { %v1016_v24 = vadd.f32 %v1008_v17, %v1004_v16  ;;  %v2093_v39 = vadd.f32 %v999_v33, %v977_v28 }
 0x195   : > { %v978_v5 = vld [vmem:[#allocation2 + $0x40] sm:$0x3]  ;;  %v1026_v29 = vadd.f32 %v1009_v20, %v1005_v19  ;;  %v1035_v31 = vadd.f32 %v1010_v23, %v1006_v22 }
 0x196   : > { %v979_v9 = vld [vmem:[#allocation2 + $0x48] sm:$0x3]  ;;  %v980_v13 = vld [vmem:[#allocation2 + $0x50] sm:$0x3]  ;;  %v1012_v18 = vadd.f32 %v987_v8, %v978_v5  ;;  %v1044_v44 = vadd.f32 %v2093_v39, %v2091_v38 }
 0x197   : > { %v1013_v21 = vadd.f32 %v991_v10, %v979_v9  ;;  %v1014_v26 = vadd.f32 %v995_v14, %v980_v13  ;;  %v981_v32 = vld [vmem:[#allocation2 + $0x58] sm:$0x3] }
 0x198   : > { %v1018_v25 = vsel %vm1017_vm0, %v1012_v18, 0.0  ;;  %v1015_v41 = vadd.f32 %v999_v33, %v981_v32 }
 0x199   : > { %v1027_v30 = vsel %vm1017_vm0, %v1013_v21, 0.0  ;;  %v1019_v34 = vadd.f32 %v1018_v25, %v1016_v24  ;;  %v1036_v35 = vsel %vm1017_vm0, %v1014_v26, 0.0 }
 0x19a   : > { %v1028_v36 = vadd.f32 %v1027_v30, %v1026_v29  ;;  %v1037_v37 = vadd.f32 %v1036_v35, %v1035_v31  ;;  %v1045_v46 = vsel %vm1017_vm0, %v1015_v41, 0.0 }
 0x19b   : > { %v1020_v40 = vrot.slane %v1019_v34, 4  ;;  %v1046_v49 = vadd.f32 %v1045_v46, %v1044_v44 }
 0x19c   : > { %v1029_v42 = vrot.slane %v1028_v36, 4  ;;  %v1038_v43 = vrot.slane %v1037_v37, 4 }
 0x19d   : > { %v1021_v45 = vadd.f32 %v1020_v40, %v1019_v34  ;;  %v1047_v53 = vrot.slane %v1046_v49, 4 }
 0x19e   : > { %v1030_v47 = vadd.f32 %v1029_v42, %v1028_v36  ;;  %v1039_v48 = vadd.f32 %v1038_v43, %v1037_v37 }
 0x19f   : > { %v1022_v50 = vrot.slane %v1021_v45, 2  ;;  %v1048_v57 = vadd.f32 %v1047_v53, %v1046_v49 }
 0x1a0   : > { %v1031_v51 = vrot.slane %v1030_v47, 2  ;;  %v1040_v52 = vrot.slane %v1039_v48, 2 }
 0x1a1   : > { %v1023_v54 = vadd.f32 %v1022_v50, %v1021_v45  ;;  %v1049_v61 = vrot.slane %v1048_v57, 2 }
 0x1a2   : > { %v1032_v55 = vadd.f32 %v1031_v51, %v1030_v47  ;;  %v1041_v56 = vadd.f32 %v1040_v52, %v1039_v48 }
 0x1a3   : > { %v1024_v58 = vrot.slane %v1023_v54, 1  ;;  %v1050_v1 = vadd.f32 %v1049_v61, %v1048_v57 }
 0x1a4   : > { %v1033_v59 = vrot.slane %v1032_v55, 1  ;;  %v1042_v60 = vrot.slane %v1041_v56, 1 }
 0x1a5   : > { %v1025_v62 = vadd.f32 %v1024_v58, %v1023_v54  ;;  %v1051_v11 = vrot.slane %v1050_v1, 1 }
 0x1a6   : > { %v1034_v63 = vadd.f32 %v1033_v59, %v1032_v55  ;;  %v1043_v0 = vadd.f32 %v1042_v60, %v1041_v56 }
 0x1a7   : > { %v1053_v5 = vmul.f32 0.055555556, %v1025_v62  ;;  %v1052_v33 = vadd.f32 %v1051_v11, %v1050_v1 }
 0x1a8   : > { %v1054_v6 = vmul.f32 0.055555556, %v1034_v63  ;;  %v1055_v7 = vmul.f32 0.055555556, %v1043_v0 }
 0x1a9   : > { %v2098_v8 = vsub.f32 %v1004_v16, %v1053_v5  ;;  %v2100_v9 = vsub.f32 %v1008_v17, %v1053_v5  ;;  %v2102_v10 = vsub.f32 %v1012_v18, %v1053_v5  ;;  %v1056_v37 = vmul.f32 0.055555556, %v1052_v33 }
 0x1aa   : > { %v2104_v12 = vsub.f32 %v1005_v19, %v1054_v6  ;;  %v2106_v13 = vsub.f32 %v1009_v20, %v1054_v6  ;;  %v2108_v14 = vsub.f32 %v1013_v21, %v1054_v6  ;;  %v2110_v24 = vsub.f32 %v1006_v22, %v1055_v7 }
 0x1ab   : > { %v1069_v25 = vmul.f32 %v2098_v8, %v2098_v8  ;;  %v1073_v16 = vmul.f32 %v2100_v9, %v2100_v9  ;;  %v1077_v17 = vmul.f32 %v2102_v10, %v2102_v10  ;;  %v2118_v18 = vsub.f32 %v1010_v23, %v1055_v7 }
 0x1ac   : > { %v1070_v19 = vmul.f32 %v2104_v12, %v2104_v12  ;;  %v1074_v20 = vmul.f32 %v2106_v13, %v2106_v13  ;;  %v1078_v21 = vmul.f32 %v2108_v14, %v2108_v14  ;;  %v2126_v22 = vsub.f32 %v1014_v26, %v1055_v7 }
 0x1ad   : > { %v1081_v27 = vadd.f32 %v1073_v16, %v1069_v25  ;;  %v1082_v28 = vsel %vm1017_vm0, %v1077_v17, 0.0  ;;  %v1071_v29 = vmul.f32 %v2110_v24, %v2110_v24  ;;  %v1075_v23 = vmul.f32 %v2118_v18, %v2118_v18 }
 0x1ae   : > { %v1090_v30 = vadd.f32 %v1074_v20, %v1070_v19  ;;  %v1091_v31 = vsel %vm1017_vm0, %v1078_v21, 0.0  ;;  %v1079_v32 = vmul.f32 %v2126_v22, %v2126_v22  ;;  %v2138_v44 = vsub.f32 %v2091_v38, %v1056_v37 }
 0x1af   : > { %v1083_v34 = vadd.f32 %v1082_v28, %v1081_v27  ;;  %v1099_v35 = vadd.f32 %v1075_v23, %v1071_v29  ;;  %v2141_v45 = vsub.f32 %v2093_v39, %v1056_v37  ;;  %v2143_v46 = vsub.f32 %v1015_v41, %v1056_v37  ;;  %v1141_v23 = vld [vmem:[%s2252_s3] sm:$0xf] }
 0x1b0   : > { %v1092_v26 = vadd.f32 %v1091_v31, %v1090_v30  ;;  %v1100_v36 = vsel %vm1017_vm0, %v1079_v32, 0.0  ;;  %v1072_v50 = vmul.f32 %v2138_v44, %v2138_v44  ;;  %v1175_v30 = vld [vmem:[%s2253_s4] sm:$0xf]  ;;  %v1146_v32 = vrot.slane %v1141_v23, %v2076_v2 }
 0x1b1   : > { %v1084_v40 = vrot.slane %v1083_v34, 4  ;;  %v1101_v42 = vadd.f32 %v1100_v36, %v1099_v35  ;;  %v1076_v51 = vmul.f32 %v2141_v45, %v2141_v45  ;;  %v1080_v52 = vmul.f32 %v2143_v46, %v2143_v46 }
 0x1b2   : > { %v1093_v43 = vrot.slane %v1092_v26, 4  ;;  %v1180_v33 = vrot.slane %v1175_v30, %v2076_v2  ;;  %v1150_v35 = vrot.slane %v1141_v23, %v2078_v3  ;;  %v2163_v36 = vrot.slane %v1141_v23, %v2080_v4 }
 0x1b3   : > { %v1085_v47 = vadd.f32 %v1084_v40, %v1083_v34  ;;  %v1102_v48 = vrot.slane %v1101_v42, 4  ;;  %v1108_v55 = vadd.f32 %v1076_v51, %v1072_v50  ;;  %v1109_v39 = vsel %vm1017_vm0, %v1080_v52, 0.0 }
 0x1b4   : > { %v1094_v49 = vadd.f32 %v1093_v43, %v1092_v26  ;;  %v1184_v26 = vrot.slane %v1175_v30, %v2078_v3  ;;  %v2166_v37 = vrot.slane %v1175_v30, %v2080_v4  ;;  %v2170_v43 = vrot.slane %v1141_v23, %v2085_v15 }
 0x1b5   : > { %v1086_v53 = vrot.slane %v1085_v47, 2  ;;  %v1103_v38 = vadd.f32 %v1102_v48, %v1101_v42  ;;  %v1110_v58 = vadd.f32 %v1109_v39, %v1108_v55  ;;  %v2176_v3 = vrot.slane %v1175_v30, %v2085_v15 }
 0x1b6   : > { %v1095_v54 = vrot.slane %v1094_v49, 2 }
 0x1b7   : > { %v1087_v41 = vadd.f32 %v1086_v53, %v1085_v47  ;;  %v1104_v56 = vrot.slane %v1103_v38, 2  ;;  %v1111_v62 = vrot.slane %v1110_v58, 4 }
 0x1b8   : > { %v1096_v57 = vadd.f32 %v1095_v54, %v1094_v49 }
 0x1b9   : > { %v1088_v59 = vrot.slane %v1087_v41, 1  ;;  %v1105_v60 = vadd.f32 %v1104_v56, %v1103_v38  ;;  %v1112_v5 = vadd.f32 %v1111_v62, %v1110_v58 }
 0x1ba   : > { %v1097_v61 = vrot.slane %v1096_v57, 1 }
 0x1bb   : > { %v1089_v63 = vadd.f32 %v1088_v59, %v1087_v41  ;;  %v1106_v0 = vrot.slane %v1105_v60, 1  ;;  %v1113_v25 = vrot.slane %v1112_v5, 2 }
 0x1bc   : > { %v1098_v1 = vadd.f32 %v1097_v61, %v1096_v57 }
 0x1bd   : > { %v1117_v6 = vmul.f32 0.055555556, %v1089_v63  ;;  %v1107_v7 = vadd.f32 %v1106_v0, %v1105_v60  ;;  %v1114_v20 = vadd.f32 %v1113_v25, %v1112_v5 }
 0x1be   : > { %v1118_v11 = vmul.f32 0.055555556, %v1098_v1 }
 0x1bf   : > { %v1121_v16 = vadd.f32 1e-05, %v1117_v6  ;;  %v1119_v17 = vmul.f32 0.055555556, %v1107_v7  ;;  %v1115_v27 = vrot.slane %v1114_v20, 1 }
 0x1c0   : > { %v1122_v19 = vadd.f32 1e-05, %v1118_v11 }
 0x1c1   : > { %1670 = vrsqrt.f32 %v1121_v16  ;;  %v1123_v21 = vadd.f32 1e-05, %v1119_v17  ;;  %v1116_v28 = vadd.f32 %v1115_v27, %v1114_v20 }
 0x1c2   : > { %1672 = vrsqrt.f32 %v1122_v19 }
 0x1c3   : > { %1674 = vrsqrt.f32 %v1123_v21  ;;  %v1120_v29 = vmul.f32 0.055555556, %v1116_v28 }
 0x1c5   : > { %v1124_v31 = vadd.f32 1e-05, %v1120_v29 }
 0x1c7   : > { %1676 = vrsqrt.f32 %v1124_v31 }
 0x1cb   : > { %v1671_v34 = vpop.eup %1670 }
 0x1cc   : > { %v1673_v40 = vpop.eup %1672  ;;  %v1129_v42 = vmul.f32 %v1671_v34, %v2098_v8  ;;  %v1133_v2 = vmul.f32 %v1671_v34, %v2100_v9  ;;  %v1137_v47 = vmul.f32 %v1671_v34, %v2102_v10 }
 0x1cd   : > { %v1675_v48 = vpop.eup %1674  ;;  %v1130_v49 = vmul.f32 %v1673_v40, %v2104_v12  ;;  %v1134_v50 = vmul.f32 %v1673_v40, %v2106_v13  ;;  %v1138_v4 = vmul.f32 %v1673_v40, %v2108_v14 }
 0x1ce   : > { %v1163_v51 = vmul.f32 %v1146_v32, %v1129_v42  ;;  %v1131_v8 = vmul.f32 %v1675_v48, %v2110_v24  ;;  %v1167_v52 = vmul.f32 %v1146_v32, %v1133_v2  ;;  %v1135_v53 = vmul.f32 %v1675_v48, %v2118_v18 }
 0x1cf   : > { %v1164_v38 = vmul.f32 %v1150_v35, %v1130_v49  ;;  %v1168_v9 = vmul.f32 %v1150_v35, %v1134_v50  ;;  %v1171_v54 = vmul.f32 %v1146_v32, %v1137_v47  ;;  %v1172_v10 = vmul.f32 %v1150_v35, %v1138_v4 }
 0x1d0   : > { %v1197_v55 = vadd.f32 %v1180_v33, %v1163_v51  ;;  %v1165_v12 = vmul.f32 %v2163_v36, %v1131_v8  ;;  %v1201_v39 = vadd.f32 %v1180_v33, %v1167_v52  ;;  %v1169_v15 = vmul.f32 %v2163_v36, %v1135_v53 }
 0x1d1   : > { %v1198_v41 = vadd.f32 %v1184_v26, %v1164_v38  ;;  %v1202_v13 = vadd.f32 %v1184_v26, %v1168_v9  ;;  %v1205_v56 = vadd.f32 %v1180_v33, %v1171_v54  ;;  %v1206_v14 = vadd.f32 %v1184_v26, %v1172_v10  ;;  %v1677_v59 = vpop.eup %1676 }
 0x1d2   : > { %vm1209_vm1 = vcmp.ge.f32.partialorder %v1197_v55, 0.0  ;;  %v1221_v57 = vmul.f32 0.2, %v1197_v55  ;;  %v1199_v24 = vadd.f32 %v2166_v37, %v1165_v12  ;;  %vm1213_vm2 = vcmp.ge.f32.partialorder %v1201_v39, 0.0 }
 0x1d3   : > { %vm1210_vm3 = vcmp.ge.f32.partialorder %v1198_v41, 0.0  ;;  %v1222_v18 = vmul.f32 0.2, %v1198_v41  ;;  %v1225_v58 = vmul.f32 0.2, %v1201_v39  ;;  %vm1214_vm4 = vcmp.ge.f32.partialorder %v1202_v13, 0.0 }
 0x1d4   : > { %v1233_v60 = vsel %vm1209_vm1, %v1197_v55, %v1221_v57  ;;  %vm1211_vm5 = vcmp.ge.f32.partialorder %v1199_v24, 0.0  ;;  %v1223_v61 = vmul.f32 0.2, %v1199_v24  ;;  %v1226_v62 = vmul.f32 0.2, %v1202_v13 }
 0x1d5   : > { %1245 = vst [vmem:[%s2254_s5] sm:$0xff] %v1233_v60  ;;  %v1234_v63 = vsel %vm1210_vm3, %v1198_v41, %v1222_v18  ;;  %v1132_v0 = vmul.f32 %v1677_v59, %v2138_v44  ;;  %v1237_v1 = vsel %vm1213_vm2, %v1201_v39, %v1225_v58  ;;  %v1203_v5 = vadd.f32 %v2166_v37, %v1169_v15 }
 0x1d6   : > { %1246 = vst [vmem:[%s2254_s5 + $0x8] sm:$0xff] %v1234_v63  ;;  %v1235_v6 = vsel %vm1211_vm5, %v1199_v24, %v1223_v61  ;;  %1249 = vst [vmem:[%s2254_s5 + $0x20] sm:$0xff] %v1237_v1  ;;  %v1238_v7 = vsel %vm1214_vm4, %v1202_v13, %v1226_v62  ;;  %v1136_v11 = vmul.f32 %v1677_v59, %v2141_v45  ;;  %vm1217_vm6 = vcmp.ge.f32.partialorder %v1205_v56, 0.0 }
 0x1d7   : > { %1247 = vst [vmem:[%s2254_s5 + $0x10] sm:$0xff] %v1235_v6  ;;  %v1166_v44 = vmul.f32 %v2170_v43, %v1132_v0  ;;  %1250 = vst [vmem:[%s2254_s5 + $0x28] sm:$0xff] %v1238_v7  ;;  %vm1215_vm7 = vcmp.ge.f32.partialorder %v1203_v5, 0.0  ;;  %v1227_v25 = vmul.f32 0.2, %v1203_v5  ;;  %vm1218_vm8 = vcmp.ge.f32.partialorder %v1206_v14, 0.0 }
 0x1d8   : > { %v1229_v16 = vmul.f32 0.2, %v1205_v56  ;;  %v1170_v17 = vmul.f32 %v2170_v43, %v1136_v11  ;;  %v1230_v19 = vmul.f32 0.2, %v1206_v14  ;;  %v1139_v45 = vmul.f32 %v1675_v48, %v2126_v22 }
 0x1d9   : > { %v1200_v20 = vadd.f32 %v2176_v3, %v1166_v44  ;;  %v1239_v21 = vsel %vm1215_vm7, %v1203_v5, %v1227_v25  ;;  %v1140_v28 = vmul.f32 %v1677_v59, %v2143_v46 }
 0x1da   : > { %v1241_v27 = vsel %vm1217_vm6, %v1205_v56, %v1229_v16  ;;  %1251 = vst [vmem:[%s2254_s5 + $0x30] sm:$0xff] %v1239_v21  ;;  %v1204_v29 = vadd.f32 %v2176_v3, %v1170_v17  ;;  %v1242_v23 = vsel %vm1218_vm8, %v1206_v14, %v1230_v19  ;;  %v1173_v30 = vmul.f32 %v2163_v36, %v1139_v45 }
 0x1db   : > { %1253 = vst [vmem:[%s2254_s5 + $0x40] sm:$0x3] %v1241_v27  ;;  %vm1212_vm9 = vcmp.ge.f32.partialorder %v1200_v20, 0.0  ;;  %v1224_v22 = vmul.f32 0.2, %v1200_v20  ;;  %v1174_v46 = vmul.f32 %v2170_v43, %v1140_v28 }
 0x1dc   : > { %1254 = vst [vmem:[%s2254_s5 + $0x48] sm:$0x3] %v1242_v23  ;;  %vm1216_vm10 = vcmp.ge.f32.partialorder %v1204_v29, 0.0  ;;  %v1228_v31 = vmul.f32 0.2, %v1204_v29  ;;  %v1207_v32 = vadd.f32 %v2166_v37, %v1173_v30 }
 0x1dd   : > { %v1236_v33 = vsel %vm1212_vm9, %v1200_v20, %v1224_v22  ;;  %v1208_v34 = vadd.f32 %v2176_v3, %v1174_v46 }
 0x1de   : > { %1248 = vst [vmem:[%s2254_s5 + $0x18] sm:$0xff] %v1236_v33  ;;  %v1240_v35 = vsel %vm1216_vm10, %v1204_v29, %v1228_v31  ;;  %vm1219_vm11 = vcmp.ge.f32.partialorder %v1207_v32, 0.0  ;;  %v1231_v26 = vmul.f32 0.2, %v1207_v32 }
 0x1df   : > { %1252 = vst [vmem:[%s2254_s5 + $0x38] sm:$0xff] %v1240_v35  ;;  %vm1220_vm12 = vcmp.ge.f32.partialorder %v1208_v34, 0.0  ;;  %v1232_v36 = vmul.f32 0.2, %v1208_v34 }
 0x1e0   : > { %v1243_v40 = vsel %vm1219_vm11, %v1207_v32, %v1231_v26 }
 0x1e1   : > { %1255 = vst [vmem:[%s2254_s5 + $0x50] sm:$0x3] %v1243_v40  ;;  %v1244_v37 = vsel %vm1220_vm12, %v1208_v34, %v1232_v36 }
 0x1e2   : > { %1256 = vst [vmem:[%s2254_s5 + $0x58] sm:$0x3] %v1244_v37 }
 0x1e3 PF: > { %s15_s22 = sadd.s32 1, %s1716_s22   ;;  %s2255_s18 = smov %s1704_s19 }
 0x1e4   : > { %p12_p12 = scmp.ge.s32.totalorder %s15_s22, 10   ;;  %s2256_s19 = smov %s1784_s26 }
 0x1e5   : > { %s2257_s20 = smov %s1712_s21  ;;  %s2258_s21 = smov %s2260_s23 }
 0x1e6   :  { %14 = sbr.rel (!%p12_p12) target bundleno = 3 (0x3), region = 109 }

// kernel: patch_discriminator.9
= control target key start
LH: loop header
LB: loop body
LE: loop exit
PB: predicated region body
PF: predicated region fallthrough
CT: control target
= control target key end

     0   :  { %s744_s12 = smov 0   ;;  %s746_s13 = smov 0   ;;  %s861_s0 = inlined_call_operand.vmem [shape: f32[8,8192], index: 0, kind: input, shape index: {}]   ;;  %s862_s1 = inlined_call_operand.vmem [shape: f32[8192,128], index: 1, kind: input, shape index: {}]   ;;  %s863_s2 = inlined_call_operand.vmem [shape: f32[1,128], index: 2, kind: input, shape index: {}]   ;;  %s864_s3 = inlined_call_operand.vmem [shape: f32[8,128], index: 3, kind: output, shape index: {}]  }
   0x1   :  { %s748_s14 = smov 0  }
   0x2 LB: > { %s22_s15 = sadd.s32 1, %s717_s13  ;;  %p529_p0 = scmp.ge.s32.totalorder %s721_s14, 1  ;;  %s721_s14 = sphi %s748_s14, %s13_s14   ;;  %s717_s13 = sphi %s746_s13, %s866_s13   ;;  %s713_s12 = sphi %s744_s12, %s865_s12  }
   0x3   : > { %p23_p1 = scmp.ge.s32.totalorder %s22_s15, 16  ;;  %p167_p2 = scmp.lt.s32.totalorder %s721_s14, 17 }
   0x5   : > { %s868_s15 = smov (%p23_p1, %s22_s15), 0  ;;  %p168_p3 = pnand %p529_p0, %p167_p2 }
   0x6   : > { %s530_s16 = sshll.u32 (!%p168_p3), %s713_s12, 2  ;;  %s532_s17 = sshll.u32 (!%p168_p3), %s713_s12, 6 }
   0x7   : > { %171 = sbr.rel (%p168_p3) target bundleno = 291 (0x123), region = 32  ;;  %p202_p4 = scmp.lt.s32.totalorder (!%p168_p3), %s530_s16, 63 }
   0x8   : > { %p210_p5 = scmp.lt.s32.totalorder (!%p168_p3), %s532_s17, 1023  ;;  %p534_p6 = scmp.ne.s32.totalorder (!%p168_p3), %s713_s12, 0 }
   0xe   : > { %s870_s16 = smov (!%p202_p4, %s530_s16), 63  ;;  %s872_s17 = smov (!%p210_p5, %s532_s17), 1023 }
   0xf   : > { %s531_s18 = sshll.u32 %s870_s16, 3  ;;  %s533_s22 = sshll.u32 %s872_s17, 3  ;;  %v723_v0 = vmov (!%p534_p6), 0.0  }
  0x10   : > { %s769_s21 = scalar_lea.vmem %s861_s0, %s531_s18  ;;  %s774_s25 = scalar_lea.vmem %s862_s1, %s533_s22  ;;  %223 = vst [vmem:[#allocation2] sm:$0xff] (!%p534_p6), %v723_v0 }
  0x11   : > { %222 = sbr.rel (%p534_p6) target bundleno = 24 (0x18), region = 36 }
  0x18 PF: > { %v245_v1 = vld [vmem:[%s774_s25 + $0x80] sm:$0xff]  ;;  %v246_v2 = vld [vmem:[%s774_s25 + $0x88] sm:$0xff]  ;;  %v247_v12 = vld [vmem:[%s774_s25 + $0x90] sm:$0xff]  ;;  %p535_p7 = scmp.ne.s32.totalorder %s713_s12, 15 }
  0x19   : > { %v277_v3 = vld [vmem:[%s774_s25 + $0x180] sm:$0xff]  ;;  %v610_v4 = vpack.c.bf16 %v246_v2, %v245_v1  ;;  %v278_v5 = vld [vmem:[%s774_s25 + $0x188] sm:$0xff]  ;;  %v248_v14 = vld [vmem:[%s774_s25 + $0x98] sm:$0xff] }
  0x1a   : > { %v229_v6 = vld [vmem:[%s774_s25] sm:$0xff]  ;;  %v230_v7 = vld [vmem:[%s774_s25 + $0x8] sm:$0xff]  ;;  %v642_v8 = vpack.c.bf16 %v278_v5, %v277_v3  ;;  %v279_v15 = vld [vmem:[%s774_s25 + $0x190] sm:$0xff]  ;;  %v614_v17 = vpack.c.bf16 %v248_v14, %v247_v12 }
  0x1b   : > { %v612_v9 = vpack.c.bf16 %v230_v7, %v229_v6  ;;  %v261_v10 = vld [vmem:[%s774_s25 + $0x100] sm:$0xff]  ;;  %v262_v11 = vld [vmem:[%s774_s25 + $0x108] sm:$0xff]  ;;  %611 = vmatprep.subr.bf16.mxu0 %v610_v4  ;;  %v280_v16 = vld [vmem:[%s774_s25 + $0x198] sm:$0xff] }
  0x1c   : > { %v644_v13 = vpack.c.bf16 %v262_v11, %v261_v10  ;;  %643 = vmatprep.subr.bf16.mxu1 %v642_v8  ;;  %v646_v18 = vpack.c.bf16 %v280_v16, %v279_v15  ;;  %v231_v19 = vld [vmem:[%s774_s25 + $0x10] sm:$0xff]  ;;  %v232_v20 = vld [vmem:[%s774_s25 + $0x18] sm:$0xff]  ;;  %v249_v24 = vld [vmem:[%s774_s25 + $0xa0] sm:$0xff] }
  0x1d   : > { %613 = vmatpush3.bf16.msra.mxu0 %v612_v9  ;;  %v263_v21 = vld [vmem:[%s774_s25 + $0x110] sm:$0xff]  ;;  %v616_v22 = vpack.c.bf16 %v232_v20, %v231_v19  ;;  %v264_v23 = vld [vmem:[%s774_s25 + $0x118] sm:$0xff]  ;;  %v250_v25 = vld [vmem:[%s774_s25 + $0xa8] sm:$0xff] }
  0x1e   : > { %645 = vmatpush3.bf16.msra.mxu1 %v644_v13  ;;  %615 = vmatprep.subr.bf16.mxu0 %v614_v17  ;;  %v648_v26 = vpack.c.bf16 %v264_v23, %v263_v21  ;;  %v618_v27 = vpack.c.bf16 %v250_v25, %v249_v24  ;;  %v281_v28 = vld [vmem:[%s774_s25 + $0x1a0] sm:$0xff]  ;;  %v282_v29 = vld [vmem:[%s774_s25 + $0x1a8] sm:$0xff]  ;;  %v251_v36 = vld [vmem:[%s774_s25 + $0xb0] sm:$0xff] }
  0x1f   : > { %647 = vmatprep.subr.bf16.mxu1 %v646_v18  ;;  %v233_v30 = vld [vmem:[%s774_s25 + $0x20] sm:$0xff]  ;;  %v650_v31 = vpack.c.bf16 %v282_v29, %v281_v28  ;;  %v234_v32 = vld [vmem:[%s774_s25 + $0x28] sm:$0xff]  ;;  %v252_v37 = vld [vmem:[%s774_s25 + $0xb8] sm:$0xff] }
  0x20   : > { %v265_v33 = vld [vmem:[%s774_s25 + $0x120] sm:$0xff]  ;;  %v266_v34 = vld [vmem:[%s774_s25 + $0x128] sm:$0xff]  ;;  %v620_v35 = vpack.c.bf16 %v234_v32, %v233_v30  ;;  %v283_v38 = vld [vmem:[%s774_s25 + $0x1b0] sm:$0xff]  ;;  %v622_v40 = vpack.c.bf16 %v252_v37, %v251_v36 }
  0x21   : > { %617 = vmatpush3.bf16.msra.mxu0 %v616_v22  ;;  %v652_v39 = vpack.c.bf16 %v266_v34, %v265_v33  ;;  %v284_v41 = vld [vmem:[%s774_s25 + $0x1b8] sm:$0xff]  ;;  %v235_v42 = vld [vmem:[%s774_s25 + $0x30] sm:$0xff]  ;;  %v253_v47 = vld [vmem:[%s774_s25 + $0xc0] sm:$0xff] }
  0x22   : > { %649 = vmatpush3.bf16.msra.mxu1 %v648_v26  ;;  %619 = vmatprep.subr.bf16.mxu0 %v618_v27  ;;  %v236_v43 = vld [vmem:[%s774_s25 + $0x38] sm:$0xff]  ;;  %v654_v44 = vpack.c.bf16 %v284_v41, %v283_v38  ;;  %v267_v45 = vld [vmem:[%s774_s25 + $0x130] sm:$0xff]  ;;  %v254_v48 = vld [vmem:[%s774_s25 + $0xc8] sm:$0xff] }
  0x23   : > { %651 = vmatprep.subr.bf16.mxu1 %v650_v31  ;;  %v268_v46 = vld [vmem:[%s774_s25 + $0x138] sm:$0xff]  ;;  %v285_v49 = vld [vmem:[%s774_s25 + $0x1c0] sm:$0xff]  ;;  %v286_v50 = vld [vmem:[%s774_s25 + $0x1c8] sm:$0xff]  ;;  %v624_v51 = vpack.c.bf16 %v236_v43, %v235_v42  ;;  %v626_v53 = vpack.c.bf16 %v254_v48, %v253_v47 }
  0x24   : > { %v656_v52 = vpack.c.bf16 %v268_v46, %v267_v45  ;;  %v237_v54 = vld [vmem:[%s774_s25 + $0x40] sm:$0xff]  ;;  %v238_v55 = vld [vmem:[%s774_s25 + $0x48] sm:$0xff]  ;;  %v658_v57 = vpack.c.bf16 %v286_v50, %v285_v49  ;;  %v255_v59 = vld [vmem:[%s774_s25 + $0xd0] sm:$0xff] }
  0x25   : > { %621 = vmatpush3.bf16.msra.mxu0 %v620_v35  ;;  %v269_v56 = vld [vmem:[%s774_s25 + $0x140] sm:$0xff]  ;;  %v270_v58 = vld [vmem:[%s774_s25 + $0x148] sm:$0xff]  ;;  %v256_v60 = vld [vmem:[%s774_s25 + $0xd8] sm:$0xff]  ;;  %v628_v63 = vpack.c.bf16 %v238_v55, %v237_v54 }
  0x26   : > { %653 = vmatpush3.bf16.msra.mxu1 %v652_v39  ;;  %623 = vmatprep.subr.bf16.mxu0 %v622_v40  ;;  %v287_v61 = vld [vmem:[%s774_s25 + $0x1d0] sm:$0xff]  ;;  %v288_v62 = vld [vmem:[%s774_s25 + $0x1d8] sm:$0xff]  ;;  %v660_v0 = vpack.c.bf16 %v270_v58, %v269_v56  ;;  %v630_v1 = vpack.c.bf16 %v256_v60, %v255_v59  ;;  %v257_v7 = vld [vmem:[%s774_s25 + $0xe0] sm:$0xff] }
  0x27   : > { %655 = vmatprep.subr.bf16.mxu1 %v654_v44  ;;  %v239_v2 = vld [vmem:[%s774_s25 + $0x50] sm:$0xff]  ;;  %v240_v3 = vld [vmem:[%s774_s25 + $0x58] sm:$0xff]  ;;  %v662_v5 = vpack.c.bf16 %v288_v62, %v287_v61  ;;  %v258_v8 = vld [vmem:[%s774_s25 + $0xe8] sm:$0xff] }
  0x28   : > { %v271_v4 = vld [vmem:[%s774_s25 + $0x150] sm:$0xff]  ;;  %v272_v6 = vld [vmem:[%s774_s25 + $0x158] sm:$0xff]  ;;  %v289_v9 = vld [vmem:[%s774_s25 + $0x1e0] sm:$0xff]  ;;  %v632_v11 = vpack.c.bf16 %v240_v3, %v239_v2  ;;  %v634_v15 = vpack.c.bf16 %v258_v8, %v257_v7 }
  0x29   : > { %625 = vmatpush3.bf16.msra.mxu0 %v624_v51  ;;  %v290_v10 = vld [vmem:[%s774_s25 + $0x1e8] sm:$0xff]  ;;  %v241_v12 = vld [vmem:[%s774_s25 + $0x60] sm:$0xff]  ;;  %v664_v14 = vpack.c.bf16 %v272_v6, %v271_v4  ;;  %v228_v18 = vld [vmem:[%s769_s21 + $0x18] sm:$0xff] }
  0x2a   : > { %657 = vmatpush3.bf16.msra.mxu1 %v656_v52  ;;  %627 = vmatprep.subr.bf16.mxu0 %v626_v53  ;;  %v242_v13 = vld [vmem:[%s774_s25 + $0x68] sm:$0xff]  ;;  %v273_v16 = vld [vmem:[%s774_s25 + $0x160] sm:$0xff]  ;;  %v666_v19 = vpack.c.bf16 %v290_v10, %v289_v9  ;;  %v259_v21 = vld [vmem:[%s774_s25 + $0xf0] sm:$0xff] }
  0x2b   : > { %659 = vmatprep.subr.bf16.mxu1 %v658_v57  ;;  %v226_v17 = vld [vmem:[%s769_s21 + $0x8] sm:$0xff]  ;;  %v260_v22 = vld [vmem:[%s774_s25 + $0xf8] sm:$0xff]  ;;  %v291_v23 = vld [vmem:[%s774_s25 + $0x1f0] sm:$0xff]  ;;  %427 = vmatprep.mubr.f32.mxu1 %v228_v18  ;;  %v636_v25 = vpack.c.bf16 %v242_v13, %v241_v12 }
  0x2c   : > { %v274_v20 = vld [vmem:[%s774_s25 + $0x168] sm:$0xff]  ;;  %357 = vmatprep.mubr.f32.mxu0 %v226_v17  ;;  %v292_v24 = vld [vmem:[%s774_s25 + $0x1f8] sm:$0xff]  ;;  %v638_v27 = vpack.c.bf16 %v260_v22, %v259_v21  ;;  %v243_v28 = vld [vmem:[%s774_s25 + $0x70] sm:$0xff] }
  0x2d   : > { %629 = vmatpush3.bf16.msra.mxu0 %v628_v63  ;;  %v668_v26 = vpack.c.bf16 %v274_v20, %v273_v16  ;;  %v244_v29 = vld [vmem:[%s774_s25 + $0x78] sm:$0xff]  ;;  %v670_v30 = vpack.c.bf16 %v292_v24, %v291_v23  ;;  %v275_v31 = vld [vmem:[%s774_s25 + $0x170] sm:$0xff]  ;;  %v225_v35 = vld [vmem:[%s769_s21] sm:$0xff] }
  0x2e   : > { %661 = vmatpush3.bf16.msra.mxu1 %v660_v0  ;;  %631 = vmatprep.subr.bf16.mxu0 %v630_v1  ;;  %v276_v32 = vld [vmem:[%s774_s25 + $0x178] sm:$0xff]  ;;  %v640_v33 = vpack.c.bf16 %v244_v29, %v243_v28  ;;  %v227_v36 = vld [vmem:[%s769_s21 + $0x10] sm:$0xff]  ;;  %v224_v43 = vld [vmem:[#allocation2] sm:$0xff] }
  0x2f   : > { %663 = vmatprep.subr.bf16.mxu1 %v662_v5  ;;  %v672_v34 = vpack.c.bf16 %v276_v32, %v275_v31  ;;  %v536_v47 = vld [vmem:[%s863_s2] ss:$0 sm:$0xff] (!%p535_p7) }
  0x31   : > { %633 = vmatpush3.bf16.msra.mxu0 %v632_v11 }
  0x32   : > { %665 = vmatpush3.bf16.msra.mxu1 %v664_v14  ;;  %635 = vmatprep.subr.bf16.mxu0 %v634_v15 }
  0x33   : > { %667 = vmatprep.subr.bf16.mxu1 %v666_v19 }
  0x35   : > { %637 = vmatpush3.bf16.msra.mxu0 %v636_v25 }
  0x36   : > { %669 = vmatpush3.bf16.msra.mxu1 %v668_v26  ;;  %639 = vmatprep.subr.bf16.mxu0 %v638_v27 }
  0x37   : > { %671 = vmatprep.subr.bf16.mxu1 %v670_v30 }
  0x39   : > { %641 = vmatpush3.bf16.msra.mxu0 %v640_v33 }
  0x3a   : > { %673 = vmatpush3.bf16.msra.mxu1 %v672_v34 }
  0x3c   : > { %358 = vmatmul.mubr.f32.vlgmr.msra.gmra.mrb[0].mxu0 %v225_v35 }
  0x3d   : > { %428 = vmatmul.mubr.f32.vlgmr.msra.gmra.mrb[0].mxu1 %v227_v36 }
 0x10f   : > { %v572_v37 = vpop.f32.mrb[0].mxu0 }
 0x110   : > { %v607_v38 = vpop.f32.mrb[0].mxu1  ;;  %v573_v39 = vpop.f32.mrb[1].mxu0 }
 0x111   : > { %v574_v40 = vadd.f32 %v573_v39, %v572_v37  ;;  %v608_v41 = vpop.f32.mrb[1].mxu1 }
 0x112   : > { %v609_v42 = vadd.f32 %v608_v41, %v607_v38  ;;  %438 = sbr.rel (%p535_p7) target bundleno = 291 (0x123), region = 40 }
 0x114   : > { %v430_v44 = vadd.f32 %v609_v42, %v574_v40 }
 0x116   : > { %v433_v45 = vadd.f32 %v430_v44, %v224_v43 }
 0x118   : > { %434 = vst [vmem:[#allocation2] sm:$0xff] %v433_v45 }
 0x11f   : > { %v439_v46 = vld [vmem:[#allocation2] sm:$0xff] }
 0x120   : > { %v447_v48 = vadd.f32 %v536_v47, %v439_v46 }
 0x122   : > { %448 = vst [vmem:[%s864_s3] sm:$0xff] %v447_v48 }
 0x123 PF: > { %s13_s14 = sadd.s32 1, %s721_s14   ;;  %s865_s12 = smov %s717_s13 }
 0x124   : > { %p10_p8 = scmp.ge.s32.totalorder %s13_s14, 18   ;;  %s866_s13 = smov %s868_s15 }
 0x126   :  { %12 = sbr.rel (!%p10_p8) target bundleno = 2 (0x2), region = 73 }

</bundles_post_ra>
